<compile_context>
chip_gen: v7x
topology: tpu7x:2x2x1
jax: 0.10.0
libtpu: 0.0.40
codegen_flags: <defaults>
</compile_context>

<pallas_src>
import numpy as np

import jax
import jax.numpy as jnp
from jax.experimental import pallas as pl
from jax.experimental.pallas import tpu as pltpu

VMEM_SPEC = pl.BlockSpec(memory_space=pltpu.MemorySpace.VMEM)


# ------------------------------ XLA-side glue ---------------------------------

def im2col_4x4_s2_p1_nhwc(x):
    """x: (B, H, W, C) -> patches (B*Ho*Wo, 16*C), feature order (kh, kw, c).

    Only used for the FIRST FeatureLayer (input is ~2 KiB); all later layers do
    their im2col inside the fused kernel via selection matmuls."""
    B, H, W, C = x.shape
    Ho = (H + 2 - 4) // 2 + 1
    Wo = (W + 2 - 4) // 2 + 1
    xp = jnp.pad(x, ((0, 0), (1, 1), (1, 1), (0, 0)))
    cols = []
    for kh in range(4):
        for kw in range(4):
            cols.append(xp[:, kh:kh + 2 * (Ho - 1) + 1:2,
                           kw:kw + 2 * (Wo - 1) + 1:2, :])
    patches = jnp.stack(cols, axis=3)            # (B, Ho, Wo, 16, C)
    return patches.reshape(B * Ho * Wo, 16 * C), Ho, Wo


# --------------------------- fused forward kernel -----------------------------

def _make_fused_kernel(n_conv_layers, n_taps_list, rows_list,
                       n_hidden, n_flows, B, C):
    """One kernel for embedder + dense encoder + whole conditional flow."""

    def kernel(*refs):
        it = iter(refs)
        patches1 = next(it)
        x_ref = next(it)
        w1 = next(it); loc1 = next(it); scale1 = next(it)
        conv_layers = [(next(it), next(it), next(it), next(it))
                       for _ in range(n_conv_layers)]          # (S, W, loc, scale)
        wd = next(it); bd = next(it)
        w0xa = next(it); w0e = next(it); b0 = next(it)
        wh, bh = [], []
        for _ in range(n_hidden):
            wh.append(next(it)); bh.append(next(it))
        wf = next(it); bfin = next(it)
        an_loc = next(it); an_scale = next(it)
        p_final = next(it); an_ld = next(it)
        o_ref = next(it); ld_ref = next(it)

        def actnorm_lrelu(acc, loc_r, scale_r, slope):
            y = scale_r[...] * (acc + loc_r[...])
            return jnp.where(y >= 0.0, y, slope * y)

        # ----------------------------- Embedder -------------------------------
        # FeatureLayer 1: conv as matmul on pre-built patches.
        y = jnp.dot(patches1[...].astype(jnp.bfloat16), w1[...],
                    preferred_element_type=jnp.float32)
        y = actnorm_lrelu(y, loc1, scale1, 0.2)

        # FeatureLayers 2..n_down: selection matmul (im2col) + per-tap matmuls.
        for li, (S, W, loc_r, scale_r) in enumerate(conv_layers):
            rows = rows_list[li]
            P = jnp.dot(S[...], y.astype(jnp.bfloat16),
                        preferred_element_type=jnp.float32).astype(jnp.bfloat16)
            acc = jnp.dot(P[0:rows, :], W[0], preferred_element_type=jnp.float32)
            for t in range(1, n_taps_list[li]):
                acc = acc + jnp.dot(P[t * rows:(t + 1) * rows, :], W[t],
                                    preferred_element_type=jnp.float32)
            y = actnorm_lrelu(acc, loc_r, scale_r, 0.2)

        # DenseEncoderLayer (1x1 bottleneck): plain linear -> embedding (B, C).
        emb_bf = (jnp.dot(y.astype(jnp.bfloat16), wd[...],
                          preferred_element_type=jnp.float32)
                  + bd[...]).astype(jnp.bfloat16)

        # --------------------------- ConditionalFlow --------------------------
        # Shuffles + half-swaps are folded into the (pre-permuted) parameters;
        # the carried `h` stays in the original channel layout until the final
        # permutation matmul.
        h = x_ref[...]                                   # (B, C) f32
        ld = jnp.zeros((B, 1), jnp.float32) + an_ld[...]  # ActNorm logdet const

        for fb in range(n_flows):
            # ActNorm + InvLeakyRelu(0.9) (logdet 0).
            hh = an_scale[fb] * (h + an_loc[fb])
            h = jnp.where(hh >= 0.0, hh, 0.9 * hh)

            for j in range(2):
                idx = fb * 2 + j
                # Fused s/t MLP; conditioner selection is baked into the
                # zero-padded layer-0 rows, target selection into the final
                # layer's zero-padded columns.
                u = (jnp.dot(h.astype(jnp.bfloat16), w0xa[idx],
                             preferred_element_type=jnp.float32)
                     + jnp.dot(emb_bf, w0e[idx],
                               preferred_element_type=jnp.float32)
                     + b0[idx])
                u = jnp.where(u >= 0.0, u, 0.01 * u)
                for hl in range(n_hidden):
                    u = jnp.dot(u.astype(jnp.bfloat16), wh[hl][idx],
                                preferred_element_type=jnp.float32) + bh[hl][idx]
                    u = jnp.where(u >= 0.0, u, 0.01 * u)
                st = jnp.dot(u.astype(jnp.bfloat16), wf[idx],
                             preferred_element_type=jnp.float32) + bfin[idx]
                s = jnp.tanh(st[:, :C])                  # zero at non-targets
                t = st[:, C:]                            # zero at non-targets
                h = h * jnp.exp(s) + t                   # untouched chans exact
                ld = ld + jnp.sum(s, axis=1, keepdims=True)

        o_ref[...] = jnp.dot(h, p_final[...], preferred_element_type=jnp.float32)
        ld_ref[...] = ld

    return kernel


def conditional_transformer_forward(params, x, conditioning):
    emb_p = params["emb"]
    flow_p = params["flow"]
    B, C = x.shape[0], x.shape[1]
    x2 = x.reshape(B, C)

    cond_nhwc = jnp.transpose(conditioning, (0, 2, 3, 1))
    patches1, _, _ = im2col_4x4_s2_p1_nhwc(cond_nhwc)

    layers = emb_p["layers"]
    n_taps_list = [int(l["W"].shape[0]) for l in layers]
    rows_list = [int(l["S"].shape[0]) // t for l, t in zip(layers, n_taps_list)]
    assert layers[0]["S"].shape[1] == patches1.shape[0], "batch mismatch vs pack"
    n_hidden = len(flow_p["wh"])
    n_flows = int(flow_p["an_loc"].shape[0])

    args = [patches1, x2, emb_p["w1"], emb_p["loc1"], emb_p["scale1"]]
    for l in layers:
        args += [l["S"], l["W"], l["loc"], l["scale"]]
    args += [emb_p["wd"], emb_p["bd"],
             flow_p["w0xa"], flow_p["w0e"], flow_p["b0"]]
    for wli, bli in zip(flow_p["wh"], flow_p["bh"]):
        args += [wli, bli]
    args += [flow_p["wf"], flow_p["bf"], flow_p["an_loc"], flow_p["an_scale"],
             flow_p["p_final"], flow_p["an_logdet"]]

    kernel = _make_fused_kernel(len(layers), n_taps_list, rows_list,
                                n_hidden, n_flows, B, C)
    out, ld = pl.pallas_call(
        kernel,
        out_shape=(jax.ShapeDtypeStruct((B, C), jnp.float32),
                   jax.ShapeDtypeStruct((B, 1), jnp.float32)),
        in_specs=[VMEM_SPEC] * len(args),
        out_specs=(VMEM_SPEC, VMEM_SPEC),
    )(*args)
    return out.reshape(B, C, 1, 1), ld[:, 0]


# ------------------------ parameter creation (PyTorch layout) -----------------

def _normal(key, shape, std):
    return std * jax.random.normal(key, shape, dtype=jnp.float32)


def init_params(key, cfg):
    """PyTorch-layout parameters (what a real checkpoint would hold)."""
    C = cfg["in_channels"]
    Cemb = C                       # embedding_channels = args.in_channels
    hid = cfg["mid_channels"]
    depth = cfg["hidden_depth"]
    n_flows = cfg["n_flows"]
    n_down = cfg["n_down"]
    cond_ch = cfg["conditioning_in_ch"]
    sp = cfg["conditioning_spatial_size"]
    bottleneck = sp // (2 ** n_down)

    keys = iter(jax.random.split(key, 4096))
    params = {}

    feats = []
    in_ch = cond_ch
    for s in range(n_down):
        out_ch = 64 * min(2 ** s, 16)
        feats.append({
            "w": _normal(next(keys), (out_ch, in_ch, 4, 4),
                         1.0 / (in_ch * 16) ** 0.5),
            "loc": _normal(next(keys), (out_ch,), 0.1),
            "scale": 1.0 + _normal(next(keys), (out_ch,), 0.1),
        })
        in_ch = out_ch
    params["feature_layers"] = feats

    params["dense_encode"] = {
        "w": _normal(next(keys), (C, in_ch, bottleneck, bottleneck),
                     1.0 / (in_ch * bottleneck * bottleneck) ** 0.5),
        "b": _normal(next(keys), (C,), 0.1),
    }

    half = C // 2
    mlp_dims = [half + Cemb] + [hid] * (depth + 1) + [half]
    flows = []
    for _ in range(n_flows):
        blk = {
            "an_loc": _normal(next(keys), (C,), 0.1),
            "an_scale": 1.0 + _normal(next(keys), (C,), 0.1),
        }
        for name in ("s", "t"):
            nets = []
            for _j in range(2):
                ws, bs = [], []
                for li in range(len(mlp_dims) - 1):
                    ws.append(_normal(next(keys),
                                      (mlp_dims[li], mlp_dims[li + 1]), 0.05))
                    bs.append(_normal(next(keys), (mlp_dims[li + 1],), 0.05))
                nets.append({"w": ws, "b": bs})
            blk[name] = nets
        blk["perm"] = jax.random.permutation(next(keys),
                                             jnp.arange(C, dtype=jnp.int32))
        flows.append(blk)
    params["flow"] = flows
    return params


# ------------------------------- packing --------------------------------------

def _build_selection(B, Hi, Wi):
    """0/1 selection matrix implementing 4x4/s2/p1 im2col for a (B,Hi,Wi,*)
    input laid out as (B*Hi*Wi, C).  Taps that never see valid input pixels are
    dropped (this removes 12/16 taps -> 4x less weight for a 2x2 input)."""
    Ho, Wo = Hi // 2, Wi // 2
    taps, blocks = [], []
    for kh in range(4):
        for kw in range(4):
            blk = np.zeros((B * Ho * Wo, B * Hi * Wi), np.float32)
            valid = False
            for b in range(B):
                for oh in range(Ho):
                    ih = 2 * oh - 1 + kh
                    if not (0 <= ih < Hi):
                        continue
                    for ow in range(Wo):
                        iw = 2 * ow - 1 + kw
                        if 0 <= iw < Wi:
                            blk[b * Ho * Wo + oh * Wo + ow,
                                b * Hi * Wi + ih * Wi + iw] = 1.0
                            valid = True
            if valid:
                taps.append((kh, kw))
                blocks.append(blk)
    return np.concatenate(blocks, axis=0), taps, Ho, Wo


def pack_params(raw, cfg, batch_size):
    """Convert PyTorch-layout params to the fused-kernel layout.

    * Embedder conv weights become per-tap (Cin, Cout) bf16 slices plus
      precomputed selection matrices (batch-block-diagonal).
    * Flow: s/t nets fused into one MLP per coupling; channel Shuffle and the
      coupling half-swap folded into parameter row/column permutations;
      ActNorm logdet precomputed."""
    C = cfg["in_channels"]
    hid = cfg["mid_channels"]
    sp = cfg["conditioning_spatial_size"]
    B = batch_size

    # ------------------------------ embedder ----------------------------------
    fls = raw["feature_layers"]
    w1 = np.asarray(fls[0]["w"])                      # (C1, Cin, 4, 4)
    C1 = w1.shape[0]
    w1_mat = np.transpose(w1, (2, 3, 1, 0)).reshape(-1, C1)   # (16*Cin, C1)
    emb_p = {
        "w1": jnp.asarray(w1_mat, jnp.bfloat16),
        "loc1": jnp.asarray(np.asarray(fls[0]["loc"]).reshape(1, C1), jnp.float32),
        "scale1": jnp.asarray(np.asarray(fls[0]["scale"]).reshape(1, C1),
                              jnp.float32),
        "layers": [],
    }
    Hi = Wi = sp // 2
    for fl in fls[1:]:
        w = np.asarray(fl["w"])                       # (Cout, Cin, 4, 4)
        Cout = w.shape[0]
        S, taps, Ho, Wo = _build_selection(B, Hi, Wi)
        W_taps = np.stack([w[:, :, kh, kw].T for (kh, kw) in taps], axis=0)
        emb_p["layers"].append({
            "S": jnp.asarray(S, jnp.bfloat16),
            "W": jnp.asarray(W_taps, jnp.bfloat16),
            "loc": jnp.asarray(np.asarray(fl["loc"]).reshape(1, Cout), jnp.float32),
            "scale": jnp.asarray(np.asarray(fl["scale"]).reshape(1, Cout),
                                 jnp.float32),
        })
        Hi, Wi = Ho, Wo
    assert Hi == 1 and Wi == 1, "fused kernel assumes a 1x1 bottleneck"

    dw = np.asarray(raw["dense_encode"]["w"])         # (emb, in_ch, 1, 1)
    emb_dim = dw.shape[0]
    dw_mat = np.transpose(dw, (2, 3, 1, 0)).reshape(-1, emb_dim)
    emb_p["wd"] = jnp.asarray(dw_mat, jnp.bfloat16)
    emb_p["bd"] = jnp.asarray(
        np.asarray(raw["dense_encode"]["b"]).reshape(1, emb_dim), jnp.float32)

    # -------------------------------- flow ------------------------------------
    flows = raw["flow"]
    half = C // 2
    n_linear = len(flows[0]["s"][0]["w"])
    n_hidden = n_linear - 2

    sigma = np.arange(C)          # logical channel c lives at physical sigma[c]
    w0xa_l, w0e_l, b0_l = [], [], []
    wh_l = [[] for _ in range(n_hidden)]
    bh_l = [[] for _ in range(n_hidden)]
    wf_l, bf_l = [], []
    an_loc_l, an_scale_l = [], []
    an_logdet = 0.0

    for blk in flows:
        loc = np.asarray(blk["an_loc"])
        scale = np.asarray(blk["an_scale"])
        loc_p = np.zeros(C, np.float32)
        scale_p = np.ones(C, np.float32)
        loc_p[sigma] = loc
        scale_p[sigma] = scale
        an_loc_l.append(loc_p.reshape(1, C))
        an_scale_l.append(scale_p.reshape(1, C))
        an_logdet += float(np.sum(np.log(np.abs(scale))))

        for j in range(2):
            pos_cond = sigma[:half] if j == 0 else sigma[half:]
            pos_tgt = sigma[half:] if j == 0 else sigma[:half]
            s_net, t_net = blk["s"][j], blk["t"][j]

            ws0 = np.asarray(s_net["w"][0]); wt0 = np.asarray(t_net["w"][0])
            W0xa = np.zeros((C, 2 * hid), np.float32)
            W0xa[pos_cond, :hid] = ws0[:half]
            W0xa[pos_cond, hid:] = wt0[:half]
            W0e = np.concatenate([ws0[half:], wt0[half:]], axis=1)
            b0v = np.concatenate([np.asarray(s_net["b"][0]),
                                  np.asarray(t_net["b"][0])]).reshape(1, 2 * hid)
            w0xa_l.append(W0xa); w0e_l.append(W0e); b0_l.append(b0v)

            for li in range(1, n_linear - 1):
                wsl = np.asarray(s_net["w"][li]); wtl = np.asarray(t_net["w"][li])
                Wh = np.zeros((2 * hid, 2 * hid), np.float32)
                Wh[:hid, :hid] = wsl
                Wh[hid:, hid:] = wtl
                bhv = np.concatenate([np.asarray(s_net["b"][li]),
                                      np.asarray(t_net["b"][li])]).reshape(1, 2 * hid)
                wh_l[li - 1].append(Wh); bh_l[li - 1].append(bhv)

            wsf = np.asarray(s_net["w"][-1]); wtf = np.asarray(t_net["w"][-1])
            WF = np.zeros((2 * hid, 2 * C), np.float32)
            WF[:hid, pos_tgt] = wsf
            WF[hid:, C + pos_tgt] = wtf
            bF = np.zeros((1, 2 * C), np.float32)
            bF[0, pos_tgt] = np.asarray(s_net["b"][-1])
            bF[0, C + pos_tgt] = np.asarray(t_net["b"][-1])
            wf_l.append(WF); bf_l.append(bF)

        # Double-coupling half-swap followed by the Shuffle, folded into sigma.
        perm = np.asarray(blk["perm"])
        sigma = sigma[(perm + half) % C]

    p_final = np.zeros((C, C), np.float32)
    p_final[sigma, np.arange(C)] = 1.0

    flow_p = {
        "w0xa": jnp.asarray(np.stack(w0xa_l), jnp.bfloat16),
        "w0e": jnp.asarray(np.stack(w0e_l), jnp.bfloat16),
        "b0": jnp.asarray(np.stack(b0_l), jnp.float32),
        "wh": [jnp.asarray(np.stack(w), jnp.bfloat16) for w in wh_l],
        "bh": [jnp.asarray(np.stack(b), jnp.float32) for b in bh_l],
        "wf": jnp.asarray(np.stack(wf_l), jnp.bfloat16),
        "bf": jnp.asarray(np.stack(bf_l), jnp.float32),
        "an_loc": jnp.asarray(np.stack(an_loc_l), jnp.float32),
        "an_scale": jnp.asarray(np.stack(an_scale_l), jnp.float32),
        "p_final": jnp.asarray(p_final, jnp.float32),
        "an_logdet": jnp.full((1, 1), an_logdet, jnp.float32),
    }
    return {"emb": emb_p, "flow": flow_p}


# ----------------------------------- main --------------------------------------

if __name__ == "__main__":
    cfg = dict(
        in_channels=16,
        mid_channels=32,
        hidden_depth=2,
        n_flows=2,
        conditioning_spatial_size=16,
        conditioning_in_ch=1,
        n_down=4,
    )
    key = jax.random.PRNGKey(0)
    kp, kx, kc = jax.random.split(key, 3)
    raw_params = init_params(kp, cfg)
    params = pack_params(raw_params, cfg, batch_size=2)

    x = jax.random.normal(kx, (2, cfg["in_channels"], 1, 1), dtype=jnp.float32)
    conditioning = jax.random.normal(
        kc,
        (2, cfg["conditioning_in_ch"], cfg["conditioning_spatial_size"],
         cfg["conditioning_spatial_size"]),
        dtype=jnp.float32,
    )

    fwd = jax.jit(conditional_transformer_forward)
    out, logdet = fwd(params, x, conditioning)
    jax.block_until_ready((out, logdet))

    assert out.shape == (2, cfg["in_channels"], 1, 1), out.shape
    assert logdet.shape == (2,), logdet.shape
    assert bool(jnp.all(jnp.isfinite(out))) and bool(jnp.all(jnp.isfinite(logdet)))
    print("KERNEL_OK")
</pallas_src>

<mosaic_0001>
module attributes {stable_mosaic.version = 11 : i64} {
  func.func @kernel(%arg0: memref<128x16xf32, #tpu.memory_space<vmem>>, %arg1: memref<2x16xf32, #tpu.memory_space<vmem>>, %arg2: memref<16x64xbf16, #tpu.memory_space<vmem>>, %arg3: memref<1x64xf32, #tpu.memory_space<vmem>>, %arg4: memref<1x64xf32, #tpu.memory_space<vmem>>, %arg5: memref<512x128xbf16, #tpu.memory_space<vmem>>, %arg6: memref<16x64x128xbf16, #tpu.memory_space<vmem>>, %arg7: memref<1x128xf32, #tpu.memory_space<vmem>>, %arg8: memref<1x128xf32, #tpu.memory_space<vmem>>, %arg9: memref<128x32xbf16, #tpu.memory_space<vmem>>, %arg10: memref<16x128x256xbf16, #tpu.memory_space<vmem>>, %arg11: memref<1x256xf32, #tpu.memory_space<vmem>>, %arg12: memref<1x256xf32, #tpu.memory_space<vmem>>, %arg13: memref<8x8xbf16, #tpu.memory_space<vmem>>, %arg14: memref<4x256x512xbf16, #tpu.memory_space<vmem>>, %arg15: memref<1x512xf32, #tpu.memory_space<vmem>>, %arg16: memref<1x512xf32, #tpu.memory_space<vmem>>, %arg17: memref<512x16xbf16, #tpu.memory_space<vmem>>, %arg18: memref<1x16xf32, #tpu.memory_space<vmem>>, %arg19: memref<4x16x64xbf16, #tpu.memory_space<vmem>>, %arg20: memref<4x16x64xbf16, #tpu.memory_space<vmem>>, %arg21: memref<4x1x64xf32, #tpu.memory_space<vmem>>, %arg22: memref<4x64x64xbf16, #tpu.memory_space<vmem>>, %arg23: memref<4x1x64xf32, #tpu.memory_space<vmem>>, %arg24: memref<4x64x64xbf16, #tpu.memory_space<vmem>>, %arg25: memref<4x1x64xf32, #tpu.memory_space<vmem>>, %arg26: memref<4x64x32xbf16, #tpu.memory_space<vmem>>, %arg27: memref<4x1x32xf32, #tpu.memory_space<vmem>>, %arg28: memref<2x1x16xf32, #tpu.memory_space<vmem>>, %arg29: memref<2x1x16xf32, #tpu.memory_space<vmem>>, %arg30: memref<16x16xf32, #tpu.memory_space<vmem>>, %arg31: memref<1x1xf32, #tpu.memory_space<vmem>>, %arg32: memref<2x16xf32, #tpu.memory_space<vmem>>, %arg33: memref<2x1xf32, #tpu.memory_space<vmem>>) attributes {dimension_semantics = [], scalar_prefetch = 0 : i64, scratch_operands = 0 : i64, tpu.core_type = #tpu.core_type<tc>} {
    %c0 = arith.constant 0 : index
    %c0_0 = arith.constant 0 : index
    %0 = vector.load %arg0[%c0, %c0_0] : memref<128x16xf32, #tpu.memory_space<vmem>>, vector<128x16xf32>
    %1 = arith.truncf %0 : vector<128x16xf32> to vector<128x16xbf16>
    %c0_1 = arith.constant 0 : index
    %c0_2 = arith.constant 0 : index
    %2 = vector.load %arg2[%c0_1, %c0_2] : memref<16x64xbf16, #tpu.memory_space<vmem>>, vector<16x64xbf16>
    %cst = arith.constant dense<0.000000e+00> : vector<128x64xf32>
    %3 = tpu.matmul %1, %2, %cst {dimension_numbers = #tpu.dot_dimension_numbers<[1], [0], [0], [1], [0, 0, 1, 1], [], []>} : vector<128x16xbf16>, vector<16x64xbf16>, vector<128x64xf32> -> vector<128x64xf32>
    %c0_3 = arith.constant 0 : index
    %c0_4 = arith.constant 0 : index
    %4 = vector.load %arg4[%c0_3, %c0_4] : memref<1x64xf32, #tpu.memory_space<vmem>>, vector<1x64xf32>
    %c0_5 = arith.constant 0 : index
    %c0_6 = arith.constant 0 : index
    %5 = vector.load %arg3[%c0_5, %c0_6] : memref<1x64xf32, #tpu.memory_space<vmem>>, vector<1x64xf32>
    %6 = vector.broadcast %5 : vector<1x64xf32> to vector<128x64xf32>
    %7 = arith.addf %3, %6 : vector<128x64xf32>
    %8 = vector.broadcast %4 : vector<1x64xf32> to vector<128x64xf32>
    %9 = arith.mulf %8, %7 : vector<128x64xf32>
    %cst_7 = arith.constant 0.000000e+00 : f32
    %10 = vector.broadcast %cst_7 : f32 to vector<128x64xf32>
    %11 = arith.cmpf oge, %9, %10 : vector<128x64xf32>
    %cst_8 = arith.constant 2.000000e-01 : f32
    %12 = vector.broadcast %cst_8 : f32 to vector<128x64xf32>
    %13 = arith.mulf %12, %9 : vector<128x64xf32>
    %14 = arith.select %11, %9, %13 : vector<128x64xi1>, vector<128x64xf32>
    %c0_9 = arith.constant 0 : index
    %c0_10 = arith.constant 0 : index
    %15 = vector.load %arg5[%c0_9, %c0_10] : memref<512x128xbf16, #tpu.memory_space<vmem>>, vector<512x128xbf16>
    %16 = arith.truncf %14 : vector<128x64xf32> to vector<128x64xbf16>
    %cst_11 = arith.constant dense<0.000000e+00> : vector<512x64xf32>
    %17 = tpu.matmul %15, %16, %cst_11 {dimension_numbers = #tpu.dot_dimension_numbers<[1], [0], [0], [1], [0, 0, 1, 1], [], []>} : vector<512x128xbf16>, vector<128x64xbf16>, vector<512x64xf32> -> vector<512x64xf32>
    %18 = arith.truncf %17 : vector<512x64xf32> to vector<512x64xbf16>
    %19 = vector.extract_strided_slice %18 {offsets = [0, 0], sizes = [32, 64], strides = [1, 1]} : vector<512x64xbf16> to vector<32x64xbf16>
    %c0_12 = arith.constant 0 : index
    %c0_13 = arith.constant 0 : index
    %c0_14 = arith.constant 0 : index
    %20 = vector.load %arg6[%c0_12, %c0_13, %c0_14] : memref<16x64x128xbf16, #tpu.memory_space<vmem>>, vector<1x64x128xbf16>
    %21 = vector.shape_cast %20 : vector<1x64x128xbf16> to vector<64x128xbf16>
    %cst_15 = arith.constant dense<0.000000e+00> : vector<32x128xf32>
    %22 = tpu.matmul %19, %21, %cst_15 {dimension_numbers = #tpu.dot_dimension_numbers<[1], [0], [0], [1], [0, 0, 1, 1], [], []>} : vector<32x64xbf16>, vector<64x128xbf16>, vector<32x128xf32> -> vector<32x128xf32>
    %23 = vector.extract_strided_slice %18 {offsets = [32, 0], sizes = [32, 64], strides = [1, 1]} : vector<512x64xbf16> to vector<32x64xbf16>
    %c1 = arith.constant 1 : index
    %c0_16 = arith.constant 0 : index
    %c0_17 = arith.constant 0 : index
    %24 = vector.load %arg6[%c1, %c0_16, %c0_17] : memref<16x64x128xbf16, #tpu.memory_space<vmem>>, vector<1x64x128xbf16>
    %25 = vector.shape_cast %24 : vector<1x64x128xbf16> to vector<64x128xbf16>
    %cst_18 = arith.constant dense<0.000000e+00> : vector<32x128xf32>
    %26 = tpu.matmul %23, %25, %cst_18 {dimension_numbers = #tpu.dot_dimension_numbers<[1], [0], [0], [1], [0, 0, 1, 1], [], []>} : vector<32x64xbf16>, vector<64x128xbf16>, vector<32x128xf32> -> vector<32x128xf32>
    %27 = arith.addf %22, %26 : vector<32x128xf32>
    %28 = vector.extract_strided_slice %18 {offsets = [64, 0], sizes = [32, 64], strides = [1, 1]} : vector<512x64xbf16> to vector<32x64xbf16>
    %c2 = arith.constant 2 : index
    %c0_19 = arith.constant 0 : index
    %c0_20 = arith.constant 0 : index
    %29 = vector.load %arg6[%c2, %c0_19, %c0_20] : memref<16x64x128xbf16, #tpu.memory_space<vmem>>, vector<1x64x128xbf16>
    %30 = vector.shape_cast %29 : vector<1x64x128xbf16> to vector<64x128xbf16>
    %cst_21 = arith.constant dense<0.000000e+00> : vector<32x128xf32>
    %31 = tpu.matmul %28, %30, %cst_21 {dimension_numbers = #tpu.dot_dimension_numbers<[1], [0], [0], [1], [0, 0, 1, 1], [], []>} : vector<32x64xbf16>, vector<64x128xbf16>, vector<32x128xf32> -> vector<32x128xf32>
    %32 = arith.addf %27, %31 : vector<32x128xf32>
    %33 = vector.extract_strided_slice %18 {offsets = [96, 0], sizes = [32, 64], strides = [1, 1]} : vector<512x64xbf16> to vector<32x64xbf16>
    %c3 = arith.constant 3 : index
    %c0_22 = arith.constant 0 : index
    %c0_23 = arith.constant 0 : index
    %34 = vector.load %arg6[%c3, %c0_22, %c0_23] : memref<16x64x128xbf16, #tpu.memory_space<vmem>>, vector<1x64x128xbf16>
    %35 = vector.shape_cast %34 : vector<1x64x128xbf16> to vector<64x128xbf16>
    %cst_24 = arith.constant dense<0.000000e+00> : vector<32x128xf32>
    %36 = tpu.matmul %33, %35, %cst_24 {dimension_numbers = #tpu.dot_dimension_numbers<[1], [0], [0], [1], [0, 0, 1, 1], [], []>} : vector<32x64xbf16>, vector<64x128xbf16>, vector<32x128xf32> -> vector<32x128xf32>
    %37 = arith.addf %32, %36 : vector<32x128xf32>
    %38 = vector.extract_strided_slice %18 {offsets = [128, 0], sizes = [32, 64], strides = [1, 1]} : vector<512x64xbf16> to vector<32x64xbf16>
    %c4 = arith.constant 4 : index
    %c0_25 = arith.constant 0 : index
    %c0_26 = arith.constant 0 : index
    %39 = vector.load %arg6[%c4, %c0_25, %c0_26] : memref<16x64x128xbf16, #tpu.memory_space<vmem>>, vector<1x64x128xbf16>
    %40 = vector.shape_cast %39 : vector<1x64x128xbf16> to vector<64x128xbf16>
    %cst_27 = arith.constant dense<0.000000e+00> : vector<32x128xf32>
    %41 = tpu.matmul %38, %40, %cst_27 {dimension_numbers = #tpu.dot_dimension_numbers<[1], [0], [0], [1], [0, 0, 1, 1], [], []>} : vector<32x64xbf16>, vector<64x128xbf16>, vector<32x128xf32> -> vector<32x128xf32>
    %42 = arith.addf %37, %41 : vector<32x128xf32>
    %43 = vector.extract_strided_slice %18 {offsets = [160, 0], sizes = [32, 64], strides = [1, 1]} : vector<512x64xbf16> to vector<32x64xbf16>
    %c5 = arith.constant 5 : index
    %c0_28 = arith.constant 0 : index
    %c0_29 = arith.constant 0 : index
    %44 = vector.load %arg6[%c5, %c0_28, %c0_29] : memref<16x64x128xbf16, #tpu.memory_space<vmem>>, vector<1x64x128xbf16>
    %45 = vector.shape_cast %44 : vector<1x64x128xbf16> to vector<64x128xbf16>
    %cst_30 = arith.constant dense<0.000000e+00> : vector<32x128xf32>
    %46 = tpu.matmul %43, %45, %cst_30 {dimension_numbers = #tpu.dot_dimension_numbers<[1], [0], [0], [1], [0, 0, 1, 1], [], []>} : vector<32x64xbf16>, vector<64x128xbf16>, vector<32x128xf32> -> vector<32x128xf32>
    %47 = arith.addf %42, %46 : vector<32x128xf32>
    %48 = vector.extract_strided_slice %18 {offsets = [192, 0], sizes = [32, 64], strides = [1, 1]} : vector<512x64xbf16> to vector<32x64xbf16>
    %c6 = arith.constant 6 : index
    %c0_31 = arith.constant 0 : index
    %c0_32 = arith.constant 0 : index
    %49 = vector.load %arg6[%c6, %c0_31, %c0_32] : memref<16x64x128xbf16, #tpu.memory_space<vmem>>, vector<1x64x128xbf16>
    %50 = vector.shape_cast %49 : vector<1x64x128xbf16> to vector<64x128xbf16>
    %cst_33 = arith.constant dense<0.000000e+00> : vector<32x128xf32>
    %51 = tpu.matmul %48, %50, %cst_33 {dimension_numbers = #tpu.dot_dimension_numbers<[1], [0], [0], [1], [0, 0, 1, 1], [], []>} : vector<32x64xbf16>, vector<64x128xbf16>, vector<32x128xf32> -> vector<32x128xf32>
    %52 = arith.addf %47, %51 : vector<32x128xf32>
    %53 = vector.extract_strided_slice %18 {offsets = [224, 0], sizes = [32, 64], strides = [1, 1]} : vector<512x64xbf16> to vector<32x64xbf16>
    %c7 = arith.constant 7 : index
    %c0_34 = arith.constant 0 : index
    %c0_35 = arith.constant 0 : index
    %54 = vector.load %arg6[%c7, %c0_34, %c0_35] : memref<16x64x128xbf16, #tpu.memory_space<vmem>>, vector<1x64x128xbf16>
    %55 = vector.shape_cast %54 : vector<1x64x128xbf16> to vector<64x128xbf16>
    %cst_36 = arith.constant dense<0.000000e+00> : vector<32x128xf32>
    %56 = tpu.matmul %53, %55, %cst_36 {dimension_numbers = #tpu.dot_dimension_numbers<[1], [0], [0], [1], [0, 0, 1, 1], [], []>} : vector<32x64xbf16>, vector<64x128xbf16>, vector<32x128xf32> -> vector<32x128xf32>
    %57 = arith.addf %52, %56 : vector<32x128xf32>
    %58 = vector.extract_strided_slice %18 {offsets = [256, 0], sizes = [32, 64], strides = [1, 1]} : vector<512x64xbf16> to vector<32x64xbf16>
    %c8 = arith.constant 8 : index
    %c0_37 = arith.constant 0 : index
    %c0_38 = arith.constant 0 : index
    %59 = vector.load %arg6[%c8, %c0_37, %c0_38] : memref<16x64x128xbf16, #tpu.memory_space<vmem>>, vector<1x64x128xbf16>
    %60 = vector.shape_cast %59 : vector<1x64x128xbf16> to vector<64x128xbf16>
    %cst_39 = arith.constant dense<0.000000e+00> : vector<32x128xf32>
    %61 = tpu.matmul %58, %60, %cst_39 {dimension_numbers = #tpu.dot_dimension_numbers<[1], [0], [0], [1], [0, 0, 1, 1], [], []>} : vector<32x64xbf16>, vector<64x128xbf16>, vector<32x128xf32> -> vector<32x128xf32>
    %62 = arith.addf %57, %61 : vector<32x128xf32>
    %63 = vector.extract_strided_slice %18 {offsets = [288, 0], sizes = [32, 64], strides = [1, 1]} : vector<512x64xbf16> to vector<32x64xbf16>
    %c9 = arith.constant 9 : index
    %c0_40 = arith.constant 0 : index
    %c0_41 = arith.constant 0 : index
    %64 = vector.load %arg6[%c9, %c0_40, %c0_41] : memref<16x64x128xbf16, #tpu.memory_space<vmem>>, vector<1x64x128xbf16>
    %65 = vector.shape_cast %64 : vector<1x64x128xbf16> to vector<64x128xbf16>
    %cst_42 = arith.constant dense<0.000000e+00> : vector<32x128xf32>
    %66 = tpu.matmul %63, %65, %cst_42 {dimension_numbers = #tpu.dot_dimension_numbers<[1], [0], [0], [1], [0, 0, 1, 1], [], []>} : vector<32x64xbf16>, vector<64x128xbf16>, vector<32x128xf32> -> vector<32x128xf32>
    %67 = arith.addf %62, %66 : vector<32x128xf32>
    %68 = vector.extract_strided_slice %18 {offsets = [320, 0], sizes = [32, 64], strides = [1, 1]} : vector<512x64xbf16> to vector<32x64xbf16>
    %c10 = arith.constant 10 : index
    %c0_43 = arith.constant 0 : index
    %c0_44 = arith.constant 0 : index
    %69 = vector.load %arg6[%c10, %c0_43, %c0_44] : memref<16x64x128xbf16, #tpu.memory_space<vmem>>, vector<1x64x128xbf16>
    %70 = vector.shape_cast %69 : vector<1x64x128xbf16> to vector<64x128xbf16>
    %cst_45 = arith.constant dense<0.000000e+00> : vector<32x128xf32>
    %71 = tpu.matmul %68, %70, %cst_45 {dimension_numbers = #tpu.dot_dimension_numbers<[1], [0], [0], [1], [0, 0, 1, 1], [], []>} : vector<32x64xbf16>, vector<64x128xbf16>, vector<32x128xf32> -> vector<32x128xf32>
    %72 = arith.addf %67, %71 : vector<32x128xf32>
    %73 = vector.extract_strided_slice %18 {offsets = [352, 0], sizes = [32, 64], strides = [1, 1]} : vector<512x64xbf16> to vector<32x64xbf16>
    %c11 = arith.constant 11 : index
    %c0_46 = arith.constant 0 : index
    %c0_47 = arith.constant 0 : index
    %74 = vector.load %arg6[%c11, %c0_46, %c0_47] : memref<16x64x128xbf16, #tpu.memory_space<vmem>>, vector<1x64x128xbf16>
    %75 = vector.shape_cast %74 : vector<1x64x128xbf16> to vector<64x128xbf16>
    %cst_48 = arith.constant dense<0.000000e+00> : vector<32x128xf32>
    %76 = tpu.matmul %73, %75, %cst_48 {dimension_numbers = #tpu.dot_dimension_numbers<[1], [0], [0], [1], [0, 0, 1, 1], [], []>} : vector<32x64xbf16>, vector<64x128xbf16>, vector<32x128xf32> -> vector<32x128xf32>
    %77 = arith.addf %72, %76 : vector<32x128xf32>
    %78 = vector.extract_strided_slice %18 {offsets = [384, 0], sizes = [32, 64], strides = [1, 1]} : vector<512x64xbf16> to vector<32x64xbf16>
    %c12 = arith.constant 12 : index
    %c0_49 = arith.constant 0 : index
    %c0_50 = arith.constant 0 : index
    %79 = vector.load %arg6[%c12, %c0_49, %c0_50] : memref<16x64x128xbf16, #tpu.memory_space<vmem>>, vector<1x64x128xbf16>
    %80 = vector.shape_cast %79 : vector<1x64x128xbf16> to vector<64x128xbf16>
    %cst_51 = arith.constant dense<0.000000e+00> : vector<32x128xf32>
    %81 = tpu.matmul %78, %80, %cst_51 {dimension_numbers = #tpu.dot_dimension_numbers<[1], [0], [0], [1], [0, 0, 1, 1], [], []>} : vector<32x64xbf16>, vector<64x128xbf16>, vector<32x128xf32> -> vector<32x128xf32>
    %82 = arith.addf %77, %81 : vector<32x128xf32>
    %83 = vector.extract_strided_slice %18 {offsets = [416, 0], sizes = [32, 64], strides = [1, 1]} : vector<512x64xbf16> to vector<32x64xbf16>
    %c13 = arith.constant 13 : index
    %c0_52 = arith.constant 0 : index
    %c0_53 = arith.constant 0 : index
    %84 = vector.load %arg6[%c13, %c0_52, %c0_53] : memref<16x64x128xbf16, #tpu.memory_space<vmem>>, vector<1x64x128xbf16>
    %85 = vector.shape_cast %84 : vector<1x64x128xbf16> to vector<64x128xbf16>
    %cst_54 = arith.constant dense<0.000000e+00> : vector<32x128xf32>
    %86 = tpu.matmul %83, %85, %cst_54 {dimension_numbers = #tpu.dot_dimension_numbers<[1], [0], [0], [1], [0, 0, 1, 1], [], []>} : vector<32x64xbf16>, vector<64x128xbf16>, vector<32x128xf32> -> vector<32x128xf32>
    %87 = arith.addf %82, %86 : vector<32x128xf32>
    %88 = vector.extract_strided_slice %18 {offsets = [448, 0], sizes = [32, 64], strides = [1, 1]} : vector<512x64xbf16> to vector<32x64xbf16>
    %c14 = arith.constant 14 : index
    %c0_55 = arith.constant 0 : index
    %c0_56 = arith.constant 0 : index
    %89 = vector.load %arg6[%c14, %c0_55, %c0_56] : memref<16x64x128xbf16, #tpu.memory_space<vmem>>, vector<1x64x128xbf16>
    %90 = vector.shape_cast %89 : vector<1x64x128xbf16> to vector<64x128xbf16>
    %cst_57 = arith.constant dense<0.000000e+00> : vector<32x128xf32>
    %91 = tpu.matmul %88, %90, %cst_57 {dimension_numbers = #tpu.dot_dimension_numbers<[1], [0], [0], [1], [0, 0, 1, 1], [], []>} : vector<32x64xbf16>, vector<64x128xbf16>, vector<32x128xf32> -> vector<32x128xf32>
    %92 = arith.addf %87, %91 : vector<32x128xf32>
    %93 = vector.extract_strided_slice %18 {offsets = [480, 0], sizes = [32, 64], strides = [1, 1]} : vector<512x64xbf16> to vector<32x64xbf16>
    %c15 = arith.constant 15 : index
    %c0_58 = arith.constant 0 : index
    %c0_59 = arith.constant 0 : index
    %94 = vector.load %arg6[%c15, %c0_58, %c0_59] : memref<16x64x128xbf16, #tpu.memory_space<vmem>>, vector<1x64x128xbf16>
    %95 = vector.shape_cast %94 : vector<1x64x128xbf16> to vector<64x128xbf16>
    %cst_60 = arith.constant dense<0.000000e+00> : vector<32x128xf32>
    %96 = tpu.matmul %93, %95, %cst_60 {dimension_numbers = #tpu.dot_dimension_numbers<[1], [0], [0], [1], [0, 0, 1, 1], [], []>} : vector<32x64xbf16>, vector<64x128xbf16>, vector<32x128xf32> -> vector<32x128xf32>
    %97 = arith.addf %92, %96 : vector<32x128xf32>
    %c0_61 = arith.constant 0 : index
    %c0_62 = arith.constant 0 : index
    %98 = vector.load %arg8[%c0_61, %c0_62] : memref<1x128xf32, #tpu.memory_space<vmem>>, vector<1x128xf32>
    %c0_63 = arith.constant 0 : index
    %c0_64 = arith.constant 0 : index
    %99 = vector.load %arg7[%c0_63, %c0_64] : memref<1x128xf32, #tpu.memory_space<vmem>>, vector<1x128xf32>
    %100 = vector.broadcast %99 : vector<1x128xf32> to vector<32x128xf32>
    %101 = arith.addf %97, %100 : vector<32x128xf32>
    %102 = vector.broadcast %98 : vector<1x128xf32> to vector<32x128xf32>
    %103 = arith.mulf %102, %101 : vector<32x128xf32>
    %cst_65 = arith.constant 0.000000e+00 : f32
    %104 = vector.broadcast %cst_65 : f32 to vector<32x128xf32>
    %105 = arith.cmpf oge, %103, %104 : vector<32x128xf32>
    %cst_66 = arith.constant 2.000000e-01 : f32
    %106 = vector.broadcast %cst_66 : f32 to vector<32x128xf32>
    %107 = arith.mulf %106, %103 : vector<32x128xf32>
    %108 = arith.select %105, %103, %107 : vector<32x128xi1>, vector<32x128xf32>
    %c0_67 = arith.constant 0 : index
    %c0_68 = arith.constant 0 : index
    %109 = vector.load %arg9[%c0_67, %c0_68] : memref<128x32xbf16, #tpu.memory_space<vmem>>, vector<128x32xbf16>
    %110 = arith.truncf %108 : vector<32x128xf32> to vector<32x128xbf16>
    %cst_69 = arith.constant dense<0.000000e+00> : vector<128x128xf32>
    %111 = tpu.matmul %109, %110, %cst_69 {dimension_numbers = #tpu.dot_dimension_numbers<[1], [0], [0], [1], [0, 0, 1, 1], [], []>} : vector<128x32xbf16>, vector<32x128xbf16>, vector<128x128xf32> -> vector<128x128xf32>
    %112 = arith.truncf %111 : vector<128x128xf32> to vector<128x128xbf16>
    %113 = vector.extract_strided_slice %112 {offsets = [0, 0], sizes = [8, 128], strides = [1, 1]} : vector<128x128xbf16> to vector<8x128xbf16>
    %c0_70 = arith.constant 0 : index
    %c0_71 = arith.constant 0 : index
    %c0_72 = arith.constant 0 : index
    %114 = vector.load %arg10[%c0_70, %c0_71, %c0_72] : memref<16x128x256xbf16, #tpu.memory_space<vmem>>, vector<1x128x256xbf16>
    %115 = vector.shape_cast %114 : vector<1x128x256xbf16> to vector<128x256xbf16>
    %cst_73 = arith.constant dense<0.000000e+00> : vector<8x256xf32>
    %116 = tpu.matmul %113, %115, %cst_73 {dimension_numbers = #tpu.dot_dimension_numbers<[1], [0], [0], [1], [0, 0, 1, 1], [], []>} : vector<8x128xbf16>, vector<128x256xbf16>, vector<8x256xf32> -> vector<8x256xf32>
    %117 = vector.extract_strided_slice %112 {offsets = [8, 0], sizes = [8, 128], strides = [1, 1]} : vector<128x128xbf16> to vector<8x128xbf16>
    %c1_74 = arith.constant 1 : index
    %c0_75 = arith.constant 0 : index
    %c0_76 = arith.constant 0 : index
    %118 = vector.load %arg10[%c1_74, %c0_75, %c0_76] : memref<16x128x256xbf16, #tpu.memory_space<vmem>>, vector<1x128x256xbf16>
    %119 = vector.shape_cast %118 : vector<1x128x256xbf16> to vector<128x256xbf16>
    %cst_77 = arith.constant dense<0.000000e+00> : vector<8x256xf32>
    %120 = tpu.matmul %117, %119, %cst_77 {dimension_numbers = #tpu.dot_dimension_numbers<[1], [0], [0], [1], [0, 0, 1, 1], [], []>} : vector<8x128xbf16>, vector<128x256xbf16>, vector<8x256xf32> -> vector<8x256xf32>
    %121 = arith.addf %116, %120 : vector<8x256xf32>
    %122 = vector.extract_strided_slice %112 {offsets = [16, 0], sizes = [8, 128], strides = [1, 1]} : vector<128x128xbf16> to vector<8x128xbf16>
    %c2_78 = arith.constant 2 : index
    %c0_79 = arith.constant 0 : index
    %c0_80 = arith.constant 0 : index
    %123 = vector.load %arg10[%c2_78, %c0_79, %c0_80] : memref<16x128x256xbf16, #tpu.memory_space<vmem>>, vector<1x128x256xbf16>
    %124 = vector.shape_cast %123 : vector<1x128x256xbf16> to vector<128x256xbf16>
    %cst_81 = arith.constant dense<0.000000e+00> : vector<8x256xf32>
    %125 = tpu.matmul %122, %124, %cst_81 {dimension_numbers = #tpu.dot_dimension_numbers<[1], [0], [0], [1], [0, 0, 1, 1], [], []>} : vector<8x128xbf16>, vector<128x256xbf16>, vector<8x256xf32> -> vector<8x256xf32>
    %126 = arith.addf %121, %125 : vector<8x256xf32>
    %127 = vector.extract_strided_slice %112 {offsets = [24, 0], sizes = [8, 128], strides = [1, 1]} : vector<128x128xbf16> to vector<8x128xbf16>
    %c3_82 = arith.constant 3 : index
    %c0_83 = arith.constant 0 : index
    %c0_84 = arith.constant 0 : index
    %128 = vector.load %arg10[%c3_82, %c0_83, %c0_84] : memref<16x128x256xbf16, #tpu.memory_space<vmem>>, vector<1x128x256xbf16>
    %129 = vector.shape_cast %128 : vector<1x128x256xbf16> to vector<128x256xbf16>
    %cst_85 = arith.constant dense<0.000000e+00> : vector<8x256xf32>
    %130 = tpu.matmul %127, %129, %cst_85 {dimension_numbers = #tpu.dot_dimension_numbers<[1], [0], [0], [1], [0, 0, 1, 1], [], []>} : vector<8x128xbf16>, vector<128x256xbf16>, vector<8x256xf32> -> vector<8x256xf32>
    %131 = arith.addf %126, %130 : vector<8x256xf32>
    %132 = vector.extract_strided_slice %112 {offsets = [32, 0], sizes = [8, 128], strides = [1, 1]} : vector<128x128xbf16> to vector<8x128xbf16>
    %c4_86 = arith.constant 4 : index
    %c0_87 = arith.constant 0 : index
    %c0_88 = arith.constant 0 : index
    %133 = vector.load %arg10[%c4_86, %c0_87, %c0_88] : memref<16x128x256xbf16, #tpu.memory_space<vmem>>, vector<1x128x256xbf16>
    %134 = vector.shape_cast %133 : vector<1x128x256xbf16> to vector<128x256xbf16>
    %cst_89 = arith.constant dense<0.000000e+00> : vector<8x256xf32>
    %135 = tpu.matmul %132, %134, %cst_89 {dimension_numbers = #tpu.dot_dimension_numbers<[1], [0], [0], [1], [0, 0, 1, 1], [], []>} : vector<8x128xbf16>, vector<128x256xbf16>, vector<8x256xf32> -> vector<8x256xf32>
    %136 = arith.addf %131, %135 : vector<8x256xf32>
    %137 = vector.extract_strided_slice %112 {offsets = [40, 0], sizes = [8, 128], strides = [1, 1]} : vector<128x128xbf16> to vector<8x128xbf16>
    %c5_90 = arith.constant 5 : index
    %c0_91 = arith.constant 0 : index
    %c0_92 = arith.constant 0 : index
    %138 = vector.load %arg10[%c5_90, %c0_91, %c0_92] : memref<16x128x256xbf16, #tpu.memory_space<vmem>>, vector<1x128x256xbf16>
    %139 = vector.shape_cast %138 : vector<1x128x256xbf16> to vector<128x256xbf16>
    %cst_93 = arith.constant dense<0.000000e+00> : vector<8x256xf32>
    %140 = tpu.matmul %137, %139, %cst_93 {dimension_numbers = #tpu.dot_dimension_numbers<[1], [0], [0], [1], [0, 0, 1, 1], [], []>} : vector<8x128xbf16>, vector<128x256xbf16>, vector<8x256xf32> -> vector<8x256xf32>
    %141 = arith.addf %136, %140 : vector<8x256xf32>
    %142 = vector.extract_strided_slice %112 {offsets = [48, 0], sizes = [8, 128], strides = [1, 1]} : vector<128x128xbf16> to vector<8x128xbf16>
    %c6_94 = arith.constant 6 : index
    %c0_95 = arith.constant 0 : index
    %c0_96 = arith.constant 0 : index
    %143 = vector.load %arg10[%c6_94, %c0_95, %c0_96] : memref<16x128x256xbf16, #tpu.memory_space<vmem>>, vector<1x128x256xbf16>
    %144 = vector.shape_cast %143 : vector<1x128x256xbf16> to vector<128x256xbf16>
    %cst_97 = arith.constant dense<0.000000e+00> : vector<8x256xf32>
    %145 = tpu.matmul %142, %144, %cst_97 {dimension_numbers = #tpu.dot_dimension_numbers<[1], [0], [0], [1], [0, 0, 1, 1], [], []>} : vector<8x128xbf16>, vector<128x256xbf16>, vector<8x256xf32> -> vector<8x256xf32>
    %146 = arith.addf %141, %145 : vector<8x256xf32>
    %147 = vector.extract_strided_slice %112 {offsets = [56, 0], sizes = [8, 128], strides = [1, 1]} : vector<128x128xbf16> to vector<8x128xbf16>
    %c7_98 = arith.constant 7 : index
    %c0_99 = arith.constant 0 : index
    %c0_100 = arith.constant 0 : index
    %148 = vector.load %arg10[%c7_98, %c0_99, %c0_100] : memref<16x128x256xbf16, #tpu.memory_space<vmem>>, vector<1x128x256xbf16>
    %149 = vector.shape_cast %148 : vector<1x128x256xbf16> to vector<128x256xbf16>
    %cst_101 = arith.constant dense<0.000000e+00> : vector<8x256xf32>
    %150 = tpu.matmul %147, %149, %cst_101 {dimension_numbers = #tpu.dot_dimension_numbers<[1], [0], [0], [1], [0, 0, 1, 1], [], []>} : vector<8x128xbf16>, vector<128x256xbf16>, vector<8x256xf32> -> vector<8x256xf32>
    %151 = arith.addf %146, %150 : vector<8x256xf32>
    %152 = vector.extract_strided_slice %112 {offsets = [64, 0], sizes = [8, 128], strides = [1, 1]} : vector<128x128xbf16> to vector<8x128xbf16>
    %c8_102 = arith.constant 8 : index
    %c0_103 = arith.constant 0 : index
    %c0_104 = arith.constant 0 : index
    %153 = vector.load %arg10[%c8_102, %c0_103, %c0_104] : memref<16x128x256xbf16, #tpu.memory_space<vmem>>, vector<1x128x256xbf16>
    %154 = vector.shape_cast %153 : vector<1x128x256xbf16> to vector<128x256xbf16>
    %cst_105 = arith.constant dense<0.000000e+00> : vector<8x256xf32>
    %155 = tpu.matmul %152, %154, %cst_105 {dimension_numbers = #tpu.dot_dimension_numbers<[1], [0], [0], [1], [0, 0, 1, 1], [], []>} : vector<8x128xbf16>, vector<128x256xbf16>, vector<8x256xf32> -> vector<8x256xf32>
    %156 = arith.addf %151, %155 : vector<8x256xf32>
    %157 = vector.extract_strided_slice %112 {offsets = [72, 0], sizes = [8, 128], strides = [1, 1]} : vector<128x128xbf16> to vector<8x128xbf16>
    %c9_106 = arith.constant 9 : index
    %c0_107 = arith.constant 0 : index
    %c0_108 = arith.constant 0 : index
    %158 = vector.load %arg10[%c9_106, %c0_107, %c0_108] : memref<16x128x256xbf16, #tpu.memory_space<vmem>>, vector<1x128x256xbf16>
    %159 = vector.shape_cast %158 : vector<1x128x256xbf16> to vector<128x256xbf16>
    %cst_109 = arith.constant dense<0.000000e+00> : vector<8x256xf32>
    %160 = tpu.matmul %157, %159, %cst_109 {dimension_numbers = #tpu.dot_dimension_numbers<[1], [0], [0], [1], [0, 0, 1, 1], [], []>} : vector<8x128xbf16>, vector<128x256xbf16>, vector<8x256xf32> -> vector<8x256xf32>
    %161 = arith.addf %156, %160 : vector<8x256xf32>
    %162 = vector.extract_strided_slice %112 {offsets = [80, 0], sizes = [8, 128], strides = [1, 1]} : vector<128x128xbf16> to vector<8x128xbf16>
    %c10_110 = arith.constant 10 : index
    %c0_111 = arith.constant 0 : index
    %c0_112 = arith.constant 0 : index
    %163 = vector.load %arg10[%c10_110, %c0_111, %c0_112] : memref<16x128x256xbf16, #tpu.memory_space<vmem>>, vector<1x128x256xbf16>
    %164 = vector.shape_cast %163 : vector<1x128x256xbf16> to vector<128x256xbf16>
    %cst_113 = arith.constant dense<0.000000e+00> : vector<8x256xf32>
    %165 = tpu.matmul %162, %164, %cst_113 {dimension_numbers = #tpu.dot_dimension_numbers<[1], [0], [0], [1], [0, 0, 1, 1], [], []>} : vector<8x128xbf16>, vector<128x256xbf16>, vector<8x256xf32> -> vector<8x256xf32>
    %166 = arith.addf %161, %165 : vector<8x256xf32>
    %167 = vector.extract_strided_slice %112 {offsets = [88, 0], sizes = [8, 128], strides = [1, 1]} : vector<128x128xbf16> to vector<8x128xbf16>
    %c11_114 = arith.constant 11 : index
    %c0_115 = arith.constant 0 : index
    %c0_116 = arith.constant 0 : index
    %168 = vector.load %arg10[%c11_114, %c0_115, %c0_116] : memref<16x128x256xbf16, #tpu.memory_space<vmem>>, vector<1x128x256xbf16>
    %169 = vector.shape_cast %168 : vector<1x128x256xbf16> to vector<128x256xbf16>
    %cst_117 = arith.constant dense<0.000000e+00> : vector<8x256xf32>
    %170 = tpu.matmul %167, %169, %cst_117 {dimension_numbers = #tpu.dot_dimension_numbers<[1], [0], [0], [1], [0, 0, 1, 1], [], []>} : vector<8x128xbf16>, vector<128x256xbf16>, vector<8x256xf32> -> vector<8x256xf32>
    %171 = arith.addf %166, %170 : vector<8x256xf32>
    %172 = vector.extract_strided_slice %112 {offsets = [96, 0], sizes = [8, 128], strides = [1, 1]} : vector<128x128xbf16> to vector<8x128xbf16>
    %c12_118 = arith.constant 12 : index
    %c0_119 = arith.constant 0 : index
    %c0_120 = arith.constant 0 : index
    %173 = vector.load %arg10[%c12_118, %c0_119, %c0_120] : memref<16x128x256xbf16, #tpu.memory_space<vmem>>, vector<1x128x256xbf16>
    %174 = vector.shape_cast %173 : vector<1x128x256xbf16> to vector<128x256xbf16>
    %cst_121 = arith.constant dense<0.000000e+00> : vector<8x256xf32>
    %175 = tpu.matmul %172, %174, %cst_121 {dimension_numbers = #tpu.dot_dimension_numbers<[1], [0], [0], [1], [0, 0, 1, 1], [], []>} : vector<8x128xbf16>, vector<128x256xbf16>, vector<8x256xf32> -> vector<8x256xf32>
    %176 = arith.addf %171, %175 : vector<8x256xf32>
    %177 = vector.extract_strided_slice %112 {offsets = [104, 0], sizes = [8, 128], strides = [1, 1]} : vector<128x128xbf16> to vector<8x128xbf16>
    %c13_122 = arith.constant 13 : index
    %c0_123 = arith.constant 0 : index
    %c0_124 = arith.constant 0 : index
    %178 = vector.load %arg10[%c13_122, %c0_123, %c0_124] : memref<16x128x256xbf16, #tpu.memory_space<vmem>>, vector<1x128x256xbf16>
    %179 = vector.shape_cast %178 : vector<1x128x256xbf16> to vector<128x256xbf16>
    %cst_125 = arith.constant dense<0.000000e+00> : vector<8x256xf32>
    %180 = tpu.matmul %177, %179, %cst_125 {dimension_numbers = #tpu.dot_dimension_numbers<[1], [0], [0], [1], [0, 0, 1, 1], [], []>} : vector<8x128xbf16>, vector<128x256xbf16>, vector<8x256xf32> -> vector<8x256xf32>
    %181 = arith.addf %176, %180 : vector<8x256xf32>
    %182 = vector.extract_strided_slice %112 {offsets = [112, 0], sizes = [8, 128], strides = [1, 1]} : vector<128x128xbf16> to vector<8x128xbf16>
    %c14_126 = arith.constant 14 : index
    %c0_127 = arith.constant 0 : index
    %c0_128 = arith.constant 0 : index
    %183 = vector.load %arg10[%c14_126, %c0_127, %c0_128] : memref<16x128x256xbf16, #tpu.memory_space<vmem>>, vector<1x128x256xbf16>
    %184 = vector.shape_cast %183 : vector<1x128x256xbf16> to vector<128x256xbf16>
    %cst_129 = arith.constant dense<0.000000e+00> : vector<8x256xf32>
    %185 = tpu.matmul %182, %184, %cst_129 {dimension_numbers = #tpu.dot_dimension_numbers<[1], [0], [0], [1], [0, 0, 1, 1], [], []>} : vector<8x128xbf16>, vector<128x256xbf16>, vector<8x256xf32> -> vector<8x256xf32>
    %186 = arith.addf %181, %185 : vector<8x256xf32>
    %187 = vector.extract_strided_slice %112 {offsets = [120, 0], sizes = [8, 128], strides = [1, 1]} : vector<128x128xbf16> to vector<8x128xbf16>
    %c15_130 = arith.constant 15 : index
    %c0_131 = arith.constant 0 : index
    %c0_132 = arith.constant 0 : index
    %188 = vector.load %arg10[%c15_130, %c0_131, %c0_132] : memref<16x128x256xbf16, #tpu.memory_space<vmem>>, vector<1x128x256xbf16>
    %189 = vector.shape_cast %188 : vector<1x128x256xbf16> to vector<128x256xbf16>
    %cst_133 = arith.constant dense<0.000000e+00> : vector<8x256xf32>
    %190 = tpu.matmul %187, %189, %cst_133 {dimension_numbers = #tpu.dot_dimension_numbers<[1], [0], [0], [1], [0, 0, 1, 1], [], []>} : vector<8x128xbf16>, vector<128x256xbf16>, vector<8x256xf32> -> vector<8x256xf32>
    %191 = arith.addf %186, %190 : vector<8x256xf32>
    %c0_134 = arith.constant 0 : index
    %c0_135 = arith.constant 0 : index
    %192 = vector.load %arg12[%c0_134, %c0_135] : memref<1x256xf32, #tpu.memory_space<vmem>>, vector<1x256xf32>
    %c0_136 = arith.constant 0 : index
    %c0_137 = arith.constant 0 : index
    %193 = vector.load %arg11[%c0_136, %c0_137] : memref<1x256xf32, #tpu.memory_space<vmem>>, vector<1x256xf32>
    %194 = vector.broadcast %193 : vector<1x256xf32> to vector<8x256xf32>
    %195 = arith.addf %191, %194 : vector<8x256xf32>
    %196 = vector.broadcast %192 : vector<1x256xf32> to vector<8x256xf32>
    %197 = arith.mulf %196, %195 : vector<8x256xf32>
    %cst_138 = arith.constant 0.000000e+00 : f32
    %198 = vector.broadcast %cst_138 : f32 to vector<8x256xf32>
    %199 = arith.cmpf oge, %197, %198 : vector<8x256xf32>
    %cst_139 = arith.constant 2.000000e-01 : f32
    %200 = vector.broadcast %cst_139 : f32 to vector<8x256xf32>
    %201 = arith.mulf %200, %197 : vector<8x256xf32>
    %202 = arith.select %199, %197, %201 : vector<8x256xi1>, vector<8x256xf32>
    %c0_140 = arith.constant 0 : index
    %c0_141 = arith.constant 0 : index
    %203 = vector.load %arg13[%c0_140, %c0_141] : memref<8x8xbf16, #tpu.memory_space<vmem>>, vector<8x8xbf16>
    %204 = arith.truncf %202 : vector<8x256xf32> to vector<8x256xbf16>
    %cst_142 = arith.constant dense<0.000000e+00> : vector<8x256xf32>
    %205 = tpu.matmul %203, %204, %cst_142 {dimension_numbers = #tpu.dot_dimension_numbers<[1], [0], [0], [1], [0, 0, 1, 1], [], []>} : vector<8x8xbf16>, vector<8x256xbf16>, vector<8x256xf32> -> vector<8x256xf32>
    %206 = arith.truncf %205 : vector<8x256xf32> to vector<8x256xbf16>
    %207 = vector.extract_strided_slice %206 {offsets = [0, 0], sizes = [2, 256], strides = [1, 1]} : vector<8x256xbf16> to vector<2x256xbf16>
    %c0_143 = arith.constant 0 : index
    %c0_144 = arith.constant 0 : index
    %c0_145 = arith.constant 0 : index
    %208 = vector.load %arg14[%c0_143, %c0_144, %c0_145] : memref<4x256x512xbf16, #tpu.memory_space<vmem>>, vector<1x256x512xbf16>
    %209 = vector.shape_cast %208 : vector<1x256x512xbf16> to vector<256x512xbf16>
    %cst_146 = arith.constant dense<0.000000e+00> : vector<2x512xf32>
    %210 = tpu.matmul %207, %209, %cst_146 {dimension_numbers = #tpu.dot_dimension_numbers<[1], [0], [0], [1], [0, 0, 1, 1], [], []>} : vector<2x256xbf16>, vector<256x512xbf16>, vector<2x512xf32> -> vector<2x512xf32>
    %211 = vector.extract_strided_slice %206 {offsets = [2, 0], sizes = [2, 256], strides = [1, 1]} : vector<8x256xbf16> to vector<2x256xbf16>
    %c1_147 = arith.constant 1 : index
    %c0_148 = arith.constant 0 : index
    %c0_149 = arith.constant 0 : index
    %212 = vector.load %arg14[%c1_147, %c0_148, %c0_149] : memref<4x256x512xbf16, #tpu.memory_space<vmem>>, vector<1x256x512xbf16>
    %213 = vector.shape_cast %212 : vector<1x256x512xbf16> to vector<256x512xbf16>
    %cst_150 = arith.constant dense<0.000000e+00> : vector<2x512xf32>
    %214 = tpu.matmul %211, %213, %cst_150 {dimension_numbers = #tpu.dot_dimension_numbers<[1], [0], [0], [1], [0, 0, 1, 1], [], []>} : vector<2x256xbf16>, vector<256x512xbf16>, vector<2x512xf32> -> vector<2x512xf32>
    %215 = arith.addf %210, %214 : vector<2x512xf32>
    %216 = vector.extract_strided_slice %206 {offsets = [4, 0], sizes = [2, 256], strides = [1, 1]} : vector<8x256xbf16> to vector<2x256xbf16>
    %c2_151 = arith.constant 2 : index
    %c0_152 = arith.constant 0 : index
    %c0_153 = arith.constant 0 : index
    %217 = vector.load %arg14[%c2_151, %c0_152, %c0_153] : memref<4x256x512xbf16, #tpu.memory_space<vmem>>, vector<1x256x512xbf16>
    %218 = vector.shape_cast %217 : vector<1x256x512xbf16> to vector<256x512xbf16>
    %cst_154 = arith.constant dense<0.000000e+00> : vector<2x512xf32>
    %219 = tpu.matmul %216, %218, %cst_154 {dimension_numbers = #tpu.dot_dimension_numbers<[1], [0], [0], [1], [0, 0, 1, 1], [], []>} : vector<2x256xbf16>, vector<256x512xbf16>, vector<2x512xf32> -> vector<2x512xf32>
    %220 = arith.addf %215, %219 : vector<2x512xf32>
    %221 = vector.extract_strided_slice %206 {offsets = [6, 0], sizes = [2, 256], strides = [1, 1]} : vector<8x256xbf16> to vector<2x256xbf16>
    %c3_155 = arith.constant 3 : index
    %c0_156 = arith.constant 0 : index
    %c0_157 = arith.constant 0 : index
    %222 = vector.load %arg14[%c3_155, %c0_156, %c0_157] : memref<4x256x512xbf16, #tpu.memory_space<vmem>>, vector<1x256x512xbf16>
    %223 = vector.shape_cast %222 : vector<1x256x512xbf16> to vector<256x512xbf16>
    %cst_158 = arith.constant dense<0.000000e+00> : vector<2x512xf32>
    %224 = tpu.matmul %221, %223, %cst_158 {dimension_numbers = #tpu.dot_dimension_numbers<[1], [0], [0], [1], [0, 0, 1, 1], [], []>} : vector<2x256xbf16>, vector<256x512xbf16>, vector<2x512xf32> -> vector<2x512xf32>
    %225 = arith.addf %220, %224 : vector<2x512xf32>
    %c0_159 = arith.constant 0 : index
    %c0_160 = arith.constant 0 : index
    %226 = vector.load %arg16[%c0_159, %c0_160] : memref<1x512xf32, #tpu.memory_space<vmem>>, vector<1x512xf32>
    %c0_161 = arith.constant 0 : index
    %c0_162 = arith.constant 0 : index
    %227 = vector.load %arg15[%c0_161, %c0_162] : memref<1x512xf32, #tpu.memory_space<vmem>>, vector<1x512xf32>
    %228 = vector.broadcast %227 : vector<1x512xf32> to vector<2x512xf32>
    %229 = arith.addf %225, %228 : vector<2x512xf32>
    %230 = vector.broadcast %226 : vector<1x512xf32> to vector<2x512xf32>
    %231 = arith.mulf %230, %229 : vector<2x512xf32>
    %cst_163 = arith.constant 0.000000e+00 : f32
    %232 = vector.broadcast %cst_163 : f32 to vector<2x512xf32>
    %233 = arith.cmpf oge, %231, %232 : vector<2x512xf32>
    %cst_164 = arith.constant 2.000000e-01 : f32
    %234 = vector.broadcast %cst_164 : f32 to vector<2x512xf32>
    %235 = arith.mulf %234, %231 : vector<2x512xf32>
    %236 = arith.select %233, %231, %235 : vector<2x512xi1>, vector<2x512xf32>
    %237 = arith.truncf %236 : vector<2x512xf32> to vector<2x512xbf16>
    %c0_165 = arith.constant 0 : index
    %c0_166 = arith.constant 0 : index
    %238 = vector.load %arg17[%c0_165, %c0_166] : memref<512x16xbf16, #tpu.memory_space<vmem>>, vector<512x16xbf16>
    %cst_167 = arith.constant dense<0.000000e+00> : vector<2x16xf32>
    %239 = tpu.matmul %237, %238, %cst_167 {dimension_numbers = #tpu.dot_dimension_numbers<[1], [0], [0], [1], [0, 0, 1, 1], [], []>} : vector<2x512xbf16>, vector<512x16xbf16>, vector<2x16xf32> -> vector<2x16xf32>
    %c0_168 = arith.constant 0 : index
    %c0_169 = arith.constant 0 : index
    %240 = vector.load %arg18[%c0_168, %c0_169] : memref<1x16xf32, #tpu.memory_space<vmem>>, vector<1x16xf32>
    %241 = vector.broadcast %240 : vector<1x16xf32> to vector<2x16xf32>
    %242 = arith.addf %239, %241 : vector<2x16xf32>
    %243 = arith.truncf %242 : vector<2x16xf32> to vector<2x16xbf16>
    %c0_170 = arith.constant 0 : index
    %c0_171 = arith.constant 0 : index
    %244 = vector.load %arg1[%c0_170, %c0_171] : memref<2x16xf32, #tpu.memory_space<vmem>>, vector<2x16xf32>
    %cst_172 = arith.constant 0.000000e+00 : f32
    %245 = vector.broadcast %cst_172 : f32 to vector<2x1xf32>
    %c0_173 = arith.constant 0 : index
    %c0_174 = arith.constant 0 : index
    %246 = vector.load %arg31[%c0_173, %c0_174] : memref<1x1xf32, #tpu.memory_space<vmem>>, vector<1x1xf32>
    %247 = vector.broadcast %246 : vector<1x1xf32> to vector<2x1xf32>
    %248 = arith.addf %245, %247 : vector<2x1xf32>
    %c0_175 = arith.constant 0 : index
    %c0_176 = arith.constant 0 : index
    %c0_177 = arith.constant 0 : index
    %249 = vector.load %arg29[%c0_175, %c0_176, %c0_177] : memref<2x1x16xf32, #tpu.memory_space<vmem>>, vector<1x1x16xf32>
    %250 = vector.shape_cast %249 : vector<1x1x16xf32> to vector<1x16xf32>
    %c0_178 = arith.constant 0 : index
    %c0_179 = arith.constant 0 : index
    %c0_180 = arith.constant 0 : index
    %251 = vector.load %arg28[%c0_178, %c0_179, %c0_180] : memref<2x1x16xf32, #tpu.memory_space<vmem>>, vector<1x1x16xf32>
    %252 = vector.shape_cast %251 : vector<1x1x16xf32> to vector<1x16xf32>
    %253 = vector.broadcast %252 : vector<1x16xf32> to vector<2x16xf32>
    %254 = arith.addf %244, %253 : vector<2x16xf32>
    %255 = vector.broadcast %250 : vector<1x16xf32> to vector<2x16xf32>
    %256 = arith.mulf %255, %254 : vector<2x16xf32>
    %cst_181 = arith.constant 0.000000e+00 : f32
    %257 = vector.broadcast %cst_181 : f32 to vector<2x16xf32>
    %258 = arith.cmpf oge, %256, %257 : vector<2x16xf32>
    %cst_182 = arith.constant 0.899999976 : f32
    %259 = vector.broadcast %cst_182 : f32 to vector<2x16xf32>
    %260 = arith.mulf %259, %256 : vector<2x16xf32>
    %261 = arith.select %258, %256, %260 : vector<2x16xi1>, vector<2x16xf32>
    %262 = arith.truncf %261 : vector<2x16xf32> to vector<2x16xbf16>
    %c0_183 = arith.constant 0 : index
    %c0_184 = arith.constant 0 : index
    %c0_185 = arith.constant 0 : index
    %263 = vector.load %arg19[%c0_183, %c0_184, %c0_185] : memref<4x16x64xbf16, #tpu.memory_space<vmem>>, vector<1x16x64xbf16>
    %264 = vector.shape_cast %263 : vector<1x16x64xbf16> to vector<16x64xbf16>
    %cst_186 = arith.constant dense<0.000000e+00> : vector<2x64xf32>
    %265 = tpu.matmul %262, %264, %cst_186 {dimension_numbers = #tpu.dot_dimension_numbers<[1], [0], [0], [1], [0, 0, 1, 1], [], []>} : vector<2x16xbf16>, vector<16x64xbf16>, vector<2x64xf32> -> vector<2x64xf32>
    %c0_187 = arith.constant 0 : index
    %c0_188 = arith.constant 0 : index
    %c0_189 = arith.constant 0 : index
    %266 = vector.load %arg20[%c0_187, %c0_188, %c0_189] : memref<4x16x64xbf16, #tpu.memory_space<vmem>>, vector<1x16x64xbf16>
    %267 = vector.shape_cast %266 : vector<1x16x64xbf16> to vector<16x64xbf16>
    %cst_190 = arith.constant dense<0.000000e+00> : vector<2x64xf32>
    %268 = tpu.matmul %243, %267, %cst_190 {dimension_numbers = #tpu.dot_dimension_numbers<[1], [0], [0], [1], [0, 0, 1, 1], [], []>} : vector<2x16xbf16>, vector<16x64xbf16>, vector<2x64xf32> -> vector<2x64xf32>
    %269 = arith.addf %265, %268 : vector<2x64xf32>
    %c0_191 = arith.constant 0 : index
    %c0_192 = arith.constant 0 : index
    %c0_193 = arith.constant 0 : index
    %270 = vector.load %arg21[%c0_191, %c0_192, %c0_193] : memref<4x1x64xf32, #tpu.memory_space<vmem>>, vector<1x1x64xf32>
    %271 = vector.shape_cast %270 : vector<1x1x64xf32> to vector<1x64xf32>
    %272 = vector.broadcast %271 : vector<1x64xf32> to vector<2x64xf32>
    %273 = arith.addf %269, %272 : vector<2x64xf32>
    %cst_194 = arith.constant 0.000000e+00 : f32
    %274 = vector.broadcast %cst_194 : f32 to vector<2x64xf32>
    %275 = arith.cmpf oge, %273, %274 : vector<2x64xf32>
    %cst_195 = arith.constant 0.00999999977 : f32
    %276 = vector.broadcast %cst_195 : f32 to vector<2x64xf32>
    %277 = arith.mulf %276, %273 : vector<2x64xf32>
    %278 = arith.select %275, %273, %277 : vector<2x64xi1>, vector<2x64xf32>
    %279 = arith.truncf %278 : vector<2x64xf32> to vector<2x64xbf16>
    %c0_196 = arith.constant 0 : index
    %c0_197 = arith.constant 0 : index
    %c0_198 = arith.constant 0 : index
    %280 = vector.load %arg22[%c0_196, %c0_197, %c0_198] : memref<4x64x64xbf16, #tpu.memory_space<vmem>>, vector<1x64x64xbf16>
    %281 = vector.shape_cast %280 : vector<1x64x64xbf16> to vector<64x64xbf16>
    %cst_199 = arith.constant dense<0.000000e+00> : vector<2x64xf32>
    %282 = tpu.matmul %279, %281, %cst_199 {dimension_numbers = #tpu.dot_dimension_numbers<[1], [0], [0], [1], [0, 0, 1, 1], [], []>} : vector<2x64xbf16>, vector<64x64xbf16>, vector<2x64xf32> -> vector<2x64xf32>
    %c0_200 = arith.constant 0 : index
    %c0_201 = arith.constant 0 : index
    %c0_202 = arith.constant 0 : index
    %283 = vector.load %arg23[%c0_200, %c0_201, %c0_202] : memref<4x1x64xf32, #tpu.memory_space<vmem>>, vector<1x1x64xf32>
    %284 = vector.shape_cast %283 : vector<1x1x64xf32> to vector<1x64xf32>
    %285 = vector.broadcast %284 : vector<1x64xf32> to vector<2x64xf32>
    %286 = arith.addf %282, %285 : vector<2x64xf32>
    %cst_203 = arith.constant 0.000000e+00 : f32
    %287 = vector.broadcast %cst_203 : f32 to vector<2x64xf32>
    %288 = arith.cmpf oge, %286, %287 : vector<2x64xf32>
    %cst_204 = arith.constant 0.00999999977 : f32
    %289 = vector.broadcast %cst_204 : f32 to vector<2x64xf32>
    %290 = arith.mulf %289, %286 : vector<2x64xf32>
    %291 = arith.select %288, %286, %290 : vector<2x64xi1>, vector<2x64xf32>
    %292 = arith.truncf %291 : vector<2x64xf32> to vector<2x64xbf16>
    %c0_205 = arith.constant 0 : index
    %c0_206 = arith.constant 0 : index
    %c0_207 = arith.constant 0 : index
    %293 = vector.load %arg24[%c0_205, %c0_206, %c0_207] : memref<4x64x64xbf16, #tpu.memory_space<vmem>>, vector<1x64x64xbf16>
    %294 = vector.shape_cast %293 : vector<1x64x64xbf16> to vector<64x64xbf16>
    %cst_208 = arith.constant dense<0.000000e+00> : vector<2x64xf32>
    %295 = tpu.matmul %292, %294, %cst_208 {dimension_numbers = #tpu.dot_dimension_numbers<[1], [0], [0], [1], [0, 0, 1, 1], [], []>} : vector<2x64xbf16>, vector<64x64xbf16>, vector<2x64xf32> -> vector<2x64xf32>
    %c0_209 = arith.constant 0 : index
    %c0_210 = arith.constant 0 : index
    %c0_211 = arith.constant 0 : index
    %296 = vector.load %arg25[%c0_209, %c0_210, %c0_211] : memref<4x1x64xf32, #tpu.memory_space<vmem>>, vector<1x1x64xf32>
    %297 = vector.shape_cast %296 : vector<1x1x64xf32> to vector<1x64xf32>
    %298 = vector.broadcast %297 : vector<1x64xf32> to vector<2x64xf32>
    %299 = arith.addf %295, %298 : vector<2x64xf32>
    %cst_212 = arith.constant 0.000000e+00 : f32
    %300 = vector.broadcast %cst_212 : f32 to vector<2x64xf32>
    %301 = arith.cmpf oge, %299, %300 : vector<2x64xf32>
    %cst_213 = arith.constant 0.00999999977 : f32
    %302 = vector.broadcast %cst_213 : f32 to vector<2x64xf32>
    %303 = arith.mulf %302, %299 : vector<2x64xf32>
    %304 = arith.select %301, %299, %303 : vector<2x64xi1>, vector<2x64xf32>
    %305 = arith.truncf %304 : vector<2x64xf32> to vector<2x64xbf16>
    %c0_214 = arith.constant 0 : index
    %c0_215 = arith.constant 0 : index
    %c0_216 = arith.constant 0 : index
    %306 = vector.load %arg26[%c0_214, %c0_215, %c0_216] : memref<4x64x32xbf16, #tpu.memory_space<vmem>>, vector<1x64x32xbf16>
    %307 = vector.shape_cast %306 : vector<1x64x32xbf16> to vector<64x32xbf16>
    %cst_217 = arith.constant dense<0.000000e+00> : vector<2x32xf32>
    %308 = tpu.matmul %305, %307, %cst_217 {dimension_numbers = #tpu.dot_dimension_numbers<[1], [0], [0], [1], [0, 0, 1, 1], [], []>} : vector<2x64xbf16>, vector<64x32xbf16>, vector<2x32xf32> -> vector<2x32xf32>
    %c0_218 = arith.constant 0 : index
    %c0_219 = arith.constant 0 : index
    %c0_220 = arith.constant 0 : index
    %309 = vector.load %arg27[%c0_218, %c0_219, %c0_220] : memref<4x1x32xf32, #tpu.memory_space<vmem>>, vector<1x1x32xf32>
    %310 = vector.shape_cast %309 : vector<1x1x32xf32> to vector<1x32xf32>
    %311 = vector.broadcast %310 : vector<1x32xf32> to vector<2x32xf32>
    %312 = arith.addf %308, %311 : vector<2x32xf32>
    %313 = vector.extract_strided_slice %312 {offsets = [0, 0], sizes = [2, 16], strides = [1, 1]} : vector<2x32xf32> to vector<2x16xf32>
    %314 = math.tanh %313 : vector<2x16xf32>
    %315 = vector.extract_strided_slice %312 {offsets = [0, 16], sizes = [2, 16], strides = [1, 1]} : vector<2x32xf32> to vector<2x16xf32>
    %316 = math.exp %314 : vector<2x16xf32>
    %317 = arith.mulf %261, %316 : vector<2x16xf32>
    %318 = arith.addf %317, %315 : vector<2x16xf32>
    %cst_221 = arith.constant dense<0.000000e+00> : vector<2xf32>
    %319 = vector.multi_reduction <add>, %314, %cst_221 [1] : vector<2x16xf32> to vector<2xf32>
    %320 = vector.shape_cast %319 : vector<2xf32> to vector<2x1xf32>
    %321 = arith.addf %248, %320 : vector<2x1xf32>
    %322 = arith.truncf %318 : vector<2x16xf32> to vector<2x16xbf16>
    %c1_222 = arith.constant 1 : index
    %c0_223 = arith.constant 0 : index
    %c0_224 = arith.constant 0 : index
    %323 = vector.load %arg19[%c1_222, %c0_223, %c0_224] : memref<4x16x64xbf16, #tpu.memory_space<vmem>>, vector<1x16x64xbf16>
    %324 = vector.shape_cast %323 : vector<1x16x64xbf16> to vector<16x64xbf16>
    %cst_225 = arith.constant dense<0.000000e+00> : vector<2x64xf32>
    %325 = tpu.matmul %322, %324, %cst_225 {dimension_numbers = #tpu.dot_dimension_numbers<[1], [0], [0], [1], [0, 0, 1, 1], [], []>} : vector<2x16xbf16>, vector<16x64xbf16>, vector<2x64xf32> -> vector<2x64xf32>
    %c1_226 = arith.constant 1 : index
    %c0_227 = arith.constant 0 : index
    %c0_228 = arith.constant 0 : index
    %326 = vector.load %arg20[%c1_226, %c0_227, %c0_228] : memref<4x16x64xbf16, #tpu.memory_space<vmem>>, vector<1x16x64xbf16>
    %327 = vector.shape_cast %326 : vector<1x16x64xbf16> to vector<16x64xbf16>
    %cst_229 = arith.constant dense<0.000000e+00> : vector<2x64xf32>
    %328 = tpu.matmul %243, %327, %cst_229 {dimension_numbers = #tpu.dot_dimension_numbers<[1], [0], [0], [1], [0, 0, 1, 1], [], []>} : vector<2x16xbf16>, vector<16x64xbf16>, vector<2x64xf32> -> vector<2x64xf32>
    %329 = arith.addf %325, %328 : vector<2x64xf32>
    %c1_230 = arith.constant 1 : index
    %c0_231 = arith.constant 0 : index
    %c0_232 = arith.constant 0 : index
    %330 = vector.load %arg21[%c1_230, %c0_231, %c0_232] : memref<4x1x64xf32, #tpu.memory_space<vmem>>, vector<1x1x64xf32>
    %331 = vector.shape_cast %330 : vector<1x1x64xf32> to vector<1x64xf32>
    %332 = vector.broadcast %331 : vector<1x64xf32> to vector<2x64xf32>
    %333 = arith.addf %329, %332 : vector<2x64xf32>
    %cst_233 = arith.constant 0.000000e+00 : f32
    %334 = vector.broadcast %cst_233 : f32 to vector<2x64xf32>
    %335 = arith.cmpf oge, %333, %334 : vector<2x64xf32>
    %cst_234 = arith.constant 0.00999999977 : f32
    %336 = vector.broadcast %cst_234 : f32 to vector<2x64xf32>
    %337 = arith.mulf %336, %333 : vector<2x64xf32>
    %338 = arith.select %335, %333, %337 : vector<2x64xi1>, vector<2x64xf32>
    %339 = arith.truncf %338 : vector<2x64xf32> to vector<2x64xbf16>
    %c1_235 = arith.constant 1 : index
    %c0_236 = arith.constant 0 : index
    %c0_237 = arith.constant 0 : index
    %340 = vector.load %arg22[%c1_235, %c0_236, %c0_237] : memref<4x64x64xbf16, #tpu.memory_space<vmem>>, vector<1x64x64xbf16>
    %341 = vector.shape_cast %340 : vector<1x64x64xbf16> to vector<64x64xbf16>
    %cst_238 = arith.constant dense<0.000000e+00> : vector<2x64xf32>
    %342 = tpu.matmul %339, %341, %cst_238 {dimension_numbers = #tpu.dot_dimension_numbers<[1], [0], [0], [1], [0, 0, 1, 1], [], []>} : vector<2x64xbf16>, vector<64x64xbf16>, vector<2x64xf32> -> vector<2x64xf32>
    %c1_239 = arith.constant 1 : index
    %c0_240 = arith.constant 0 : index
    %c0_241 = arith.constant 0 : index
    %343 = vector.load %arg23[%c1_239, %c0_240, %c0_241] : memref<4x1x64xf32, #tpu.memory_space<vmem>>, vector<1x1x64xf32>
    %344 = vector.shape_cast %343 : vector<1x1x64xf32> to vector<1x64xf32>
    %345 = vector.broadcast %344 : vector<1x64xf32> to vector<2x64xf32>
    %346 = arith.addf %342, %345 : vector<2x64xf32>
    %cst_242 = arith.constant 0.000000e+00 : f32
    %347 = vector.broadcast %cst_242 : f32 to vector<2x64xf32>
    %348 = arith.cmpf oge, %346, %347 : vector<2x64xf32>
    %cst_243 = arith.constant 0.00999999977 : f32
    %349 = vector.broadcast %cst_243 : f32 to vector<2x64xf32>
    %350 = arith.mulf %349, %346 : vector<2x64xf32>
    %351 = arith.select %348, %346, %350 : vector<2x64xi1>, vector<2x64xf32>
    %352 = arith.truncf %351 : vector<2x64xf32> to vector<2x64xbf16>
    %c1_244 = arith.constant 1 : index
    %c0_245 = arith.constant 0 : index
    %c0_246 = arith.constant 0 : index
    %353 = vector.load %arg24[%c1_244, %c0_245, %c0_246] : memref<4x64x64xbf16, #tpu.memory_space<vmem>>, vector<1x64x64xbf16>
    %354 = vector.shape_cast %353 : vector<1x64x64xbf16> to vector<64x64xbf16>
    %cst_247 = arith.constant dense<0.000000e+00> : vector<2x64xf32>
    %355 = tpu.matmul %352, %354, %cst_247 {dimension_numbers = #tpu.dot_dimension_numbers<[1], [0], [0], [1], [0, 0, 1, 1], [], []>} : vector<2x64xbf16>, vector<64x64xbf16>, vector<2x64xf32> -> vector<2x64xf32>
    %c1_248 = arith.constant 1 : index
    %c0_249 = arith.constant 0 : index
    %c0_250 = arith.constant 0 : index
    %356 = vector.load %arg25[%c1_248, %c0_249, %c0_250] : memref<4x1x64xf32, #tpu.memory_space<vmem>>, vector<1x1x64xf32>
    %357 = vector.shape_cast %356 : vector<1x1x64xf32> to vector<1x64xf32>
    %358 = vector.broadcast %357 : vector<1x64xf32> to vector<2x64xf32>
    %359 = arith.addf %355, %358 : vector<2x64xf32>
    %cst_251 = arith.constant 0.000000e+00 : f32
    %360 = vector.broadcast %cst_251 : f32 to vector<2x64xf32>
    %361 = arith.cmpf oge, %359, %360 : vector<2x64xf32>
    %cst_252 = arith.constant 0.00999999977 : f32
    %362 = vector.broadcast %cst_252 : f32 to vector<2x64xf32>
    %363 = arith.mulf %362, %359 : vector<2x64xf32>
    %364 = arith.select %361, %359, %363 : vector<2x64xi1>, vector<2x64xf32>
    %365 = arith.truncf %364 : vector<2x64xf32> to vector<2x64xbf16>
    %c1_253 = arith.constant 1 : index
    %c0_254 = arith.constant 0 : index
    %c0_255 = arith.constant 0 : index
    %366 = vector.load %arg26[%c1_253, %c0_254, %c0_255] : memref<4x64x32xbf16, #tpu.memory_space<vmem>>, vector<1x64x32xbf16>
    %367 = vector.shape_cast %366 : vector<1x64x32xbf16> to vector<64x32xbf16>
    %cst_256 = arith.constant dense<0.000000e+00> : vector<2x32xf32>
    %368 = tpu.matmul %365, %367, %cst_256 {dimension_numbers = #tpu.dot_dimension_numbers<[1], [0], [0], [1], [0, 0, 1, 1], [], []>} : vector<2x64xbf16>, vector<64x32xbf16>, vector<2x32xf32> -> vector<2x32xf32>
    %c1_257 = arith.constant 1 : index
    %c0_258 = arith.constant 0 : index
    %c0_259 = arith.constant 0 : index
    %369 = vector.load %arg27[%c1_257, %c0_258, %c0_259] : memref<4x1x32xf32, #tpu.memory_space<vmem>>, vector<1x1x32xf32>
    %370 = vector.shape_cast %369 : vector<1x1x32xf32> to vector<1x32xf32>
    %371 = vector.broadcast %370 : vector<1x32xf32> to vector<2x32xf32>
    %372 = arith.addf %368, %371 : vector<2x32xf32>
    %373 = vector.extract_strided_slice %372 {offsets = [0, 0], sizes = [2, 16], strides = [1, 1]} : vector<2x32xf32> to vector<2x16xf32>
    %374 = math.tanh %373 : vector<2x16xf32>
    %375 = vector.extract_strided_slice %372 {offsets = [0, 16], sizes = [2, 16], strides = [1, 1]} : vector<2x32xf32> to vector<2x16xf32>
    %376 = math.exp %374 : vector<2x16xf32>
    %377 = arith.mulf %318, %376 : vector<2x16xf32>
    %378 = arith.addf %377, %375 : vector<2x16xf32>
    %cst_260 = arith.constant dense<0.000000e+00> : vector<2xf32>
    %379 = vector.multi_reduction <add>, %374, %cst_260 [1] : vector<2x16xf32> to vector<2xf32>
    %380 = vector.shape_cast %379 : vector<2xf32> to vector<2x1xf32>
    %381 = arith.addf %321, %380 : vector<2x1xf32>
    %c1_261 = arith.constant 1 : index
    %c0_262 = arith.constant 0 : index
    %c0_263 = arith.constant 0 : index
    %382 = vector.load %arg29[%c1_261, %c0_262, %c0_263] : memref<2x1x16xf32, #tpu.memory_space<vmem>>, vector<1x1x16xf32>
    %383 = vector.shape_cast %382 : vector<1x1x16xf32> to vector<1x16xf32>
    %c1_264 = arith.constant 1 : index
    %c0_265 = arith.constant 0 : index
    %c0_266 = arith.constant 0 : index
    %384 = vector.load %arg28[%c1_264, %c0_265, %c0_266] : memref<2x1x16xf32, #tpu.memory_space<vmem>>, vector<1x1x16xf32>
    %385 = vector.shape_cast %384 : vector<1x1x16xf32> to vector<1x16xf32>
    %386 = vector.broadcast %385 : vector<1x16xf32> to vector<2x16xf32>
    %387 = arith.addf %378, %386 : vector<2x16xf32>
    %388 = vector.broadcast %383 : vector<1x16xf32> to vector<2x16xf32>
    %389 = arith.mulf %388, %387 : vector<2x16xf32>
    %cst_267 = arith.constant 0.000000e+00 : f32
    %390 = vector.broadcast %cst_267 : f32 to vector<2x16xf32>
    %391 = arith.cmpf oge, %389, %390 : vector<2x16xf32>
    %cst_268 = arith.constant 0.899999976 : f32
    %392 = vector.broadcast %cst_268 : f32 to vector<2x16xf32>
    %393 = arith.mulf %392, %389 : vector<2x16xf32>
    %394 = arith.select %391, %389, %393 : vector<2x16xi1>, vector<2x16xf32>
    %395 = arith.truncf %394 : vector<2x16xf32> to vector<2x16xbf16>
    %c2_269 = arith.constant 2 : index
    %c0_270 = arith.constant 0 : index
    %c0_271 = arith.constant 0 : index
    %396 = vector.load %arg19[%c2_269, %c0_270, %c0_271] : memref<4x16x64xbf16, #tpu.memory_space<vmem>>, vector<1x16x64xbf16>
    %397 = vector.shape_cast %396 : vector<1x16x64xbf16> to vector<16x64xbf16>
    %cst_272 = arith.constant dense<0.000000e+00> : vector<2x64xf32>
    %398 = tpu.matmul %395, %397, %cst_272 {dimension_numbers = #tpu.dot_dimension_numbers<[1], [0], [0], [1], [0, 0, 1, 1], [], []>} : vector<2x16xbf16>, vector<16x64xbf16>, vector<2x64xf32> -> vector<2x64xf32>
    %c2_273 = arith.constant 2 : index
    %c0_274 = arith.constant 0 : index
    %c0_275 = arith.constant 0 : index
    %399 = vector.load %arg20[%c2_273, %c0_274, %c0_275] : memref<4x16x64xbf16, #tpu.memory_space<vmem>>, vector<1x16x64xbf16>
    %400 = vector.shape_cast %399 : vector<1x16x64xbf16> to vector<16x64xbf16>
    %cst_276 = arith.constant dense<0.000000e+00> : vector<2x64xf32>
    %401 = tpu.matmul %243, %400, %cst_276 {dimension_numbers = #tpu.dot_dimension_numbers<[1], [0], [0], [1], [0, 0, 1, 1], [], []>} : vector<2x16xbf16>, vector<16x64xbf16>, vector<2x64xf32> -> vector<2x64xf32>
    %402 = arith.addf %398, %401 : vector<2x64xf32>
    %c2_277 = arith.constant 2 : index
    %c0_278 = arith.constant 0 : index
    %c0_279 = arith.constant 0 : index
    %403 = vector.load %arg21[%c2_277, %c0_278, %c0_279] : memref<4x1x64xf32, #tpu.memory_space<vmem>>, vector<1x1x64xf32>
    %404 = vector.shape_cast %403 : vector<1x1x64xf32> to vector<1x64xf32>
    %405 = vector.broadcast %404 : vector<1x64xf32> to vector<2x64xf32>
    %406 = arith.addf %402, %405 : vector<2x64xf32>
    %cst_280 = arith.constant 0.000000e+00 : f32
    %407 = vector.broadcast %cst_280 : f32 to vector<2x64xf32>
    %408 = arith.cmpf oge, %406, %407 : vector<2x64xf32>
    %cst_281 = arith.constant 0.00999999977 : f32
    %409 = vector.broadcast %cst_281 : f32 to vector<2x64xf32>
    %410 = arith.mulf %409, %406 : vector<2x64xf32>
    %411 = arith.select %408, %406, %410 : vector<2x64xi1>, vector<2x64xf32>
    %412 = arith.truncf %411 : vector<2x64xf32> to vector<2x64xbf16>
    %c2_282 = arith.constant 2 : index
    %c0_283 = arith.constant 0 : index
    %c0_284 = arith.constant 0 : index
    %413 = vector.load %arg22[%c2_282, %c0_283, %c0_284] : memref<4x64x64xbf16, #tpu.memory_space<vmem>>, vector<1x64x64xbf16>
    %414 = vector.shape_cast %413 : vector<1x64x64xbf16> to vector<64x64xbf16>
    %cst_285 = arith.constant dense<0.000000e+00> : vector<2x64xf32>
    %415 = tpu.matmul %412, %414, %cst_285 {dimension_numbers = #tpu.dot_dimension_numbers<[1], [0], [0], [1], [0, 0, 1, 1], [], []>} : vector<2x64xbf16>, vector<64x64xbf16>, vector<2x64xf32> -> vector<2x64xf32>
    %c2_286 = arith.constant 2 : index
    %c0_287 = arith.constant 0 : index
    %c0_288 = arith.constant 0 : index
    %416 = vector.load %arg23[%c2_286, %c0_287, %c0_288] : memref<4x1x64xf32, #tpu.memory_space<vmem>>, vector<1x1x64xf32>
    %417 = vector.shape_cast %416 : vector<1x1x64xf32> to vector<1x64xf32>
    %418 = vector.broadcast %417 : vector<1x64xf32> to vector<2x64xf32>
    %419 = arith.addf %415, %418 : vector<2x64xf32>
    %cst_289 = arith.constant 0.000000e+00 : f32
    %420 = vector.broadcast %cst_289 : f32 to vector<2x64xf32>
    %421 = arith.cmpf oge, %419, %420 : vector<2x64xf32>
    %cst_290 = arith.constant 0.00999999977 : f32
    %422 = vector.broadcast %cst_290 : f32 to vector<2x64xf32>
    %423 = arith.mulf %422, %419 : vector<2x64xf32>
    %424 = arith.select %421, %419, %423 : vector<2x64xi1>, vector<2x64xf32>
    %425 = arith.truncf %424 : vector<2x64xf32> to vector<2x64xbf16>
    %c2_291 = arith.constant 2 : index
    %c0_292 = arith.constant 0 : index
    %c0_293 = arith.constant 0 : index
    %426 = vector.load %arg24[%c2_291, %c0_292, %c0_293] : memref<4x64x64xbf16, #tpu.memory_space<vmem>>, vector<1x64x64xbf16>
    %427 = vector.shape_cast %426 : vector<1x64x64xbf16> to vector<64x64xbf16>
    %cst_294 = arith.constant dense<0.000000e+00> : vector<2x64xf32>
    %428 = tpu.matmul %425, %427, %cst_294 {dimension_numbers = #tpu.dot_dimension_numbers<[1], [0], [0], [1], [0, 0, 1, 1], [], []>} : vector<2x64xbf16>, vector<64x64xbf16>, vector<2x64xf32> -> vector<2x64xf32>
    %c2_295 = arith.constant 2 : index
    %c0_296 = arith.constant 0 : index
    %c0_297 = arith.constant 0 : index
    %429 = vector.load %arg25[%c2_295, %c0_296, %c0_297] : memref<4x1x64xf32, #tpu.memory_space<vmem>>, vector<1x1x64xf32>
    %430 = vector.shape_cast %429 : vector<1x1x64xf32> to vector<1x64xf32>
    %431 = vector.broadcast %430 : vector<1x64xf32> to vector<2x64xf32>
    %432 = arith.addf %428, %431 : vector<2x64xf32>
    %cst_298 = arith.constant 0.000000e+00 : f32
    %433 = vector.broadcast %cst_298 : f32 to vector<2x64xf32>
    %434 = arith.cmpf oge, %432, %433 : vector<2x64xf32>
    %cst_299 = arith.constant 0.00999999977 : f32
    %435 = vector.broadcast %cst_299 : f32 to vector<2x64xf32>
    %436 = arith.mulf %435, %432 : vector<2x64xf32>
    %437 = arith.select %434, %432, %436 : vector<2x64xi1>, vector<2x64xf32>
    %438 = arith.truncf %437 : vector<2x64xf32> to vector<2x64xbf16>
    %c2_300 = arith.constant 2 : index
    %c0_301 = arith.constant 0 : index
    %c0_302 = arith.constant 0 : index
    %439 = vector.load %arg26[%c2_300, %c0_301, %c0_302] : memref<4x64x32xbf16, #tpu.memory_space<vmem>>, vector<1x64x32xbf16>
    %440 = vector.shape_cast %439 : vector<1x64x32xbf16> to vector<64x32xbf16>
    %cst_303 = arith.constant dense<0.000000e+00> : vector<2x32xf32>
    %441 = tpu.matmul %438, %440, %cst_303 {dimension_numbers = #tpu.dot_dimension_numbers<[1], [0], [0], [1], [0, 0, 1, 1], [], []>} : vector<2x64xbf16>, vector<64x32xbf16>, vector<2x32xf32> -> vector<2x32xf32>
    %c2_304 = arith.constant 2 : index
    %c0_305 = arith.constant 0 : index
    %c0_306 = arith.constant 0 : index
    %442 = vector.load %arg27[%c2_304, %c0_305, %c0_306] : memref<4x1x32xf32, #tpu.memory_space<vmem>>, vector<1x1x32xf32>
    %443 = vector.shape_cast %442 : vector<1x1x32xf32> to vector<1x32xf32>
    %444 = vector.broadcast %443 : vector<1x32xf32> to vector<2x32xf32>
    %445 = arith.addf %441, %444 : vector<2x32xf32>
    %446 = vector.extract_strided_slice %445 {offsets = [0, 0], sizes = [2, 16], strides = [1, 1]} : vector<2x32xf32> to vector<2x16xf32>
    %447 = math.tanh %446 : vector<2x16xf32>
    %448 = vector.extract_strided_slice %445 {offsets = [0, 16], sizes = [2, 16], strides = [1, 1]} : vector<2x32xf32> to vector<2x16xf32>
    %449 = math.exp %447 : vector<2x16xf32>
    %450 = arith.mulf %394, %449 : vector<2x16xf32>
    %451 = arith.addf %450, %448 : vector<2x16xf32>
    %cst_307 = arith.constant dense<0.000000e+00> : vector<2xf32>
    %452 = vector.multi_reduction <add>, %447, %cst_307 [1] : vector<2x16xf32> to vector<2xf32>
    %453 = vector.shape_cast %452 : vector<2xf32> to vector<2x1xf32>
    %454 = arith.addf %381, %453 : vector<2x1xf32>
    %455 = arith.truncf %451 : vector<2x16xf32> to vector<2x16xbf16>
    %c3_308 = arith.constant 3 : index
    %c0_309 = arith.constant 0 : index
    %c0_310 = arith.constant 0 : index
    %456 = vector.load %arg19[%c3_308, %c0_309, %c0_310] : memref<4x16x64xbf16, #tpu.memory_space<vmem>>, vector<1x16x64xbf16>
    %457 = vector.shape_cast %456 : vector<1x16x64xbf16> to vector<16x64xbf16>
    %cst_311 = arith.constant dense<0.000000e+00> : vector<2x64xf32>
    %458 = tpu.matmul %455, %457, %cst_311 {dimension_numbers = #tpu.dot_dimension_numbers<[1], [0], [0], [1], [0, 0, 1, 1], [], []>} : vector<2x16xbf16>, vector<16x64xbf16>, vector<2x64xf32> -> vector<2x64xf32>
    %c3_312 = arith.constant 3 : index
    %c0_313 = arith.constant 0 : index
    %c0_314 = arith.constant 0 : index
    %459 = vector.load %arg20[%c3_312, %c0_313, %c0_314] : memref<4x16x64xbf16, #tpu.memory_space<vmem>>, vector<1x16x64xbf16>
    %460 = vector.shape_cast %459 : vector<1x16x64xbf16> to vector<16x64xbf16>
    %cst_315 = arith.constant dense<0.000000e+00> : vector<2x64xf32>
    %461 = tpu.matmul %243, %460, %cst_315 {dimension_numbers = #tpu.dot_dimension_numbers<[1], [0], [0], [1], [0, 0, 1, 1], [], []>} : vector<2x16xbf16>, vector<16x64xbf16>, vector<2x64xf32> -> vector<2x64xf32>
    %462 = arith.addf %458, %461 : vector<2x64xf32>
    %c3_316 = arith.constant 3 : index
    %c0_317 = arith.constant 0 : index
    %c0_318 = arith.constant 0 : index
    %463 = vector.load %arg21[%c3_316, %c0_317, %c0_318] : memref<4x1x64xf32, #tpu.memory_space<vmem>>, vector<1x1x64xf32>
    %464 = vector.shape_cast %463 : vector<1x1x64xf32> to vector<1x64xf32>
    %465 = vector.broadcast %464 : vector<1x64xf32> to vector<2x64xf32>
    %466 = arith.addf %462, %465 : vector<2x64xf32>
    %cst_319 = arith.constant 0.000000e+00 : f32
    %467 = vector.broadcast %cst_319 : f32 to vector<2x64xf32>
    %468 = arith.cmpf oge, %466, %467 : vector<2x64xf32>
    %cst_320 = arith.constant 0.00999999977 : f32
    %469 = vector.broadcast %cst_320 : f32 to vector<2x64xf32>
    %470 = arith.mulf %469, %466 : vector<2x64xf32>
    %471 = arith.select %468, %466, %470 : vector<2x64xi1>, vector<2x64xf32>
    %472 = arith.truncf %471 : vector<2x64xf32> to vector<2x64xbf16>
    %c3_321 = arith.constant 3 : index
    %c0_322 = arith.constant 0 : index
    %c0_323 = arith.constant 0 : index
    %473 = vector.load %arg22[%c3_321, %c0_322, %c0_323] : memref<4x64x64xbf16, #tpu.memory_space<vmem>>, vector<1x64x64xbf16>
    %474 = vector.shape_cast %473 : vector<1x64x64xbf16> to vector<64x64xbf16>
    %cst_324 = arith.constant dense<0.000000e+00> : vector<2x64xf32>
    %475 = tpu.matmul %472, %474, %cst_324 {dimension_numbers = #tpu.dot_dimension_numbers<[1], [0], [0], [1], [0, 0, 1, 1], [], []>} : vector<2x64xbf16>, vector<64x64xbf16>, vector<2x64xf32> -> vector<2x64xf32>
    %c3_325 = arith.constant 3 : index
    %c0_326 = arith.constant 0 : index
    %c0_327 = arith.constant 0 : index
    %476 = vector.load %arg23[%c3_325, %c0_326, %c0_327] : memref<4x1x64xf32, #tpu.memory_space<vmem>>, vector<1x1x64xf32>
    %477 = vector.shape_cast %476 : vector<1x1x64xf32> to vector<1x64xf32>
    %478 = vector.broadcast %477 : vector<1x64xf32> to vector<2x64xf32>
    %479 = arith.addf %475, %478 : vector<2x64xf32>
    %cst_328 = arith.constant 0.000000e+00 : f32
    %480 = vector.broadcast %cst_328 : f32 to vector<2x64xf32>
    %481 = arith.cmpf oge, %479, %480 : vector<2x64xf32>
    %cst_329 = arith.constant 0.00999999977 : f32
    %482 = vector.broadcast %cst_329 : f32 to vector<2x64xf32>
    %483 = arith.mulf %482, %479 : vector<2x64xf32>
    %484 = arith.select %481, %479, %483 : vector<2x64xi1>, vector<2x64xf32>
    %485 = arith.truncf %484 : vector<2x64xf32> to vector<2x64xbf16>
    %c3_330 = arith.constant 3 : index
    %c0_331 = arith.constant 0 : index
    %c0_332 = arith.constant 0 : index
    %486 = vector.load %arg24[%c3_330, %c0_331, %c0_332] : memref<4x64x64xbf16, #tpu.memory_space<vmem>>, vector<1x64x64xbf16>
    %487 = vector.shape_cast %486 : vector<1x64x64xbf16> to vector<64x64xbf16>
    %cst_333 = arith.constant dense<0.000000e+00> : vector<2x64xf32>
    %488 = tpu.matmul %485, %487, %cst_333 {dimension_numbers = #tpu.dot_dimension_numbers<[1], [0], [0], [1], [0, 0, 1, 1], [], []>} : vector<2x64xbf16>, vector<64x64xbf16>, vector<2x64xf32> -> vector<2x64xf32>
    %c3_334 = arith.constant 3 : index
    %c0_335 = arith.constant 0 : index
    %c0_336 = arith.constant 0 : index
    %489 = vector.load %arg25[%c3_334, %c0_335, %c0_336] : memref<4x1x64xf32, #tpu.memory_space<vmem>>, vector<1x1x64xf32>
    %490 = vector.shape_cast %489 : vector<1x1x64xf32> to vector<1x64xf32>
    %491 = vector.broadcast %490 : vector<1x64xf32> to vector<2x64xf32>
    %492 = arith.addf %488, %491 : vector<2x64xf32>
    %cst_337 = arith.constant 0.000000e+00 : f32
    %493 = vector.broadcast %cst_337 : f32 to vector<2x64xf32>
    %494 = arith.cmpf oge, %492, %493 : vector<2x64xf32>
    %cst_338 = arith.constant 0.00999999977 : f32
    %495 = vector.broadcast %cst_338 : f32 to vector<2x64xf32>
    %496 = arith.mulf %495, %492 : vector<2x64xf32>
    %497 = arith.select %494, %492, %496 : vector<2x64xi1>, vector<2x64xf32>
    %498 = arith.truncf %497 : vector<2x64xf32> to vector<2x64xbf16>
    %c3_339 = arith.constant 3 : index
    %c0_340 = arith.constant 0 : index
    %c0_341 = arith.constant 0 : index
    %499 = vector.load %arg26[%c3_339, %c0_340, %c0_341] : memref<4x64x32xbf16, #tpu.memory_space<vmem>>, vector<1x64x32xbf16>
    %500 = vector.shape_cast %499 : vector<1x64x32xbf16> to vector<64x32xbf16>
    %cst_342 = arith.constant dense<0.000000e+00> : vector<2x32xf32>
    %501 = tpu.matmul %498, %500, %cst_342 {dimension_numbers = #tpu.dot_dimension_numbers<[1], [0], [0], [1], [0, 0, 1, 1], [], []>} : vector<2x64xbf16>, vector<64x32xbf16>, vector<2x32xf32> -> vector<2x32xf32>
    %c3_343 = arith.constant 3 : index
    %c0_344 = arith.constant 0 : index
    %c0_345 = arith.constant 0 : index
    %502 = vector.load %arg27[%c3_343, %c0_344, %c0_345] : memref<4x1x32xf32, #tpu.memory_space<vmem>>, vector<1x1x32xf32>
    %503 = vector.shape_cast %502 : vector<1x1x32xf32> to vector<1x32xf32>
    %504 = vector.broadcast %503 : vector<1x32xf32> to vector<2x32xf32>
    %505 = arith.addf %501, %504 : vector<2x32xf32>
    %506 = vector.extract_strided_slice %505 {offsets = [0, 0], sizes = [2, 16], strides = [1, 1]} : vector<2x32xf32> to vector<2x16xf32>
    %507 = math.tanh %506 : vector<2x16xf32>
    %508 = vector.extract_strided_slice %505 {offsets = [0, 16], sizes = [2, 16], strides = [1, 1]} : vector<2x32xf32> to vector<2x16xf32>
    %509 = math.exp %507 : vector<2x16xf32>
    %510 = arith.mulf %451, %509 : vector<2x16xf32>
    %511 = arith.addf %510, %508 : vector<2x16xf32>
    %cst_346 = arith.constant dense<0.000000e+00> : vector<2xf32>
    %512 = vector.multi_reduction <add>, %507, %cst_346 [1] : vector<2x16xf32> to vector<2xf32>
    %513 = vector.shape_cast %512 : vector<2xf32> to vector<2x1xf32>
    %514 = arith.addf %454, %513 : vector<2x1xf32>
    %c0_347 = arith.constant 0 : index
    %c0_348 = arith.constant 0 : index
    %515 = vector.load %arg30[%c0_347, %c0_348] : memref<16x16xf32, #tpu.memory_space<vmem>>, vector<16x16xf32>
    %cst_349 = arith.constant dense<0.000000e+00> : vector<2x16xf32>
    %516 = tpu.matmul %511, %515, %cst_349 {dimension_numbers = #tpu.dot_dimension_numbers<[1], [0], [0], [1], [0, 0, 1, 1], [], []>} : vector<2x16xf32>, vector<16x16xf32>, vector<2x16xf32> -> vector<2x16xf32>
    %c0_350 = arith.constant 0 : index
    %c0_351 = arith.constant 0 : index
    %517 = vector.load %arg32[%c0_350, %c0_351] : memref<2x16xf32, #tpu.memory_space<vmem>>, vector<2x16xf32>
    tpu.vector_store %arg32[%c0_350, %c0_351], %516 {strides = array<i32>} : memref<2x16xf32, #tpu.memory_space<vmem>>, vector<2x16xf32>,
    %c0_352 = arith.constant 0 : index
    %c0_353 = arith.constant 0 : index
    %518 = vector.load %arg33[%c0_352, %c0_353] : memref<2x1xf32, #tpu.memory_space<vmem>>, vector<2x1xf32>
    tpu.vector_store %arg33[%c0_352, %c0_353], %514 {strides = array<i32>} : memref<2x1xf32, #tpu.memory_space<vmem>>, vector<2x1xf32>,
    return
  }
}

</mosaic_0001>

<bundles_post_ra>
// kernel: conditional_transformer_forward.1
= control target key start
LH: loop header
LB: loop body
LE: loop exit
PB: predicated region body
PF: predicated region fallthrough
CT: control target
= control target key end

     0   :  { %s12014_s6 = smov 1   ;;  %s12015_s10 = smov 2   ;;  %s13046_s0 = inlined_call_operand.smem [shape: u32[34], index: -1, kind: input, shape index: {}] }
   0x1   :  { %s12067_s5 = sld [smem:[%s13046_s0]]   ;;  %s12016_s14 = smov 3  }
   0x2   :  { %s12072_s9 = sld [smem:[%s13046_s0 + %s12014_s6]]   ;;  %s12017_s18 = smov 4  }
   0x3   :  { %s12077_s13 = sld [smem:[%s13046_s0 + %s12015_s10]]   ;;  %s12018_s22 = smov 5  }
   0x4   :  { %s12082_s17 = sld [smem:[%s13046_s0 + %s12016_s14]]   ;;  %s12019_s26 = smov 6  }
   0x5   :  { %s12087_s21 = sld [smem:[%s13046_s0 + %s12017_s18]]   ;;  %s12020_s30 = smov 7  }
   0x6   :  { %s12092_s25 = sld [smem:[%s13046_s0 + %s12018_s22]]   ;;  %s12021_s4 = smov 8  }
   0x7   :  { %s12097_s29 = sld [smem:[%s13046_s0 + %s12019_s26]]   ;;  %s12022_s10 = smov 9  }
   0x8   :  { %13059 = sst [smem:[#allocation12_spill]] %s12072_s9  ;;  %s12023_s15 = smov 10  }
   0x9   :  { %s12102_s3 = sld [smem:[%s13046_s0 + %s12020_s30]]   ;;  %s12024_s20 = smov 11  }
   0xa   :  { %s12107_s8 = sld [smem:[%s13046_s0 + %s12021_s4]]   ;;  %s12025_s26 = smov 12  }
   0xb   :  { %s12112_s14 = sld [smem:[%s13046_s0 + %s12022_s10]]   ;;  %s12026_s1 = smov 13  }
   0xc   :  { %s12117_s19 = sld [smem:[%s13046_s0 + %s12023_s15]]   ;;  %s12027_s7 = smov 14  }
   0xd   :  { %s12122_s24 = sld [smem:[%s13046_s0 + %s12024_s20]]   ;;  %s12028_s15 = smov 15  }
   0xe   :  { %s12127_s30 = sld [smem:[%s13046_s0 + %s12025_s26]]   ;;  %s12029_s22 = smov 16  }
   0xf   :  { %s12132_s6 = sld [smem:[%s13046_s0 + %s12026_s1]]   ;;  %s12030_s28 = smov 17  }
  0x10   :  { %s12137_s12 = sld [smem:[%s13046_s0 + %s12027_s7]]   ;;  %s12031_s7 = smov 18  }
  0x11   :  { %s12142_s20 = sld [smem:[%s13046_s0 + %s12028_s15]]   ;;  %s12032_s15 = smov 19  }
  0x12   :  { %s12147_s27 = sld [smem:[%s13046_s0 + %s12029_s22]]   ;;  %s12033_s22 = smov 20  }
  0x13   :  { %s12152_s4 = sld [smem:[%s13046_s0 + %s12030_s28]]   ;;  %s12034_s28 = smov 21  }
  0x14   :  { %s12157_s9 = sld [smem:[%s13046_s0 + %s12031_s7]]   ;;  %s12035_s7 = smov 22  }
  0x15   :  { %s12045_s23 = smov 32   ;;  %s12046_s1 = smov 33  }
  0x17   :  { %13060 = sst [smem:[#allocation13_spill]] %s12142_s20 }
  0x18   :  { %13061 = sst [smem:[#allocation14_spill]] %s12147_s27 }
  0x19   :  { %13062 = sst [smem:[#allocation15_spill]] %s12152_s4 }
  0x1a   :  { %13063 = sst [smem:[#allocation16_spill]] %s12157_s9 }
  0x1b   :  { %s12162_s20 = sld [smem:[%s13046_s0 + %s12032_s15]]   ;;  %s12036_s15 = smov 23  }
  0x1c   :  { %s12167_s27 = sld [smem:[%s13046_s0 + %s12033_s22]]   ;;  %s12037_s22 = smov 24  }
  0x1d   :  { %s12172_s4 = sld [smem:[%s13046_s0 + %s12034_s28]]   ;;  %s12038_s28 = smov 25  }
  0x1e   :  { %s12177_s9 = sld [smem:[%s13046_s0 + %s12035_s7]]   ;;  %s12039_s7 = smov 26  }
  0x21   :  { %13064 = sst [smem:[#allocation17_spill]] %s12162_s20 }
  0x22   :  { %13065 = sst [smem:[#allocation18_spill]] %s12167_s27 }
  0x23   :  { %13066 = sst [smem:[#allocation19_spill]] %s12172_s4 }
  0x24   :  { %13067 = sst [smem:[#allocation20_spill]] %s12177_s9 }
  0x25   :  { %s12182_s20 = sld [smem:[%s13046_s0 + %s12036_s15]]   ;;  %s12040_s15 = smov 27  }
  0x26   :  { %s12187_s27 = sld [smem:[%s13046_s0 + %s12037_s22]]   ;;  %s12041_s22 = smov 28  }
  0x27   :  { %s12192_s4 = sld [smem:[%s13046_s0 + %s12038_s28]]   ;;  %s12042_s28 = smov 29  }
  0x28   :  { %s12197_s9 = sld [smem:[%s13046_s0 + %s12039_s7]]   ;;  %s12043_s7 = smov 30  }
  0x2b   :  { %13068 = sst [smem:[#allocation21_spill]] %s12182_s20 }
  0x2c   :  { %13069 = sst [smem:[#allocation22_spill]] %s12187_s27 }
  0x2d   :  { %13070 = sst [smem:[#allocation23_spill]] %s12192_s4 }
  0x2e   :  { %13071 = sst [smem:[#allocation24_spill]] %s12197_s9 }
  0x2f   :  { %s12202_s20 = sld [smem:[%s13046_s0 + %s12040_s15]]   ;;  %s12044_s15 = smov 31  }
  0x30   :  { %s12207_s27 = sld [smem:[%s13046_s0 + %s12041_s22]]  }
  0x31   :  { %s12212_s4 = sld [smem:[%s13046_s0 + %s12042_s28]]  }
  0x32   :  { %s12217_s9 = sld [smem:[%s13046_s0 + %s12043_s7]]  }
  0x35   :  { %13072 = sst [smem:[#allocation25_spill]] %s12202_s20 }
  0x36   :  { %13073 = sst [smem:[#allocation26_spill]] %s12207_s27 }
  0x37   :  { %13074 = sst [smem:[#allocation27_spill]] %s12212_s4 }
  0x38   :  { %s9047_s20 = sld [smem:[%s13046_s0 + %s12044_s15]]  }
  0x39   :  { %s12225_s27 = sld [smem:[%s13046_s0 + %s12045_s23]]  }
  0x3a   :  { %s12230_s4 = sld [smem:[%s13046_s0 + %s12046_s1]]  }
  0x3e   :  { %v73_v0 = vstv %s9047_s20 }
  0x3f   :  { %74 = vst [vmem:[#allocation2] sm:$0x1] %v73_v0 }
  0x40   :  { %75 = vsyncpa [#allocation4], 0 }
  0x41   :  { %76 = vsyncpa [#allocation7], 0 }
  0x42   :  { %77 = vsyncpa [#allocation5], 0  ;;  %s12047_s7 = smov [#allocation3]   ;;  %s11942_s11 = scalar_lea.hbm %s12117_s19, 32768 }
  0x43   :  { %s103_s10 = sshll.u32 %s12047_s7, 4  ;;  %p11943_p0 = scmp.ne.s32.totalorder %s12117_s19, %s11942_s11  ;;  %s104_s10 = int_to_ptr.vmem [resolvable:$true] %s103_s10 }
  0x44   :  { %p11946_p1 = scmp.lt.u32.totalorder %s11942_s11, %s12117_s19 }
  0x46   :  { %p11948_p2 = pnand %p11946_p1, %p11943_p0 }
  0x48   :  { %11951 = shalt.err (!%p11948_p2)
}
  0x49   :  { %s11952_s15 = scalar_lea.vmem %s104_s10, 32768  ;;  %p11957_p4 = scmp.lt.s32.totalorder %s104_s10, %s104_s10 }
  0x4a   :  { %p11953_p3 = scmp.ne.s32.totalorder %s104_s10, %s11952_s15  ;;  %p11958_p5 = scmp.lt.s32.totalorder %s11952_s15, %s11952_s15 }
  0x4c   :  { %p11959_p6 = por %p11958_p5, %p11957_p4 }
  0x4e   :  { %p11960_p7 = pnand %p11959_p6, %p11953_p3 }
  0x50   :  { %11963 = shalt.err (!%p11960_p7)
}
  0x51   :  { %s12048_s0 = smov 128   ;;  %s12049_s20 = smov 8  }
  0x52   :  { %109 = dma.hbm_to_vmem [thread:$0]  %s12117_s19, 32768, %s104_s10, [#allocation4], %s12048_s0, %s12048_s0, %s12049_s20  }
  0x53   :  { %s12050_s16 = smov [#allocation6]   ;;  %s11964_s23 = scalar_lea.hbm %s12137_s12, 32768 }
  0x54   :  { %s121_s18 = sshll.u32 %s12050_s16, 4  ;;  %p11965_p8 = scmp.ne.s32.totalorder %s12137_s12, %s11964_s23  ;;  %s122_s18 = int_to_ptr.vmem [resolvable:$true] %s121_s18 }
  0x55   :  { %p11968_p9 = scmp.lt.u32.totalorder %s11964_s23, %s12137_s12 }
  0x57   :  { %p11970_p10 = pnand %p11968_p9, %p11965_p8 }
  0x59   :  { %11973 = shalt.err (!%p11970_p10)
}
  0x5a   :  { %s11974_s22 = scalar_lea.vmem %s122_s18, 32768  ;;  %p11979_p12 = scmp.lt.s32.totalorder %s122_s18, %s122_s18 }
  0x5b   :  { %p11975_p11 = scmp.ne.s32.totalorder %s122_s18, %s11974_s22  ;;  %p11980_p13 = scmp.lt.s32.totalorder %s11974_s22, %s11974_s22 }
  0x5d   :  { %p11981_p0 = por %p11980_p13, %p11979_p12 }
  0x5f   :  { %p11982_p1 = pnand %p11981_p0, %p11975_p11 }
  0x61   :  { %11985 = shalt.err (!%p11982_p1)
}
  0x62   :  { %s12051_s26 = smov 256   ;;  %s12052_s1 = smov 16  }
  0x63   :  { %127 = dma.hbm_to_vmem [thread:$0]  %s12137_s12, 32768, %s122_s18, [#allocation7], %s12051_s26, %s12051_s26, %s12052_s1  }
  0x64   :  { %12008 = dma.done.wait [#allocation4], 32768  }
  0x65   :  { %12009 = vsyncadd [#allocation4], 4294934528 }
  0x66   :  { %12010 = dma.done.wait [#allocation7], 32768  }
  0x67   :  { %12011 = vsyncadd [#allocation7], 4294934528  ;;  %v10965_v1 = vld [vmem:[%s12077_s13] sm:$0xff]   ;;  %v170_v3 = vld [vmem:[%s12067_s5 + $0x8] sm:$0xff]  ;;  %vm209_vm0 = vcmask 130048   ;;  %s13076_s13 = sld [smem:[#allocation13_spill]] }
  0x68   :  { %v169_v2 = vld [vmem:[%s12067_s5] sm:$0xff]  ;;  %v171_v4 = vld [vmem:[%s12067_s5 + $0x10] sm:$0xff]  ;;  %10348 = vmatprep.subr.bf16.mxu1 %v10965_v1  ;;  %v172_v6 = vld [vmem:[%s12067_s5 + $0x18] sm:$0xff]  ;;  %s13084_s19 = sld [smem:[#allocation20_spill]]  ;;  %s13088_s12 = sld [smem:[#allocation21_spill]] }
  0x69   :  { %v185_v5 = vpack.c.bf16 %v170_v3, %v169_v2  ;;  %v173_v7 = vld [vmem:[%s12067_s5 + $0x20] sm:$0xff]  ;;  %v174_v8 = vld [vmem:[%s12067_s5 + $0x28] sm:$0xff]  ;;  %10349 = vmatpush3.bf16.msra.mxu1 %v10965_v1  ;;  %v186_v9 = vpack.c.bf16 %v172_v6, %v171_v4  ;;  %v175_v11 = vld [vmem:[%s12067_s5 + $0x30] sm:$0xff]  ;;  %s13089_s28 = sld [smem:[#allocation23_spill]]  ;;  %s13090_s2 = sld [smem:[#allocation25_spill]] }
  0x6a   :  { %v187_v10 = vpack.c.bf16 %v174_v8, %v173_v7  ;;  %v176_v12 = vld [vmem:[%s12067_s5 + $0x38] sm:$0xff]  ;;  %v177_v13 = vld [vmem:[%s12067_s5 + $0x40] sm:$0xff]  ;;  %v178_v14 = vld [vmem:[%s12067_s5 + $0x48] sm:$0xff]  ;;  %s12056_s7 = smov 112  }
  0x6b   :  { %10350 = vmatprep.mubr.msk.bf16.mxu1 %vm209_vm0, %v185_v5  ;;  %v188_v15 = vpack.c.bf16 %v176_v12, %v175_v11  ;;  %v189_v16 = vpack.c.bf16 %v178_v14, %v177_v13  ;;  %v179_v17 = vld [vmem:[%s12067_s5 + $0x50] sm:$0xff]  ;;  %v180_v18 = vld [vmem:[%s12067_s5 + $0x58] sm:$0xff]  ;;  %v181_v19 = vld [vmem:[%s12067_s5 + $0x60] sm:$0xff] }
  0x6c   :  { %10351 = vmatmul.mubr.msk.bf16.vlgmr.msra.gmra.mrb[0].mxu1 %vm209_vm0, %v186_v9  ;;  %v182_v20 = vld [vmem:[%s12067_s5 + $0x68] sm:$0xff]  ;;  %v190_v21 = vpack.c.bf16 %v180_v18, %v179_v17  ;;  %v183_v23 = vld [vmem:[%s12067_s5 + $0x70] sm:$0xff]  ;;  %v184_v24 = vld [vmem:[%s12067_s5 + $0x78] sm:$0xff]  ;;  %s13075_s5 = sld [smem:[#allocation15_spill]] }
  0x6d   :  { %10354 = vmatprep.mubr.msk.bf16.mxu1 %vm209_vm0, %v187_v10  ;;  %v191_v22 = vpack.c.bf16 %v182_v20, %v181_v19  ;;  %v192_v25 = vpack.c.bf16 %v184_v24, %v183_v23  ;;  %v10966_v26 = vld [vmem:[%s12092_s25] sm:$0xff]  }
  0x6e   :  { %v12267_v27 = vld [vmem:[%s12087_s21] ss:$0 sm:$0xff]  ;;  %s13078_s21 = sld [smem:[#allocation12_spill]] }
  0x6f   :  { %v12270_v28 = vld [vmem:[%s12082_s17] ss:$0 sm:$0xff]  ;;  %s13077_s17 = sld [smem:[#allocation14_spill]] }
  0x70   :  { %v10992_v63 = vld [vmem:[%s12097_s29 + $0x20] sm:$0xff]  }
  0x71   :  { %10446 = vmatprep.subr.bf16.mxu0 %v10992_v63 }
  0x72   :  { %10447 = vmatpush3.bf16.msra.mxu0 %v10992_v63  ;;  %v10976_v63 = vld [vmem:[%s12092_s25 + $0x50] sm:$0xff]  }
  0x74   :  { %10355 = vmatmul.mubr.msk.bf16.gmra.mrb[4].mxu1 %vm209_vm0, %v188_v15 }
  0x75   :  { %10358 = vmatprep.mubr.msk.bf16.mxu1 %vm209_vm0, %v189_v16 }
  0x7c   :  { %10359 = vmatmul.mubr.msk.bf16.gmra.mrb[8].mxu1 %vm209_vm0, %v190_v21 }
  0x7d   :  { %10362 = vmatprep.mubr.msk.bf16.mxu1 %vm209_vm0, %v191_v22 }
  0x84   :  { %10363 = vmatmul.mubr.msk.bf16.gmra.mrb[12].mxu1 %vm209_vm0, %v192_v25 }
  0x85   :  { %10382 = vmatprep.mubr.bf16.mxu1 %v10966_v26 }
 0x13f   :  { %v10352_v29 = vpop.f32.mrb[0].mxu1 }
 0x140   :  { %v277_v30 = vadd.f32 %v10352_v29, %v12270_v28  ;;  %v268_v31 = vpop.f32.mrb[1].mxu1 }
 0x141   :  { %v269_v32 = vadd.f32 %v12270_v28, %v268_v31  ;;  %v10353_v33 = vpop.f32.mrb[2].mxu1 }
 0x142   :  { %v339_v34 = vmul.f32 %v12267_v27, %v277_v30  ;;  %v280_v35 = vadd.f32 %v10353_v33, %v12270_v28  ;;  %v271_v36 = vpop.f32.mrb[3].mxu1 }
 0x143   :  { %v337_v37 = vmul.f32 %v12267_v27, %v269_v32  ;;  %v272_v38 = vadd.f32 %v12270_v28, %v271_v36 }
 0x144   :  { %v371_v39 = vmul.f32 0.2, %v339_v34  ;;  %v340_v40 = vmul.f32 %v12267_v27, %v280_v35  ;;  %vm355_vm1 = vcmp.ge.f32.partialorder %v339_v34, 0.0 }
 0x145   :  { %vm353_vm2 = vcmp.ge.f32.partialorder %v337_v37, 0.0  ;;  %v369_v41 = vmul.f32 0.2, %v337_v37  ;;  %v338_v42 = vmul.f32 %v12267_v27, %v272_v38 }
 0x146   :  { %vm356_vm3 = vcmp.ge.f32.partialorder %v340_v40, 0.0  ;;  %v372_v43 = vmul.f32 0.2, %v340_v40  ;;  %v387_v48 = vsel %vm355_vm1, %v339_v34, %v371_v39 }
 0x147   :  { %vm354_vm4 = vcmp.ge.f32.partialorder %v338_v42, 0.0  ;;  %v370_v44 = vmul.f32 0.2, %v338_v42  ;;  %v10356_v45 = vpop.f32.mrb[4].mxu1  ;;  %v385_v52 = vsel %vm353_vm2, %v337_v37, %v369_v41  ;;  %vm1027_vm2 = vcmask 523264  }
 0x148   :  { %v293_v46 = vadd.f32 %v10356_v45, %v12270_v28  ;;  %v284_v47 = vpop.f32.mrb[5].mxu1  ;;  %v388_v49 = vsel %vm356_vm3, %v340_v40, %v372_v43  ;;  %vm2542_vm3 = vcmask 261120  }
 0x149   :  { %v285_v50 = vadd.f32 %v12270_v28, %v284_v47  ;;  %v10357_v51 = vpop.f32.mrb[6].mxu1  ;;  %v386_v53 = vsel %vm354_vm4, %v338_v42, %v370_v44  ;;  %v466_v54 = vpack.c.bf16 %v388_v49, %v387_v48 }
 0x14a   :  { %v343_v55 = vmul.f32 %v12267_v27, %v293_v46  ;;  %v296_v56 = vadd.f32 %v10357_v51, %v12270_v28  ;;  %v287_v57 = vpop.f32.mrb[7].mxu1  ;;  %v465_v58 = vpack.c.bf16 %v386_v53, %v385_v52 }
 0x14b   :  { %v341_v59 = vmul.f32 %v12267_v27, %v285_v50  ;;  %v288_v60 = vadd.f32 %v12270_v28, %v287_v57  ;;  %v10970_v57 = vld [vmem:[%s12092_s25 + $0x20] sm:$0xff]  }
 0x14c   :  { %vm359_vm5 = vcmp.ge.f32.partialorder %v343_v55, 0.0  ;;  %v375_v61 = vmul.f32 0.2, %v343_v55  ;;  %v344_v62 = vmul.f32 %v12267_v27, %v296_v56  ;;  %10366 = vmatprep.subr.bf16.mxu1 %v465_v58  ;;  %v10969_v56 = vld [vmem:[%s12092_s25 + $0x18] sm:$0xff]  }
 0x14d   :  { %vm357_vm6 = vcmp.ge.f32.partialorder %v341_v59, 0.0  ;;  %v373_v0 = vmul.f32 0.2, %v341_v59  ;;  %v342_v1 = vmul.f32 %v12267_v27, %v288_v60  ;;  %10367 = vmatpush3.bf16.msra.mxu1 %v465_v58  ;;  %v10971_v58 = vld [vmem:[%s12092_s25 + $0x28] sm:$0xff]   ;;  %v10973_v60 = vld [vmem:[%s12092_s25 + $0x38] sm:$0xff]  }
 0x14e   :  { %vm360_vm7 = vcmp.ge.f32.partialorder %v344_v62, 0.0  ;;  %v376_v2 = vmul.f32 0.2, %v344_v62  ;;  %10368 = vmatprep.subr.bf16.mxu1 %v466_v54  ;;  %v391_v7 = vsel %vm359_vm5, %v343_v55, %v375_v61  ;;  %v10968_v55 = vld [vmem:[%s12092_s25 + $0x10] sm:$0xff]   ;;  %v10974_v61 = vld [vmem:[%s12092_s25 + $0x40] sm:$0xff]  }
 0x14f   :  { %vm358_vm8 = vcmp.ge.f32.partialorder %v342_v1, 0.0  ;;  %v374_v3 = vmul.f32 0.2, %v342_v1  ;;  %v10360_v4 = vpop.f32.mrb[8].mxu1  ;;  %v389_v11 = vsel %vm357_vm6, %v341_v59, %v373_v0  ;;  %v10972_v59 = vld [vmem:[%s12092_s25 + $0x30] sm:$0xff]   ;;  %v10977_v0 = vld [vmem:[%s12092_s25 + $0x58] sm:$0xff]  }
 0x150   :  { %v309_v5 = vadd.f32 %v10360_v4, %v12270_v28  ;;  %v300_v6 = vpop.f32.mrb[9].mxu1  ;;  %v392_v8 = vsel %vm360_vm7, %v344_v62, %v376_v2  ;;  %v10975_v62 = vld [vmem:[%s12092_s25 + $0x48] sm:$0xff]   ;;  %v10981_v4 = vld [vmem:[%s12092_s25 + $0x78] sm:$0xff]  }
 0x151   :  { %v301_v9 = vadd.f32 %v12270_v28, %v300_v6  ;;  %v10361_v10 = vpop.f32.mrb[10].mxu1  ;;  %10369 = vmatpush3.bf16.msra.mxu1 %v466_v54  ;;  %v390_v12 = vsel %vm358_vm8, %v342_v1, %v374_v3  ;;  %v468_v13 = vpack.c.bf16 %v392_v8, %v391_v7  ;;  %v10978_v1 = vld [vmem:[%s12092_s25 + $0x60] sm:$0xff]   ;;  %v10979_v2 = vld [vmem:[%s12092_s25 + $0x68] sm:$0xff]   ;;  %v10980_v3 = vld [vmem:[%s12092_s25 + $0x70] sm:$0xff]  }
 0x152   :  { %v347_v14 = vmul.f32 %v12267_v27, %v309_v5  ;;  %v312_v15 = vadd.f32 %v10361_v10, %v12270_v28  ;;  %v303_v16 = vpop.f32.mrb[11].mxu1  ;;  %v467_v17 = vpack.c.bf16 %v390_v12, %v389_v11  ;;  %v10982_v5 = vld [vmem:[%s12092_s25 + $0x80] sm:$0xff]   ;;  %v10983_v6 = vld [vmem:[%s12092_s25 + $0x88] sm:$0xff]   ;;  %v10984_v7 = vld [vmem:[%s12092_s25 + $0x90] sm:$0xff]  }
 0x153   :  { %v345_v18 = vmul.f32 %v12267_v27, %v301_v9  ;;  %v304_v19 = vadd.f32 %v12270_v28, %v303_v16  ;;  %v10985_v8 = vld [vmem:[%s12092_s25 + $0x98] sm:$0xff]   ;;  %v10986_v9 = vld [vmem:[%s12092_s25 + $0xa0] sm:$0xff]   ;;  %v10987_v10 = vld [vmem:[%s12092_s25 + $0xa8] sm:$0xff]  }
 0x154   :  { %vm363_vm9 = vcmp.ge.f32.partialorder %v347_v14, 0.0  ;;  %v379_v20 = vmul.f32 0.2, %v347_v14  ;;  %v348_v21 = vmul.f32 %v12267_v27, %v312_v15  ;;  %10370 = vmatprep.subr.bf16.mxu1 %v467_v17  ;;  %v10988_v11 = vld [vmem:[%s12092_s25 + $0xb0] sm:$0xff]   ;;  %v10995_v12 = vld [vmem:[%s12097_s29 + $0x28] sm:$0xff]   ;;  %v10997_v16 = vld [vmem:[%s12097_s29 + $0x38] sm:$0xff]  }
 0x155   :  { %vm361_vm10 = vcmp.ge.f32.partialorder %v345_v18, 0.0  ;;  %v377_v22 = vmul.f32 0.2, %v345_v18  ;;  %v346_v23 = vmul.f32 %v12267_v27, %v304_v19  ;;  %10371 = vmatpush3.bf16.msra.mxu1 %v467_v17  ;;  %10448 = vmatprep.subr.bf16.mxu0 %v10995_v12  ;;  %v10996_v15 = vld [vmem:[%s12097_s29 + $0x30] sm:$0xff]   ;;  %v10991_v17 = vld [vmem:[%s12092_s25 + $0xc8] sm:$0xff]   ;;  %v10998_v19 = vld [vmem:[%s12097_s29] sm:$0xff]  }
 0x156   :  { %vm364_vm11 = vcmp.ge.f32.partialorder %v348_v21, 0.0  ;;  %v380_v24 = vmul.f32 0.2, %v348_v21  ;;  %10372 = vmatprep.subr.bf16.mxu1 %v468_v13  ;;  %v395_v31 = vsel %vm363_vm9, %v347_v14, %v379_v20  ;;  %v10990_v14 = vld [vmem:[%s12092_s25 + $0xc0] sm:$0xff]   ;;  %10449 = vmatpush3.bf16.msra.mxu0 %v10995_v12  ;;  %v10994_v20 = vld [vmem:[%s12092_s25 + $0xd8] sm:$0xff]  }
 0x157   :  { %vm362_vm12 = vcmp.ge.f32.partialorder %v346_v23, 0.0  ;;  %v378_v25 = vmul.f32 0.2, %v346_v23  ;;  %v10364_v26 = vpop.f32.mrb[12].mxu1  ;;  %v393_v35 = vsel %vm361_vm10, %v345_v18, %v377_v22  ;;  %10450 = vmatprep.subr.bf16.mxu0 %v10996_v15  ;;  %v10993_v18 = vld [vmem:[%s12092_s25 + $0xd0] sm:$0xff]   ;;  %v11000_v22 = vld [vmem:[%s12092_s25 + $0xe8] sm:$0xff]  }
 0x158   :  { %v325_v29 = vadd.f32 %v10364_v26, %v12270_v28  ;;  %v316_v30 = vpop.f32.mrb[13].mxu1  ;;  %v396_v32 = vsel %vm364_vm11, %v348_v21, %v380_v24  ;;  %v10999_v21 = vld [vmem:[%s12092_s25 + $0xe0] sm:$0xff]   ;;  %v11006_v24 = vld [vmem:[%s12092_s25 + $0xf8] sm:$0xff]   ;;  %vm4972_vm10 = vcmask 1043456   ;;  %vm4968_vm11 = vcmask 64512  }
 0x159   :  { %v317_v33 = vadd.f32 %v12270_v28, %v316_v30  ;;  %v10365_v34 = vpop.f32.mrb[14].mxu1  ;;  %10373 = vmatpush3.bf16.msra.mxu1 %v468_v13  ;;  %v394_v36 = vsel %vm362_vm12, %v346_v23, %v378_v25  ;;  %v470_v37 = vpack.c.bf16 %v396_v32, %v395_v31  ;;  %v10989_v13 = vld [vmem:[%s12092_s25 + $0xb8] sm:$0xff]   ;;  %v11005_v23 = vld [vmem:[%s12092_s25 + $0xf0] sm:$0xff]  }
 0x15a   :  { %v351_v38 = vmul.f32 %v12267_v27, %v325_v29  ;;  %v328_v39 = vadd.f32 %v10365_v34, %v12270_v28  ;;  %v319_v40 = vpop.f32.mrb[15].mxu1  ;;  %v469_v41 = vpack.c.bf16 %v394_v36, %v393_v35  ;;  %10451 = vmatpush3.bf16.msra.mxu0 %v10996_v15  ;;  %v11014_v15 = vld [vmem:[%s12097_s29 + $0x80] sm:$0xff]  }
 0x15b   :  { %v349_v42 = vmul.f32 %v12267_v27, %v317_v33  ;;  %v320_v43 = vadd.f32 %v12270_v28, %v319_v40  ;;  %10452 = vmatprep.subr.bf16.mxu0 %v10997_v16 }
 0x15c   :  { %vm367_vm13 = vcmp.ge.f32.partialorder %v351_v38, 0.0  ;;  %v383_v44 = vmul.f32 0.2, %v351_v38  ;;  %v352_v45 = vmul.f32 %v12267_v27, %v328_v39  ;;  %10374 = vmatprep.subr.bf16.mxu1 %v469_v41  ;;  %v11001_v39 = vld [vmem:[%s12097_s29 + $0x8] sm:$0xff]  }
 0x15d   :  { %vm365_vm14 = vcmp.ge.f32.partialorder %v349_v42, 0.0  ;;  %v381_v46 = vmul.f32 0.2, %v349_v42  ;;  %v350_v47 = vmul.f32 %v12267_v27, %v320_v43  ;;  %10375 = vmatpush3.bf16.msra.mxu1 %v469_v41  ;;  %v10967_v27 = vld [vmem:[%s12092_s25 + $0x8] sm:$0xff]   ;;  %v11002_v41 = vld [vmem:[%s12097_s29 + $0x10] sm:$0xff]   ;;  %s13079_s25 = sld [smem:[#allocation26_spill]] }
 0x15e   :  { %vm368_vm15 = vcmp.ge.f32.partialorder %v352_v45, 0.0  ;;  %v384_v48 = vmul.f32 0.2, %v352_v45  ;;  %10376 = vmatprep.subr.bf16.mxu1 %v470_v37  ;;  %v399_v50 = vsel %vm367_vm13, %v351_v38, %v383_v44  ;;  %10453 = vmatpush3.bf16.msra.mxu0 %v10997_v16 }
 0x15f   :  { %vm366_vm1 = vcmp.ge.f32.partialorder %v350_v47, 0.0  ;;  %v382_v49 = vmul.f32 0.2, %v350_v47  ;;  %v397_v51 = vsel %vm365_vm14, %v349_v42, %v381_v46  ;;  %10458 = vmatprep.subr.bf16.mxu0 %v10998_v19 }
 0x160   :  { %v400_v28 = vsel %vm368_vm15, %v352_v45, %v384_v48 }
 0x161   :  { %10377 = vmatpush3.bf16.msra.mxu1 %v470_v37  ;;  %v398_v52 = vsel %vm366_vm1, %v350_v47, %v382_v49  ;;  %v472_v53 = vpack.c.bf16 %v400_v28, %v399_v50  ;;  %v11003_v47 = vld [vmem:[%s12097_s29 + $0x18] sm:$0xff]   ;;  %v11004_v49 = vld [vmem:[%s12097_s29 + $0x40] sm:$0xff]  }
 0x162   :  { %v471_v54 = vpack.c.bf16 %v398_v52, %v397_v51 }
 0x164   :  { %10378 = vmatprep.subr.bf16.mxu1 %v471_v54 }
 0x165   :  { %10379 = vmatpush3.bf16.msra.mxu1 %v471_v54  ;;  %v11007_v54 = vld [vmem:[%s12097_s29 + $0x48] sm:$0xff]  }
 0x166   :  { %10380 = vmatprep.subr.bf16.mxu1 %v472_v53 }
 0x169   :  { %10381 = vmatpush3.bf16.msra.mxu1 %v472_v53 }
 0x16c   :  { %10383 = vmatmul.mubr.bf16.vlgmr.msra.gmra.mrb[16].mxu1 %v10967_v27 }
 0x16d   :  { %10386 = vmatprep.mubr.bf16.mxu1 %v10968_v55  ;;  %v11008_v55 = vld [vmem:[%s12097_s29 + $0x50] sm:$0xff]  }
 0x174   :  { %10387 = vmatmul.mubr.bf16.gmra.mrb[20].mxu1 %v10969_v56 }
 0x175   :  { %10390 = vmatprep.mubr.bf16.mxu1 %v10970_v57 }
 0x17c   :  { %10391 = vmatmul.mubr.bf16.gmra.mrb[24].mxu1 %v10971_v58 }
 0x17d   :  { %10394 = vmatprep.mubr.bf16.mxu1 %v10972_v59 }
 0x184   :  { %10395 = vmatmul.mubr.bf16.gmra.mrb[28].mxu1 %v10973_v60 }
 0x185   :  { %10398 = vmatprep.mubr.bf16.mxu1 %v10974_v61  ;;  %v11009_v61 = vld [vmem:[%s12097_s29 + $0x58] sm:$0xff]  }
 0x18c   :  { %10399 = vmatmul.mubr.bf16.gmra.mrb[32].mxu1 %v10975_v62 }
 0x18d   :  { %10402 = vmatprep.mubr.bf16.mxu1 %v10976_v63  ;;  %v11010_v63 = vld [vmem:[%s12097_s29 + $0x60] sm:$0xff]  }
 0x194   :  { %10403 = vmatmul.mubr.bf16.gmra.mrb[36].mxu1 %v10977_v0 }
 0x195   :  { %10406 = vmatprep.mubr.bf16.mxu1 %v10978_v1 }
 0x19c   :  { %10407 = vmatmul.mubr.bf16.gmra.mrb[40].mxu1 %v10979_v2 }
 0x19d   :  { %10410 = vmatprep.mubr.bf16.mxu1 %v10980_v3 }
 0x1a4   :  { %10411 = vmatmul.mubr.bf16.gmra.mrb[44].mxu1 %v10981_v4 }
 0x1a5   :  { %10414 = vmatprep.mubr.bf16.mxu1 %v10982_v5  ;;  %v11011_v5 = vld [vmem:[%s12097_s29 + $0x68] sm:$0xff]  }
 0x1ac   :  { %10415 = vmatmul.mubr.bf16.gmra.mrb[48].mxu1 %v10983_v6 }
 0x1ad   :  { %10418 = vmatprep.mubr.bf16.mxu1 %v10984_v7  ;;  %v11012_v7 = vld [vmem:[%s12097_s29 + $0x70] sm:$0xff]  }
 0x1b4   :  { %10419 = vmatmul.mubr.bf16.gmra.mrb[52].mxu1 %v10985_v8 }
 0x1b5   :  { %10422 = vmatprep.mubr.bf16.mxu1 %v10986_v9 }
 0x1bc   :  { %10423 = vmatmul.mubr.bf16.gmra.mrb[56].mxu1 %v10987_v10 }
 0x1bd   :  { %10426 = vmatprep.mubr.bf16.mxu1 %v10988_v11 }
 0x1c4   :  { %10427 = vmatmul.mubr.bf16.gmra.mrb[60].mxu1 %v10989_v13  ;;  %v11013_v13 = vld [vmem:[%s12097_s29 + $0x78] sm:$0xff]  }
 0x1c5   :  { %10430 = vmatprep.mubr.bf16.mxu1 %v10990_v14 }
 0x1cc   :  { %10431 = vmatmul.mubr.bf16.gmra.mrb[64].mxu1 %v10991_v17 }
 0x1cd   :  { %10434 = vmatprep.mubr.bf16.mxu1 %v10993_v18 }
 0x1d4   :  { %10435 = vmatmul.mubr.bf16.gmra.mrb[68].mxu1 %v10994_v20 }
 0x1d5   :  { %10438 = vmatprep.mubr.bf16.mxu1 %v10999_v21  ;;  %v11015_v21 = vld [vmem:[%s12097_s29 + $0x88] sm:$0xff]  }
 0x1dc   :  { %10439 = vmatmul.mubr.bf16.gmra.mrb[72].mxu1 %v11000_v22 }
 0x1dd   :  { %10442 = vmatprep.mubr.bf16.mxu1 %v11005_v23  ;;  %v11016_v23 = vld [vmem:[%s12097_s29 + $0x90] sm:$0xff]  }
 0x1e4   :  { %10443 = vmatmul.mubr.bf16.gmra.mrb[76].mxu1 %v11006_v24 }
 0x23f   :  { %v10384_v25 = vpop.f32.mrb[16].mxu1 }
 0x240   :  { %v699_v26 = vpop.f32.mrb[17].mxu1 }
 0x241   :  { %v10385_v29 = vpop.f32.mrb[18].mxu1 }
 0x242   :  { %v955_v30 = vpack.c.bf16 %v10385_v29, %v10384_v25  ;;  %v702_v31 = vpop.f32.mrb[19].mxu1 }
 0x243   :  { %v954_v32 = vpack.c.bf16 %v702_v31, %v699_v26  ;;  %v11017_v31 = vld [vmem:[%s12097_s29 + $0x98] sm:$0xff]  }
 0x247   :  { %v10388_v33 = vpop.f32.mrb[20].mxu1 }
 0x248   :  { %v715_v34 = vpop.f32.mrb[21].mxu1 }
 0x249   :  { %v10389_v35 = vpop.f32.mrb[22].mxu1 }
 0x24a   :  { %v957_v36 = vpack.c.bf16 %v10389_v35, %v10388_v33  ;;  %v718_v37 = vpop.f32.mrb[23].mxu1  ;;  %v11018_v33 = vld [vmem:[%s12097_s29 + $0xa0] sm:$0xff]  }
 0x24b   :  { %v956_v38 = vpack.c.bf16 %v718_v37, %v715_v34 }
 0x24d   :  { %10454 = vmatprep.mubr.msk.bf16.mxu0 %vm1027_vm2, %v956_v38 }
 0x24e   :  { %10455 = vmatmul.mubr.msk.bf16.vlgmr.msra.gmra.mrb[0].mxu0 %vm1027_vm2, %v957_v36 }
 0x24f   :  { %10459 = vmatpush3.bf16.msra.mxu0 %v10998_v19  ;;  %10466 = vmatprep.mubr.msk.bf16.mxu0 %vm1027_vm2, %v954_v32  ;;  %v10392_v40 = vpop.f32.mrb[24].mxu1 }
 0x250   :  { %10460 = vmatprep.subr.bf16.mxu0 %v11001_v39  ;;  %v731_v42 = vpop.f32.mrb[25].mxu1 }
 0x251   :  { %v10393_v43 = vpop.f32.mrb[26].mxu1 }
 0x252   :  { %v959_v44 = vpack.c.bf16 %v10393_v43, %v10392_v40  ;;  %v734_v45 = vpop.f32.mrb[27].mxu1 }
 0x253   :  { %10461 = vmatpush3.bf16.msra.mxu0 %v11001_v39  ;;  %v958_v46 = vpack.c.bf16 %v734_v45, %v731_v42  ;;  %v11019_v39 = vld [vmem:[%s12097_s29 + $0xa8] sm:$0xff]  }
 0x254   :  { %10462 = vmatprep.subr.bf16.mxu0 %v11002_v41 }
 0x257   :  { %10463 = vmatpush3.bf16.msra.mxu0 %v11002_v41  ;;  %v12350_v48 = vpop.f32.mrb[28].mxu1  ;;  %v11020_v41 = vld [vmem:[%s12097_s29 + $0xb0] sm:$0xff]  }
 0x258   :  { %10464 = vmatprep.subr.bf16.mxu0 %v11003_v47  ;;  %v747_v50 = vpop.f32.mrb[29].mxu1 }
 0x259   :  { %v10397_v28 = vpop.f32.mrb[30].mxu1 }
 0x25a   :  { %v961_v51 = vpack.c.bf16 %v10397_v28, %v12350_v48  ;;  %v750_v52 = vpop.f32.mrb[31].mxu1 }
 0x25b   :  { %10465 = vmatpush3.bf16.msra.mxu0 %v11003_v47  ;;  %v960_v53 = vpack.c.bf16 %v750_v52, %v747_v50  ;;  %v11021_v47 = vld [vmem:[%s12097_s29 + $0xb8] sm:$0xff]  }
 0x25c   :  { %10470 = vmatprep.subr.bf16.mxu0 %v11004_v49 }
 0x25e   :  { %10467 = vmatmul.mubr.msk.bf16.vlgmr.msra.gmra.mrb[0].mxu0 %vm1027_vm2, %v955_v30 }
 0x25f   :  { %10471 = vmatpush3.bf16.msra.mxu0 %v11004_v49  ;;  %10478 = vmatprep.mubr.msk.bf16.mxu0 %vm1027_vm2, %v958_v46  ;;  %v12357_v27 = vpop.f32.mrb[32].mxu1  ;;  %v11022_v49 = vld [vmem:[%s12097_s29 + $0xc0] sm:$0xff]  }
 0x260   :  { %10472 = vmatprep.subr.bf16.mxu0 %v11007_v54  ;;  %v763_v56 = vpop.f32.mrb[33].mxu1 }
 0x261   :  { %v12360_v57 = vpop.f32.mrb[34].mxu1 }
 0x262   :  { %v963_v58 = vpack.c.bf16 %v12360_v57, %v12357_v27  ;;  %v766_v59 = vpop.f32.mrb[35].mxu1 }
 0x263   :  { %10473 = vmatpush3.bf16.msra.mxu0 %v11007_v54  ;;  %v962_v60 = vpack.c.bf16 %v766_v59, %v763_v56  ;;  %v11023_v54 = vld [vmem:[%s12097_s29 + $0xc8] sm:$0xff]  }
 0x264   :  { %10474 = vmatprep.subr.bf16.mxu0 %v11008_v55 }
 0x267   :  { %10475 = vmatpush3.bf16.msra.mxu0 %v11008_v55  ;;  %v12365_v62 = vpop.f32.mrb[36].mxu1  ;;  %v11024_v55 = vld [vmem:[%s12097_s29 + $0xd0] sm:$0xff]  }
 0x268   :  { %10476 = vmatprep.subr.bf16.mxu0 %v11009_v61  ;;  %v12368_v0 = vpop.f32.mrb[37].mxu1 }
 0x269   :  { %v12370_v1 = vpop.f32.mrb[38].mxu1 }
 0x26a   :  { %v965_v2 = vpack.c.bf16 %v12370_v1, %v12365_v62  ;;  %v782_v3 = vpop.f32.mrb[39].mxu1 }
 0x26b   :  { %10477 = vmatpush3.bf16.msra.mxu0 %v11009_v61  ;;  %v964_v4 = vpack.c.bf16 %v782_v3, %v12368_v0  ;;  %v11025_v61 = vld [vmem:[%s12097_s29 + $0xd8] sm:$0xff]  }
 0x26c   :  { %10482 = vmatprep.subr.bf16.mxu0 %v11010_v63 }
 0x26e   :  { %10479 = vmatmul.mubr.msk.bf16.vlgmr.msra.gmra.mrb[0].mxu0 %vm1027_vm2, %v959_v44 }
 0x26f   :  { %10483 = vmatpush3.bf16.msra.mxu0 %v11010_v63  ;;  %10490 = vmatprep.mubr.msk.bf16.mxu0 %vm1027_vm2, %v960_v53  ;;  %v12378_v6 = vpop.f32.mrb[40].mxu1  ;;  %v11026_v63 = vld [vmem:[%s12097_s29 + $0xe0] sm:$0xff]  }
 0x270   :  { %10484 = vmatprep.subr.bf16.mxu0 %v11011_v5  ;;  %v12381_v8 = vpop.f32.mrb[41].mxu1 }
 0x271   :  { %v12383_v9 = vpop.f32.mrb[42].mxu1 }
 0x272   :  { %v967_v10 = vpack.c.bf16 %v12383_v9, %v12378_v6  ;;  %v12387_v11 = vpop.f32.mrb[43].mxu1 }
 0x273   :  { %10485 = vmatpush3.bf16.msra.mxu0 %v11011_v5  ;;  %v966_v12 = vpack.c.bf16 %v12387_v11, %v12381_v8  ;;  %v11027_v5 = vld [vmem:[%s12097_s29 + $0xe8] sm:$0xff]   ;;  %v11028_v8 = vld [vmem:[%s12097_s29 + $0xf0] sm:$0xff]  }
 0x274   :  { %10486 = vmatprep.subr.bf16.mxu0 %v11012_v7 }
 0x277   :  { %10487 = vmatpush3.bf16.msra.mxu0 %v11012_v7  ;;  %v12392_v14 = vpop.f32.mrb[44].mxu1 }
 0x278   :  { %10488 = vmatprep.subr.bf16.mxu0 %v11013_v13  ;;  %v12395_v16 = vpop.f32.mrb[45].mxu1 }
 0x279   :  { %v12397_v17 = vpop.f32.mrb[46].mxu1 }
 0x27a   :  { %v969_v18 = vpack.c.bf16 %v12397_v17, %v12392_v14  ;;  %v12401_v19 = vpop.f32.mrb[47].mxu1  ;;  %v11035_v14 = vld [vmem:[%s12097_s29 + $0x128] sm:$0xff]   ;;  %v11036_v17 = vld [vmem:[%s12097_s29 + $0x130] sm:$0xff]  }
 0x27b   :  { %10489 = vmatpush3.bf16.msra.mxu0 %v11013_v13  ;;  %v968_v20 = vpack.c.bf16 %v12401_v19, %v12395_v16  ;;  %v11029_v13 = vld [vmem:[%s12097_s29 + $0xf8] sm:$0xff]   ;;  %v11030_v16 = vld [vmem:[%s12097_s29 + $0x100] sm:$0xff]  }
 0x27c   :  { %10494 = vmatprep.subr.bf16.mxu0 %v11014_v15 }
 0x27e   :  { %10491 = vmatmul.mubr.msk.bf16.vlgmr.msra.gmra.mrb[0].mxu0 %vm1027_vm2, %v961_v51 }
 0x27f   :  { %10495 = vmatpush3.bf16.msra.mxu0 %v11014_v15  ;;  %10502 = vmatprep.mubr.msk.bf16.mxu0 %vm1027_vm2, %v962_v60  ;;  %v12408_v22 = vpop.f32.mrb[48].mxu1 }
 0x280   :  { %10496 = vmatprep.subr.bf16.mxu0 %v11015_v21  ;;  %v12411_v24 = vpop.f32.mrb[49].mxu1 }
 0x281   :  { %v12413_v25 = vpop.f32.mrb[50].mxu1 }
 0x282   :  { %v971_v26 = vpack.c.bf16 %v12413_v25, %v12408_v22  ;;  %v12417_v29 = vpop.f32.mrb[51].mxu1  ;;  %v11039_v22 = vld [vmem:[%s12097_s29 + $0x148] sm:$0xff]   ;;  %v11040_v25 = vld [vmem:[%s12097_s29 + $0x150] sm:$0xff]  }
 0x283   :  { %10497 = vmatpush3.bf16.msra.mxu0 %v11015_v21  ;;  %v970_v30 = vpack.c.bf16 %v12417_v29, %v12411_v24  ;;  %v11038_v24 = vld [vmem:[%s12097_s29 + $0x140] sm:$0xff]  }
 0x284   :  { %10498 = vmatprep.subr.bf16.mxu0 %v11016_v23  ;;  %v11042_v29 = vld [vmem:[%s12097_s29 + $0x160] sm:$0xff]  }
 0x287   :  { %10499 = vmatpush3.bf16.msra.mxu0 %v11016_v23  ;;  %v12422_v32 = vpop.f32.mrb[52].mxu1 }
 0x288   :  { %10500 = vmatprep.subr.bf16.mxu0 %v11017_v31  ;;  %v12425_v34 = vpop.f32.mrb[53].mxu1 }
 0x289   :  { %v12427_v35 = vpop.f32.mrb[54].mxu1 }
 0x28a   :  { %v973_v36 = vpack.c.bf16 %v12427_v35, %v12422_v32  ;;  %v12431_v37 = vpop.f32.mrb[55].mxu1  ;;  %v11044_v32 = vld [vmem:[%s12097_s29 + $0x170] sm:$0xff]   ;;  %v11046_v35 = vld [vmem:[%s12097_s29 + $0x180] sm:$0xff]  }
 0x28b   :  { %10501 = vmatpush3.bf16.msra.mxu0 %v11017_v31  ;;  %v972_v38 = vpack.c.bf16 %v12431_v37, %v12425_v34  ;;  %v11045_v34 = vld [vmem:[%s12097_s29 + $0x178] sm:$0xff]   ;;  %v11048_v37 = vld [vmem:[%s12097_s29 + $0x190] sm:$0xff]  }
 0x28c   :  { %10506 = vmatprep.subr.bf16.mxu0 %v11018_v33 }
 0x28e   :  { %10503 = vmatmul.mubr.msk.bf16.vlgmr.msra.gmra.mrb[0].mxu0 %vm1027_vm2, %v963_v58 }
 0x28f   :  { %10507 = vmatpush3.bf16.msra.mxu0 %v11018_v33  ;;  %10514 = vmatprep.mubr.msk.bf16.mxu0 %vm1027_vm2, %v964_v4  ;;  %v12441_v40 = vpop.f32.mrb[56].mxu1  ;;  %v11031_v33 = vld [vmem:[%s12097_s29 + $0x108] sm:$0xff]  }
 0x290   :  { %10508 = vmatprep.subr.bf16.mxu0 %v11019_v39  ;;  %v12444_v42 = vpop.f32.mrb[57].mxu1 }
 0x291   :  { %v12446_v43 = vpop.f32.mrb[58].mxu1 }
 0x292   :  { %v975_v44 = vpack.c.bf16 %v12446_v43, %v12441_v40  ;;  %v12450_v45 = vpop.f32.mrb[59].mxu1  ;;  %v11050_v40 = vld [vmem:[%s12097_s29 + $0x1a0] sm:$0xff]   ;;  %v11052_v43 = vld [vmem:[%s12097_s29 + $0x1b0] sm:$0xff]  }
 0x293   :  { %10509 = vmatpush3.bf16.msra.mxu0 %v11019_v39  ;;  %v974_v46 = vpack.c.bf16 %v12450_v45, %v12444_v42  ;;  %v11032_v39 = vld [vmem:[%s12097_s29 + $0x110] sm:$0xff]   ;;  %v11051_v42 = vld [vmem:[%s12097_s29 + $0x1a8] sm:$0xff]   ;;  %v11054_v45 = vld [vmem:[%s12097_s29 + $0x1c0] sm:$0xff]  }
 0x294   :  { %10510 = vmatprep.subr.bf16.mxu0 %v11020_v41 }
 0x297   :  { %10511 = vmatpush3.bf16.msra.mxu0 %v11020_v41  ;;  %v12455_v48 = vpop.f32.mrb[60].mxu1  ;;  %v11033_v41 = vld [vmem:[%s12097_s29 + $0x118] sm:$0xff]  }
 0x298   :  { %10512 = vmatprep.subr.bf16.mxu0 %v11021_v47  ;;  %v12458_v50 = vpop.f32.mrb[61].mxu1 }
 0x299   :  { %v12460_v28 = vpop.f32.mrb[62].mxu1 }
 0x29a   :  { %v977_v51 = vpack.c.bf16 %v12460_v28, %v12455_v48  ;;  %v12464_v52 = vpop.f32.mrb[63].mxu1  ;;  %v11056_v48 = vld [vmem:[%s12097_s29 + $0x1d0] sm:$0xff]   ;;  %v11059_v28 = vld [vmem:[%s12097_s29 + $0x1e8] sm:$0xff]  }
 0x29b   :  { %10513 = vmatpush3.bf16.msra.mxu0 %v11021_v47  ;;  %v976_v53 = vpack.c.bf16 %v12464_v52, %v12458_v50  ;;  %v11034_v47 = vld [vmem:[%s12097_s29 + $0x120] sm:$0xff]   ;;  %v11061_v52 = vld [vmem:[%s12097_s29 + $0x1f8] sm:$0xff]  }
 0x29c   :  { %10518 = vmatprep.subr.bf16.mxu0 %v11022_v49  ;;  %v11058_v50 = vld [vmem:[%s12097_s29 + $0x1e0] sm:$0xff]  }
 0x29e   :  { %10515 = vmatmul.mubr.msk.bf16.vlgmr.msra.gmra.mrb[0].mxu0 %vm1027_vm2, %v965_v2 }
 0x29f   :  { %10519 = vmatpush3.bf16.msra.mxu0 %v11022_v49  ;;  %10526 = vmatprep.mubr.msk.bf16.mxu0 %vm1027_vm2, %v966_v12  ;;  %v12477_v27 = vpop.f32.mrb[64].mxu1  ;;  %v11057_v49 = vld [vmem:[%s12097_s29 + $0x1d8] sm:$0xff]  }
 0x2a0   :  { %10520 = vmatprep.subr.bf16.mxu0 %v11023_v54  ;;  %v12480_v56 = vpop.f32.mrb[65].mxu1 }
 0x2a1   :  { %v12482_v57 = vpop.f32.mrb[66].mxu1 }
 0x2a2   :  { %v979_v58 = vpack.c.bf16 %v12482_v57, %v12477_v27  ;;  %v12486_v59 = vpop.f32.mrb[67].mxu1  ;;  %v11068_v27 = vld [vmem:[#allocation3 + $0x84] ss:$8 sps:$4 sm:$0xff]  }
 0x2a3   :  { %10521 = vmatpush3.bf16.msra.mxu0 %v11023_v54  ;;  %v978_v60 = vpack.c.bf16 %v12486_v59, %v12480_v56  ;;  %v11066_v54 = vld [vmem:[#allocation3 + $0x80] ss:$8 sps:$4 sm:$0xff]   ;;  %2788 = vmatprep.subr.bf16.mxu1 %v11068_v27  ;;  %v11069_v56 = vld [vmem:[#allocation3 + $0x90] ss:$8 sps:$4 sm:$0xff]   ;;  %v11074_v57 = vld [vmem:[#allocation3 + $0xa4] ss:$8 sps:$4 sm:$0xff]  }
 0x2a4   :  { %10522 = vmatprep.subr.bf16.mxu0 %v11024_v55  ;;  %2789 = vmatpush1.bf16.msra.mxu1 %v11066_v54  ;;  %v11077_v59 = vld [vmem:[#allocation3 + $0xb4] ss:$8 sps:$4 sm:$0xff]   ;;  %v11181_v54 = vld [vmem:[#allocation3 + $0x270] ss:$8 sps:$4 sm:$0xff]   ;;  %v11189_v27 = vld [vmem:[#allocation3 + $0x304] ss:$8 sps:$4 sm:$0xff]  }
 0x2a7   :  { %10523 = vmatpush3.bf16.msra.mxu0 %v11024_v55  ;;  %v12491_v62 = vpop.f32.mrb[68].mxu1  ;;  %v11071_v55 = vld [vmem:[#allocation3 + $0x94] ss:$8 sps:$4 sm:$0xff]  }
 0x2a8   :  { %10524 = vmatprep.subr.bf16.mxu0 %v11025_v61  ;;  %v12494_v0 = vpop.f32.mrb[69].mxu1  ;;  %2790 = vmatprep.subr.bf16.mxu1 %v11071_v55 }
 0x2a9   :  { %v12496_v1 = vpop.f32.mrb[70].mxu1  ;;  %2791 = vmatpush1.bf16.msra.mxu1 %v11069_v56 }
 0x2aa   :  { %v981_v2 = vpack.c.bf16 %v12496_v1, %v12491_v62  ;;  %v12500_v3 = vpop.f32.mrb[71].mxu1  ;;  %2792 = vmatprep.subr.bf16.mxu1 %v11074_v57  ;;  %v11080_v62 = vld [vmem:[#allocation3 + $0xc0] ss:$8 sps:$4 sm:$0xff]   ;;  %v11088_v1 = vld [vmem:[#allocation3 + $0xe4] ss:$8 sps:$4 sm:$0xff]  }
 0x2ab   :  { %10525 = vmatpush3.bf16.msra.mxu0 %v11025_v61  ;;  %v980_v4 = vpack.c.bf16 %v12500_v3, %v12494_v0  ;;  %v11082_v61 = vld [vmem:[#allocation3 + $0xc4] ss:$8 sps:$4 sm:$0xff]   ;;  %v11083_v0 = vld [vmem:[#allocation3 + $0xd0] ss:$8 sps:$4 sm:$0xff]   ;;  %v11091_v3 = vld [vmem:[#allocation3 + $0xf4] ss:$8 sps:$4 sm:$0xff]  }
 0x2ac   :  { %10530 = vmatprep.subr.bf16.mxu0 %v11026_v63 }
 0x2ae   :  { %10527 = vmatmul.mubr.msk.bf16.vlgmr.msra.gmra.mrb[0].mxu0 %vm1027_vm2, %v967_v10 }
 0x2af   :  { %10531 = vmatpush3.bf16.msra.mxu0 %v11026_v63  ;;  %10538 = vmatprep.mubr.msk.bf16.mxu0 %vm1027_vm2, %v968_v20  ;;  %v12513_v7 = vpop.f32.mrb[72].mxu1  ;;  %v11085_v63 = vld [vmem:[#allocation3 + $0xd4] ss:$8 sps:$4 sm:$0xff]  }
 0x2b0   :  { %10532 = vmatprep.subr.bf16.mxu0 %v11027_v5  ;;  %v12516_v11 = vpop.f32.mrb[73].mxu1 }
 0x2b1   :  { %v12518_v12 = vpop.f32.mrb[74].mxu1 }
 0x2b2   :  { %v983_v6 = vpack.c.bf16 %v12518_v12, %v12513_v7  ;;  %v12522_v9 = vpop.f32.mrb[75].mxu1 }
 0x2b3   :  { %10533 = vmatpush3.bf16.msra.mxu0 %v11027_v5  ;;  %v982_v10 = vpack.c.bf16 %v12522_v9, %v12516_v11  ;;  %v9309_v5 = vld [vmem:[%s12102_s3] ss:$0 sm:$0xff]  ;;  %s13081_s3 = sld [smem:[#allocation17_spill]] }
 0x2b4   :  { %10534 = vmatprep.subr.bf16.mxu0 %v11028_v8 }
 0x2b7   :  { %10535 = vmatpush3.bf16.msra.mxu0 %v11028_v8  ;;  %v12527_v15 = vpop.f32.mrb[76].mxu1  ;;  %v9310_v8 = vld [vmem:[%s12107_s8] ss:$0 sm:$0xff]  ;;  %s13082_s8 = sld [smem:[#allocation18_spill]] }
 0x2b8   :  { %10536 = vmatprep.subr.bf16.mxu0 %v11029_v13  ;;  %v12530_v19 = vpop.f32.mrb[77].mxu1 }
 0x2b9   :  { %v12532_v20 = vpop.f32.mrb[78].mxu1 }
 0x2ba   :  { %v985_v21 = vpack.c.bf16 %v12532_v20, %v12527_v15  ;;  %v12536_v23 = vpop.f32.mrb[79].mxu1 }
 0x2bb   :  { %10537 = vmatpush3.bf16.msra.mxu0 %v11029_v13  ;;  %v984_v31 = vpack.c.bf16 %v12536_v23, %v12530_v19 }
 0x2bc   :  { %10542 = vmatprep.subr.bf16.mxu0 %v11030_v16 }
 0x2be   :  { %10539 = vmatmul.mubr.msk.bf16.vlgmr.msra.gmra.mrb[0].mxu0 %vm1027_vm2, %v969_v18  ;;  %v11037_v18 = vld [vmem:[%s12097_s29 + $0x138] sm:$0xff]  }
 0x2bf   :  { %10543 = vmatpush3.bf16.msra.mxu0 %v11030_v16  ;;  %10550 = vmatprep.mubr.msk.bf16.mxu0 %vm1027_vm2, %v970_v30  ;;  %v11043_v30 = vld [vmem:[%s12097_s29 + $0x168] sm:$0xff]  }
 0x2c0   :  { %10544 = vmatprep.subr.bf16.mxu0 %v11031_v33 }
 0x2c3   :  { %10545 = vmatpush3.bf16.msra.mxu0 %v11031_v33 }
 0x2c4   :  { %10546 = vmatprep.subr.bf16.mxu0 %v11032_v39 }
 0x2c7   :  { %10547 = vmatpush3.bf16.msra.mxu0 %v11032_v39 }
 0x2c8   :  { %10548 = vmatprep.subr.bf16.mxu0 %v11033_v41 }
 0x2cb   :  { %10549 = vmatpush3.bf16.msra.mxu0 %v11033_v41 }
 0x2cc   :  { %10554 = vmatprep.subr.bf16.mxu0 %v11034_v47 }
 0x2ce   :  { %10551 = vmatmul.mubr.msk.bf16.vlgmr.msra.gmra.mrb[0].mxu0 %vm1027_vm2, %v971_v26  ;;  %v11041_v26 = vld [vmem:[%s12097_s29 + $0x158] sm:$0xff]  }
 0x2cf   :  { %10555 = vmatpush3.bf16.msra.mxu0 %v11034_v47  ;;  %10562 = vmatprep.mubr.msk.bf16.mxu0 %vm1027_vm2, %v972_v38  ;;  %v11049_v38 = vld [vmem:[%s12097_s29 + $0x198] sm:$0xff]  }
 0x2d0   :  { %10556 = vmatprep.subr.bf16.mxu0 %v11035_v14 }
 0x2d3   :  { %10557 = vmatpush3.bf16.msra.mxu0 %v11035_v14 }
 0x2d4   :  { %10558 = vmatprep.subr.bf16.mxu0 %v11036_v17 }
 0x2d7   :  { %10559 = vmatpush3.bf16.msra.mxu0 %v11036_v17 }
 0x2d8   :  { %10560 = vmatprep.subr.bf16.mxu0 %v11037_v18 }
 0x2db   :  { %10561 = vmatpush3.bf16.msra.mxu0 %v11037_v18 }
 0x2dc   :  { %10566 = vmatprep.subr.bf16.mxu0 %v11038_v24 }
 0x2de   :  { %10563 = vmatmul.mubr.msk.bf16.vlgmr.msra.gmra.mrb[0].mxu0 %vm1027_vm2, %v973_v36  ;;  %v11047_v36 = vld [vmem:[%s12097_s29 + $0x188] sm:$0xff]  }
 0x2df   :  { %10567 = vmatpush3.bf16.msra.mxu0 %v11038_v24  ;;  %10574 = vmatprep.mubr.msk.bf16.mxu0 %vm1027_vm2, %v974_v46  ;;  %v11055_v46 = vld [vmem:[%s12097_s29 + $0x1c8] sm:$0xff]  }
 0x2e0   :  { %10568 = vmatprep.subr.bf16.mxu0 %v11039_v22 }
 0x2e3   :  { %10569 = vmatpush3.bf16.msra.mxu0 %v11039_v22  ;;  %v11063_v22 = vld [vmem:[%s12112_s14 + $0x8] sm:$0xff]  }
 0x2e4   :  { %10570 = vmatprep.subr.bf16.mxu0 %v11040_v25 }
 0x2e7   :  { %10571 = vmatpush3.bf16.msra.mxu0 %v11040_v25  ;;  %v11064_v25 = vld [vmem:[%s12112_s14 + $0x10] sm:$0xff]  }
 0x2e8   :  { %10572 = vmatprep.subr.bf16.mxu0 %v11041_v26 }
 0x2eb   :  { %10573 = vmatpush3.bf16.msra.mxu0 %v11041_v26  ;;  %v11065_v26 = vld [vmem:[%s12112_s14 + $0x18] sm:$0xff]  }
 0x2ec   :  { %10578 = vmatprep.subr.bf16.mxu0 %v11042_v29 }
 0x2ee   :  { %10575 = vmatmul.mubr.msk.bf16.vlgmr.msra.gmra.mrb[0].mxu0 %vm1027_vm2, %v975_v44  ;;  %v11053_v44 = vld [vmem:[%s12097_s29 + $0x1b8] sm:$0xff]  }
 0x2ef   :  { %10579 = vmatpush3.bf16.msra.mxu0 %v11042_v29  ;;  %10586 = vmatprep.mubr.msk.bf16.mxu0 %vm1027_vm2, %v976_v53  ;;  %v11062_v53 = vld [vmem:[%s12112_s14] sm:$0xff]  }
 0x2f0   :  { %10580 = vmatprep.subr.bf16.mxu0 %v11043_v30  ;;  %v11078_v29 = vld [vmem:[%s12112_s14 + $0x20] sm:$0xff]  }
 0x2f3   :  { %10581 = vmatpush3.bf16.msra.mxu0 %v11043_v30  ;;  %v11079_v30 = vld [vmem:[%s12112_s14 + $0x28] sm:$0xff]  }
 0x2f4   :  { %10582 = vmatprep.subr.bf16.mxu0 %v11044_v32 }
 0x2f7   :  { %10583 = vmatpush3.bf16.msra.mxu0 %v11044_v32  ;;  %v11092_v32 = vld [vmem:[%s12112_s14 + $0x30] sm:$0xff]  }
 0x2f8   :  { %10584 = vmatprep.subr.bf16.mxu0 %v11045_v34 }
 0x2fb   :  { %10585 = vmatpush3.bf16.msra.mxu0 %v11045_v34  ;;  %v11095_v34 = vld [vmem:[#allocation3 + $0x4] ss:$8 sps:$4 sm:$0xff]  }
 0x2fc   :  { %10590 = vmatprep.subr.bf16.mxu0 %v11046_v35 }
 0x2fe   :  { %10587 = vmatmul.mubr.msk.bf16.vlgmr.msra.gmra.mrb[0].mxu0 %vm1027_vm2, %v977_v51  ;;  %v11060_v51 = vld [vmem:[%s12097_s29 + $0x1f0] sm:$0xff]   ;;  %s13080_s29 = sld [smem:[#allocation27_spill]] }
 0x2ff   :  { %10591 = vmatpush3.bf16.msra.mxu0 %v11046_v35  ;;  %10598 = vmatprep.mubr.msk.bf16.mxu0 %vm1027_vm2, %v978_v60  ;;  %v11075_v60 = vld [vmem:[#allocation3 + $0xb0] ss:$8 sps:$4 sm:$0xff]  }
 0x300   :  { %10592 = vmatprep.subr.bf16.mxu0 %v11047_v36  ;;  %v11096_v35 = vld [vmem:[%s12112_s14 + $0x38] sm:$0xff]   ;;  %s13083_s14 = sld [smem:[#allocation16_spill]] }
 0x303   :  { %10593 = vmatpush3.bf16.msra.mxu0 %v11047_v36  ;;  %v12053_v36 = vmov 0  }
 0x304   :  { %10594 = vmatprep.subr.bf16.mxu0 %v11048_v37  ;;  %2820 = vmatprep.mubr.bf16.mxu1 %v12053_v36 }
 0x307   :  { %10595 = vmatpush3.bf16.msra.mxu0 %v11048_v37  ;;  %v11141_v37 = vld [vmem:[#allocation3 + $0x204] ss:$8 sps:$4 sm:$0xff]  }
 0x308   :  { %10596 = vmatprep.subr.bf16.mxu0 %v11049_v38 }
 0x30b   :  { %10597 = vmatpush3.bf16.msra.mxu0 %v11049_v38  ;;  %v11139_v38 = vld [vmem:[#allocation3 + $0x200] ss:$8 sps:$4 sm:$0xff]  }
 0x30c   :  { %10602 = vmatprep.subr.bf16.mxu0 %v11050_v40 }
 0x30e   :  { %10599 = vmatmul.mubr.msk.bf16.vlgmr.msra.gmra.mrb[0].mxu0 %vm1027_vm2, %v979_v58  ;;  %v11072_v58 = vld [vmem:[#allocation3 + $0xa0] ss:$8 sps:$4 sm:$0xff]  }
 0x30f   :  { %10603 = vmatpush3.bf16.msra.mxu0 %v11050_v40  ;;  %10610 = vmatprep.mubr.msk.bf16.mxu0 %vm1027_vm2, %v980_v4  ;;  %v11089_v4 = vld [vmem:[#allocation3 + $0xf0] ss:$8 sps:$4 sm:$0xff]   ;;  %v11147_v40 = vld [vmem:[#allocation3 + $0x214] ss:$8 sps:$4 sm:$0xff]  }
 0x310   :  { %10604 = vmatprep.subr.bf16.mxu0 %v11051_v42  ;;  %2793 = vmatpush1.bf16.msra.mxu1 %v11072_v58 }
 0x311   :  { %2794 = vmatprep.subr.bf16.mxu1 %v11077_v59 }
 0x313   :  { %10605 = vmatpush3.bf16.msra.mxu0 %v11051_v42  ;;  %v11145_v42 = vld [vmem:[#allocation3 + $0x210] ss:$8 sps:$4 sm:$0xff]  }
 0x314   :  { %10606 = vmatprep.subr.bf16.mxu0 %v11052_v43  ;;  %2795 = vmatpush1.bf16.msra.mxu1 %v11075_v60 }
 0x315   :  { %2796 = vmatprep.subr.bf16.mxu1 %v11082_v61  ;;  %v11093_v61 = vld [vmem:[#allocation3] ss:$8 sps:$4 sm:$0xff]  }
 0x317   :  { %10607 = vmatpush3.bf16.msra.mxu0 %v11052_v43  ;;  %v11153_v43 = vld [vmem:[#allocation3 + $0x224] ss:$8 sps:$4 sm:$0xff]  }
 0x318   :  { %10608 = vmatprep.subr.bf16.mxu0 %v11053_v44  ;;  %2797 = vmatpush1.bf16.msra.mxu1 %v11080_v62 }
 0x319   :  { %2798 = vmatprep.subr.bf16.mxu1 %v11085_v63  ;;  %v11099_v63 = vld [vmem:[#allocation3 + $0x14] ss:$8 sps:$4 sm:$0xff]  }
 0x31b   :  { %10609 = vmatpush3.bf16.msra.mxu0 %v11053_v44  ;;  %v11151_v44 = vld [vmem:[#allocation3 + $0x220] ss:$8 sps:$4 sm:$0xff]  }
 0x31c   :  { %10614 = vmatprep.subr.bf16.mxu0 %v11054_v45  ;;  %2799 = vmatpush1.bf16.msra.mxu1 %v11083_v0 }
 0x31d   :  { %2800 = vmatprep.subr.bf16.mxu1 %v11088_v1  ;;  %v11097_v1 = vld [vmem:[#allocation3 + $0x10] ss:$8 sps:$4 sm:$0xff]  }
 0x31e   :  { %10611 = vmatmul.mubr.msk.bf16.vlgmr.msra.gmra.mrb[0].mxu0 %vm1027_vm2, %v981_v2  ;;  %v11086_v2 = vld [vmem:[#allocation3 + $0xe0] ss:$8 sps:$4 sm:$0xff]  }
 0x31f   :  { %10615 = vmatpush3.bf16.msra.mxu0 %v11054_v45  ;;  %10622 = vmatprep.mubr.msk.bf16.mxu0 %vm1027_vm2, %v982_v10  ;;  %v11159_v45 = vld [vmem:[#allocation3 + $0x234] ss:$8 sps:$4 sm:$0xff]  }
 0x320   :  { %10616 = vmatprep.subr.bf16.mxu0 %v11055_v46  ;;  %2801 = vmatpush1.bf16.msra.mxu1 %v11086_v2 }
 0x321   :  { %2802 = vmatprep.subr.bf16.mxu1 %v11091_v3  ;;  %v11102_v3 = vld [vmem:[#allocation3 + $0x24] ss:$8 sps:$4 sm:$0xff]  }
 0x323   :  { %10617 = vmatpush3.bf16.msra.mxu0 %v11055_v46  ;;  %v11157_v46 = vld [vmem:[#allocation3 + $0x230] ss:$8 sps:$4 sm:$0xff]  }
 0x324   :  { %10618 = vmatprep.subr.bf16.mxu0 %v11056_v48  ;;  %2803 = vmatpush1.bf16.msra.mxu1 %v11089_v4 }
 0x325   :  { %2909 = vmatprep.subr.bf16.mxu1 %v11095_v34  ;;  %v11225_v34 = vld [vmem:[#allocation3 + $0x364] ss:$8 sps:$4 sm:$0xff]  }
 0x327   :  { %10619 = vmatpush3.bf16.msra.mxu0 %v11056_v48  ;;  %v11165_v48 = vld [vmem:[#allocation3 + $0x244] ss:$8 sps:$4 sm:$0xff]  }
 0x328   :  { %10620 = vmatprep.subr.bf16.mxu0 %v11057_v49 }
 0x32b   :  { %10621 = vmatpush3.bf16.msra.mxu0 %v11057_v49  ;;  %v11163_v49 = vld [vmem:[#allocation3 + $0x240] ss:$8 sps:$4 sm:$0xff]  }
 0x32c   :  { %10626 = vmatprep.subr.bf16.mxu0 %v11058_v50 }
 0x32e   :  { %10623 = vmatmul.mubr.msk.bf16.vlgmr.msra.gmra.mrb[0].mxu0 %vm1027_vm2, %v983_v6 }
 0x32f   :  { %10627 = vmatpush3.bf16.msra.mxu0 %v11058_v50  ;;  %10634 = vmatprep.mubr.msk.bf16.mxu0 %vm1027_vm2, %v984_v31  ;;  %v11171_v50 = vld [vmem:[#allocation3 + $0x254] ss:$8 sps:$4 sm:$0xff]  }
 0x330   :  { %10628 = vmatprep.subr.bf16.mxu0 %v11059_v28 }
 0x333   :  { %10629 = vmatpush3.bf16.msra.mxu0 %v11059_v28  ;;  %v11169_v28 = vld [vmem:[#allocation3 + $0x250] ss:$8 sps:$4 sm:$0xff]  }
 0x334   :  { %10630 = vmatprep.subr.bf16.mxu0 %v11060_v51 }
 0x337   :  { %10631 = vmatpush3.bf16.msra.mxu0 %v11060_v51  ;;  %v11177_v51 = vld [vmem:[#allocation3 + $0x264] ss:$8 sps:$4 sm:$0xff]  }
 0x338   :  { %10632 = vmatprep.subr.bf16.mxu0 %v11061_v52 }
 0x33b   :  { %10633 = vmatpush3.bf16.msra.mxu0 %v11061_v52  ;;  %v11175_v52 = vld [vmem:[#allocation3 + $0x260] ss:$8 sps:$4 sm:$0xff]  }
 0x33e   :  { %10635 = vmatmul.mubr.msk.bf16.vlgmr.msra.gmra.mrb[0].mxu0 %vm1027_vm2, %v985_v21 }
 0x33f   :  { %10642 = vmatprep.mubr.msk.bf16.mxu0 %vm2542_vm3, %v11062_v53  ;;  %v11183_v53 = vld [vmem:[#allocation3 + $0x274] ss:$8 sps:$4 sm:$0xff]  }
 0x411   :  { %v10636_v7 = vpop.f32.mrb[0].mxu0 }
 0x412   :  { %v2460_v11 = vadd.f32 %v10636_v7, %v9309_v5  ;;  %v2431_v12 = vpop.f32.mrb[1].mxu0 }
 0x413   :  { %v2458_v6 = vadd.f32 %v9309_v5, %v2431_v12  ;;  %v10637_v9 = vpop.f32.mrb[2].mxu0  ;;  %v11195_v12 = vld [vmem:[#allocation3 + $0x314] ss:$8 sps:$4 sm:$0xff]  }
 0x414   :  { %v2470_v10 = vmul.f32 %v9310_v8, %v2460_v11  ;;  %v2461_v13 = vadd.f32 %v10637_v9, %v9309_v5  ;;  %v2434_v15 = vpop.f32.mrb[3].mxu0  ;;  %v11105_v9 = vld [vmem:[#allocation3 + $0x34] ss:$8 sps:$4 sm:$0xff]  }
 0x415   :  { %v2468_v16 = vmul.f32 %v9310_v8, %v2458_v6  ;;  %v2459_v19 = vadd.f32 %v9309_v5, %v2434_v15  ;;  %v11100_v6 = vld [vmem:[#allocation3 + $0x20] ss:$8 sps:$4 sm:$0xff]   ;;  %v11103_v15 = vld [vmem:[#allocation3 + $0x30] ss:$8 sps:$4 sm:$0xff]  }
 0x416   :  { %v2478_v20 = vmul.f32 0.2, %v2470_v10  ;;  %v2471_v21 = vmul.f32 %v9310_v8, %v2461_v13  ;;  %vm2474_vm4 = vcmp.ge.f32.partialorder %v2470_v10, 0.0  ;;  %v11201_v13 = vld [vmem:[#allocation3 + $0x324] ss:$8 sps:$4 sm:$0xff]  }
 0x417   :  { %v2476_v23 = vmul.f32 0.2, %v2468_v16  ;;  %v2469_v31 = vmul.f32 %v9310_v8, %v2459_v19  ;;  %vm2472_vm5 = vcmp.ge.f32.partialorder %v2468_v16, 0.0  ;;  %v11187_v8 = vld [vmem:[#allocation3 + $0x300] ss:$8 sps:$4 sm:$0xff]  }
 0x418   :  { %vm2475_vm6 = vcmp.ge.f32.partialorder %v2471_v21, 0.0  ;;  %v2479_v33 = vmul.f32 0.2, %v2471_v21  ;;  %v2482_v41 = vsel %vm2474_vm4, %v2470_v10, %v2478_v20  ;;  %v11193_v10 = vld [vmem:[#allocation3 + $0x310] ss:$8 sps:$4 sm:$0xff]  }
 0x419   :  { %vm2473_vm7 = vcmp.ge.f32.partialorder %v2469_v31, 0.0  ;;  %v2477_v39 = vmul.f32 0.2, %v2469_v31  ;;  %v2480_v14 = vsel %vm2472_vm5, %v2468_v16, %v2476_v23  ;;  %v11108_v16 = vld [vmem:[#allocation3 + $0x44] ss:$8 sps:$4 sm:$0xff]  }
 0x41a   :  { %v2483_v47 = vsel %vm2475_vm6, %v2471_v21, %v2479_v33  ;;  %v11199_v19 = vld [vmem:[#allocation3 + $0x320] ss:$8 sps:$4 sm:$0xff]   ;;  %v11207_v20 = vld [vmem:[#allocation3 + $0x334] ss:$8 sps:$4 sm:$0xff]   ;;  %v11213_v33 = vld [vmem:[#allocation3 + $0x344] ss:$8 sps:$4 sm:$0xff]  }
 0x41b   :  { %v2481_v17 = vsel %vm2473_vm7, %v2469_v31, %v2477_v39  ;;  %v2501_v18 = vpack.c.bf16 %v2483_v47, %v2482_v41  ;;  %v11106_v21 = vld [vmem:[#allocation3 + $0x40] ss:$8 sps:$4 sm:$0xff]   ;;  %v11111_v23 = vld [vmem:[#allocation3 + $0x54] ss:$8 sps:$4 sm:$0xff]   ;;  %v11205_v31 = vld [vmem:[#allocation3 + $0x330] ss:$8 sps:$4 sm:$0xff]  }
 0x41c   :  { %v2500_v24 = vpack.c.bf16 %v2481_v17, %v2480_v14  ;;  %v11109_v39 = vld [vmem:[#allocation3 + $0x50] ss:$8 sps:$4 sm:$0xff]   ;;  %v11114_v47 = vld [vmem:[#allocation3 + $0x64] ss:$8 sps:$4 sm:$0xff]   ;;  %v11211_v17 = vld [vmem:[#allocation3 + $0x340] ss:$8 sps:$4 sm:$0xff]  }
 0x41e   :  { %10638 = vmatprep.subr.bf16.mxu0 %v2500_v24 }
 0x41f   :  { %10639 = vmatpush3.bf16.msra.mxu0 %v2500_v24  ;;  %v11112_v24 = vld [vmem:[#allocation3 + $0x60] ss:$8 sps:$4 sm:$0xff]  }
 0x420   :  { %10640 = vmatprep.subr.bf16.mxu0 %v2501_v18 }
 0x423   :  { %10641 = vmatpush3.bf16.msra.mxu0 %v2501_v18  ;;  %v11219_v18 = vld [vmem:[#allocation3 + $0x354] ss:$8 sps:$4 sm:$0xff]  }
 0x424   :  { %3330 = vmatprep.subr.bf16.mxu0 %v11141_v37  ;;  %v11120_v37 = vld [vmem:[#allocation3 + $0x104] ss:$8 sps:$4 sm:$0xff]  }
 0x426   :  { %10643 = vmatmul.mubr.msk.bf16.vlgmr.msra.gmra.mrb[4].mxu0 %vm2542_vm3, %v11063_v22 }
 0x427   :  { %10646 = vmatprep.mubr.msk.bf16.mxu0 %vm2542_vm3, %v11064_v25  ;;  %3331 = vmatpush1.bf16.msra.mxu0 %v11139_v38  ;;  %v11117_v25 = vld [vmem:[#allocation3 + $0x74] ss:$8 sps:$4 sm:$0xff]   ;;  %v11223_v38 = vld [vmem:[#allocation3 + $0x360] ss:$8 sps:$4 sm:$0xff]  }
 0x428   :  { %3332 = vmatprep.subr.bf16.mxu0 %v11147_v40  ;;  %v11231_v40 = vld [vmem:[#allocation3 + $0x374] ss:$8 sps:$4 sm:$0xff]  }
 0x42b   :  { %3333 = vmatpush1.bf16.msra.mxu0 %v11145_v42  ;;  %v11118_v42 = vld [vmem:[#allocation3 + $0x100] ss:$8 sps:$4 sm:$0xff]  }
 0x42c   :  { %3334 = vmatprep.subr.bf16.mxu0 %v11153_v43  ;;  %v11123_v43 = vld [vmem:[#allocation3 + $0x114] ss:$8 sps:$4 sm:$0xff]  }
 0x42e   :  { %10647 = vmatmul.mubr.msk.bf16.gmra.mrb[8].mxu0 %vm2542_vm3, %v11065_v26 }
 0x42f   :  { %10650 = vmatprep.mubr.msk.bf16.mxu0 %vm2542_vm3, %v11078_v29  ;;  %3335 = vmatpush1.bf16.msra.mxu0 %v11151_v44  ;;  %v11229_v44 = vld [vmem:[#allocation3 + $0x370] ss:$8 sps:$4 sm:$0xff]  }
 0x430   :  { %3336 = vmatprep.subr.bf16.mxu0 %v11159_v45  ;;  %v11237_v45 = vld [vmem:[#allocation3 + $0x404] ss:$8 sps:$4 sm:$0xff]  }
 0x433   :  { %3337 = vmatpush1.bf16.msra.mxu0 %v11157_v46  ;;  %v11121_v46 = vld [vmem:[#allocation3 + $0x110] ss:$8 sps:$4 sm:$0xff]  }
 0x434   :  { %3338 = vmatprep.subr.bf16.mxu0 %v11165_v48  ;;  %v11126_v48 = vld [vmem:[#allocation3 + $0x124] ss:$8 sps:$4 sm:$0xff]  }
 0x436   :  { %10651 = vmatmul.mubr.msk.bf16.gmra.mrb[12].mxu0 %vm2542_vm3, %v11079_v30  ;;  %v11217_v30 = vld [vmem:[#allocation3 + $0x350] ss:$8 sps:$4 sm:$0xff]  }
 0x437   :  { %10654 = vmatprep.mubr.msk.bf16.mxu0 %vm2542_vm3, %v11092_v32  ;;  %3339 = vmatpush1.bf16.msra.mxu0 %v11163_v49  ;;  %v11235_v49 = vld [vmem:[#allocation3 + $0x400] ss:$8 sps:$4 sm:$0xff]  }
 0x438   :  { %3340 = vmatprep.subr.bf16.mxu0 %v11171_v50  ;;  %v11243_v50 = vld [vmem:[#allocation3 + $0x414] ss:$8 sps:$4 sm:$0xff]  }
 0x43b   :  { %3341 = vmatpush1.bf16.msra.mxu0 %v11169_v28  ;;  %v11124_v28 = vld [vmem:[#allocation3 + $0x120] ss:$8 sps:$4 sm:$0xff]  }
 0x43c   :  { %3342 = vmatprep.subr.bf16.mxu0 %v11177_v51  ;;  %v11129_v51 = vld [vmem:[#allocation3 + $0x134] ss:$8 sps:$4 sm:$0xff]  }
 0x43e   :  { %10655 = vmatmul.mubr.msk.bf16.gmra.mrb[16].mxu0 %vm2542_vm3, %v11096_v35  ;;  %v11115_v35 = vld [vmem:[#allocation3 + $0x70] ss:$8 sps:$4 sm:$0xff]   ;;  %vm12055_vm3 = vmmov 0  }
 0x43f   :  { %3362 = vmatprep.mubr.bf16.mxu0 %v12053_v36  ;;  %3343 = vmatpush1.bf16.msra.mxu0 %v11175_v52  ;;  %v11241_v52 = vld [vmem:[#allocation3 + $0x410] ss:$8 sps:$4 sm:$0xff]  }
 0x440   :  { %3344 = vmatprep.subr.bf16.mxu0 %v11183_v53  ;;  %v11249_v53 = vld [vmem:[#allocation3 + $0x424] ss:$8 sps:$4 sm:$0xff]  }
 0x443   :  { %3345 = vmatpush1.bf16.msra.mxu0 %v11181_v54  ;;  %v11127_v54 = vld [vmem:[#allocation3 + $0x130] ss:$8 sps:$4 sm:$0xff]  }
 0x444   :  { %3613 = vmatprep.subr.bf16.mxu0 %v11189_v27  ;;  %v11132_v27 = vld [vmem:[#allocation3 + $0x144] ss:$8 sps:$4 sm:$0xff]  }
 0x4f9   :  { %v10644_v55 = vpop.f32.mrb[4].mxu0 }
 0x4fa   :  { %v2601_v56 = vpop.f32.mrb[5].mxu0 }
 0x4fb   :  { %v10645_v57 = vpop.f32.mrb[6].mxu0 }
 0x4fc   :  { %v12659_v58 = vpack.c.bf16 %v10645_v57, %v10644_v55  ;;  %v2604_v59 = vpop.f32.mrb[7].mxu0  ;;  %v11247_v55 = vld [vmem:[#allocation3 + $0x420] ss:$8 sps:$4 sm:$0xff]  }
 0x4fd   :  { %v12661_v60 = vpack.c.bf16 %v2604_v59, %v2601_v56  ;;  %v11255_v56 = vld [vmem:[#allocation3 + $0x434] ss:$8 sps:$4 sm:$0xff]   ;;  %v11130_v57 = vld [vmem:[#allocation3 + $0x140] ss:$8 sps:$4 sm:$0xff]  }
 0x4fe   :  { %v11135_v59 = vld [vmem:[#allocation3 + $0x154] ss:$8 sps:$4 sm:$0xff]  }
 0x4ff   :  { %v2706_v62 = vrot.slane %v12661_v60, 4 }
 0x501   :  { %2821 = vmatmul.mubr.bf16.vlgmr.msra.gmra.mrb[80].mxu1 %v2706_v62  ;;  %v10648_v0 = vpop.f32.mrb[8].mxu0  ;;  %v11133_v62 = vld [vmem:[#allocation3 + $0x150] ss:$8 sps:$4 sm:$0xff]  }
 0x502   :  { %2910 = vmatpush1.bf16.msra.mxu1 %v11093_v61  ;;  %2941 = vmatprep.mubr.bf16.mxu1 %v12053_v36  ;;  %v2617_v2 = vpop.f32.mrb[9].mxu0  ;;  %v11261_v61 = vld [vmem:[#allocation3 + $0x444] ss:$8 sps:$4 sm:$0xff]  }
 0x503   :  { %2911 = vmatprep.subr.bf16.mxu1 %v11099_v63  ;;  %v10649_v4 = vpop.f32.mrb[10].mxu0  ;;  %v11138_v63 = vld [vmem:[#allocation3 + $0x164] ss:$8 sps:$4 sm:$0xff]  }
 0x504   :  { %v12665_v5 = vpack.c.bf16 %v10649_v4, %v10648_v0  ;;  %v2620_v7 = vpop.f32.mrb[11].mxu0  ;;  %v11259_v0 = vld [vmem:[#allocation3 + $0x440] ss:$8 sps:$4 sm:$0xff]   ;;  %v11265_v4 = vld [vmem:[#allocation3 + $0x450] ss:$8 sps:$4 sm:$0xff]  }
 0x505   :  { %v12667_v11 = vpack.c.bf16 %v2620_v7, %v2617_v2  ;;  %v11136_v2 = vld [vmem:[#allocation3 + $0x160] ss:$8 sps:$4 sm:$0xff]   ;;  %v11273_v7 = vld [vmem:[#allocation3 + $0x464] ss:$8 sps:$4 sm:$0xff]  }
 0x506   :  { %2912 = vmatpush1.bf16.msra.mxu1 %v11097_v1  ;;  %v11267_v1 = vld [vmem:[#allocation3 + $0x454] ss:$8 sps:$4 sm:$0xff]  }
 0x507   :  { %2913 = vmatprep.subr.bf16.mxu1 %v11102_v3  ;;  %3363 = vmatmul.mubr.bf16.vlgmr.msra.gmra.mrb[20].mxu0 %v12667_v11  ;;  %v11144_v3 = vld [vmem:[#allocation3 + $0x174] ss:$8 sps:$4 sm:$0xff]  }
 0x508   :  { %3614 = vmatpush1.bf16.msra.mxu0 %v11187_v8  ;;  %3645 = vmatprep.mubr.bf16.mxu0 %v12053_v36  ;;  %v11142_v8 = vld [vmem:[#allocation3 + $0x170] ss:$8 sps:$4 sm:$0xff]  }
 0x509   :  { %3615 = vmatprep.subr.bf16.mxu0 %v11195_v12  ;;  %v10652_v41 = vpop.f32.mrb[12].mxu0  ;;  %v11150_v12 = vld [vmem:[#allocation3 + $0x184] ss:$8 sps:$4 sm:$0xff]  }
 0x50a   :  { %2914 = vmatpush1.bf16.msra.mxu1 %v11100_v6  ;;  %v2633_v14 = vpop.f32.mrb[13].mxu0  ;;  %v11271_v6 = vld [vmem:[#allocation3 + $0x460] ss:$8 sps:$4 sm:$0xff]  }
 0x50b   :  { %2915 = vmatprep.subr.bf16.mxu1 %v11105_v9  ;;  %v10653_v22 = vpop.f32.mrb[14].mxu0  ;;  %v11279_v9 = vld [vmem:[#allocation3 + $0x474] ss:$8 sps:$4 sm:$0xff]  }
 0x50c   :  { %3616 = vmatpush1.bf16.msra.mxu0 %v11193_v10  ;;  %v12671_v26 = vpack.c.bf16 %v10653_v22, %v10652_v41  ;;  %v2636_v29 = vpop.f32.mrb[15].mxu0  ;;  %v11148_v10 = vld [vmem:[#allocation3 + $0x180] ss:$8 sps:$4 sm:$0xff]   ;;  %v11297_v41 = vld [vmem:[#allocation3 + $0x524] ss:$8 sps:$4 sm:$0xff]  }
 0x50d   :  { %3617 = vmatprep.subr.bf16.mxu0 %v11201_v13  ;;  %v12673_v32 = vpack.c.bf16 %v2636_v29, %v2633_v14  ;;  %v11156_v13 = vld [vmem:[#allocation3 + $0x194] ss:$8 sps:$4 sm:$0xff]   ;;  %v11174_v14 = vld [vmem:[#allocation3 + $0x1c4] ss:$8 sps:$4 sm:$0xff]  }
 0x50e   :  { %2916 = vmatpush1.bf16.msra.mxu1 %v11103_v15  ;;  %v11277_v15 = vld [vmem:[#allocation3 + $0x470] ss:$8 sps:$4 sm:$0xff]   ;;  %v11180_v22 = vld [vmem:[#allocation3 + $0x1d4] ss:$8 sps:$4 sm:$0xff]   ;;  %v11309_v29 = vld [vmem:[#allocation3 + $0x544] ss:$8 sps:$4 sm:$0xff]  }
 0x50f   :  { %2917 = vmatprep.subr.bf16.mxu1 %v11108_v16  ;;  %v11285_v16 = vld [vmem:[#allocation3 + $0x504] ss:$8 sps:$4 sm:$0xff]  }
 0x510   :  { %3618 = vmatpush1.bf16.msra.mxu0 %v11199_v19  ;;  %v11154_v19 = vld [vmem:[#allocation3 + $0x190] ss:$8 sps:$4 sm:$0xff]  }
 0x511   :  { %3619 = vmatprep.subr.bf16.mxu0 %v11207_v20  ;;  %v11162_v20 = vld [vmem:[#allocation3 + $0x1a4] ss:$8 sps:$4 sm:$0xff]  }
 0x512   :  { %2918 = vmatpush1.bf16.msra.mxu1 %v11106_v21  ;;  %v11283_v21 = vld [vmem:[#allocation3 + $0x500] ss:$8 sps:$4 sm:$0xff]  }
 0x513   :  { %2919 = vmatprep.subr.bf16.mxu1 %v11111_v23  ;;  %v11291_v23 = vld [vmem:[#allocation3 + $0x514] ss:$8 sps:$4 sm:$0xff]  }
 0x514   :  { %3620 = vmatpush1.bf16.msra.mxu0 %v11205_v31  ;;  %v11160_v31 = vld [vmem:[#allocation3 + $0x1a0] ss:$8 sps:$4 sm:$0xff]  }
 0x515   :  { %3621 = vmatprep.subr.bf16.mxu0 %v11213_v33  ;;  %v11168_v33 = vld [vmem:[#allocation3 + $0x1b4] ss:$8 sps:$4 sm:$0xff]  }
 0x516   :  { %2920 = vmatpush1.bf16.msra.mxu1 %v11109_v39  ;;  %v11289_v39 = vld [vmem:[#allocation3 + $0x510] ss:$8 sps:$4 sm:$0xff]  }
 0x517   :  { %2921 = vmatprep.subr.bf16.mxu1 %v11114_v47  ;;  %v11166_v47 = vld [vmem:[#allocation3 + $0x1b0] ss:$8 sps:$4 sm:$0xff]  }
 0x518   :  { %3622 = vmatpush1.bf16.msra.mxu0 %v11211_v17  ;;  %v11295_v17 = vld [vmem:[#allocation3 + $0x520] ss:$8 sps:$4 sm:$0xff]  }
 0x519   :  { %3623 = vmatprep.subr.bf16.mxu0 %v11219_v18  ;;  %v11303_v18 = vld [vmem:[#allocation3 + $0x534] ss:$8 sps:$4 sm:$0xff]  }
 0x51a   :  { %2922 = vmatpush1.bf16.msra.mxu1 %v11112_v24  ;;  %v11172_v24 = vld [vmem:[#allocation3 + $0x1c0] ss:$8 sps:$4 sm:$0xff]  }
 0x51b   :  { %2923 = vmatprep.subr.bf16.mxu1 %v11117_v25  ;;  %v11301_v25 = vld [vmem:[#allocation3 + $0x530] ss:$8 sps:$4 sm:$0xff]  }
 0x51c   :  { %3624 = vmatpush1.bf16.msra.mxu0 %v11217_v30  ;;  %v11178_v30 = vld [vmem:[#allocation3 + $0x1d0] ss:$8 sps:$4 sm:$0xff]  }
 0x51d   :  { %3625 = vmatprep.subr.bf16.mxu0 %v11225_v34  ;;  %v11186_v34 = vld [vmem:[#allocation3 + $0x1e4] ss:$8 sps:$4 sm:$0xff]  }
 0x51e   :  { %2924 = vmatpush1.bf16.msra.mxu1 %v11115_v35  ;;  %v11307_v35 = vld [vmem:[#allocation3 + $0x540] ss:$8 sps:$4 sm:$0xff]  }
 0x51f   :  { %3047 = vmatprep.subr.bf16.mxu1 %v11120_v37  ;;  %v10656_v37 = vpop.f32.mrb[16].mxu0 }
 0x520   :  { %3626 = vmatpush1.bf16.msra.mxu0 %v11223_v38  ;;  %v11315_v38 = vld [vmem:[#allocation3 + $0x554] ss:$8 sps:$4 sm:$0xff]  }
 0x521   :  { %2942 = vmatmul.mubr.bf16.vlgmr.msra.gmra.mrb[84].mxu1 %v12661_v60  ;;  %3627 = vmatprep.subr.bf16.mxu0 %v11231_v40  ;;  %v11253_v60 = vld [vmem:[#allocation3 + $0x430] ss:$8 sps:$4 sm:$0xff]   ;;  %v2649_v40 = vpop.f32.mrb[17].mxu0 }
 0x522   :  { %3048 = vmatpush1.bf16.msra.mxu1 %v11118_v42  ;;  %3079 = vmatprep.mubr.bf16.mxu1 %v12053_v36  ;;  %v11184_v42 = vld [vmem:[#allocation3 + $0x1e0] ss:$8 sps:$4 sm:$0xff]  }
 0x523   :  { %3049 = vmatprep.subr.bf16.mxu1 %v11123_v43  ;;  %v10657_v43 = vpop.f32.mrb[18].mxu0 }
 0x524   :  { %3628 = vmatpush1.bf16.msra.mxu0 %v11229_v44  ;;  %v11192_v44 = vld [vmem:[#allocation3 + $0x1f4] ss:$8 sps:$4 sm:$0xff]  }
 0x525   :  { %3896 = vmatprep.subr.bf16.mxu0 %v11237_v45  ;;  %v12683_v45 = vpack.c.bf16 %v10657_v43, %v10656_v37  ;;  %v11393_v37 = vld [vmem:[#allocation3 + $0x724] ss:$8 sps:$4 sm:$0xff]   ;;  %v11399_v43 = vld [vmem:[#allocation3 + $0x734] ss:$8 sps:$4 sm:$0xff]  }
 0x526   :  { %3050 = vmatpush1.bf16.msra.mxu1 %v11121_v46  ;;  %v2652_v46 = vpop.f32.mrb[19].mxu0 }
 0x527   :  { %3051 = vmatprep.subr.bf16.mxu1 %v11126_v48  ;;  %3646 = vmatmul.mubr.bf16.vlgmr.msra.gmra.mrb[24].mxu0 %v12665_v5  ;;  %v11313_v48 = vld [vmem:[#allocation3 + $0x550] ss:$8 sps:$4 sm:$0xff]  }
 0x528   :  { %3897 = vmatpush1.bf16.msra.mxu0 %v11235_v49  ;;  %3928 = vmatprep.mubr.bf16.mxu0 %v12053_v36  ;;  %v12685_v49 = vpack.c.bf16 %v2652_v46, %v2649_v40  ;;  %v11270_v40 = vld [vmem:[#allocation3 + $0x3c4] ss:$8 sps:$4 sm:$0xff]   ;;  %v11276_v46 = vld [vmem:[#allocation3 + $0x3d4] ss:$8 sps:$4 sm:$0xff]  }
 0x529   :  { %3898 = vmatprep.subr.bf16.mxu0 %v11243_v50  ;;  %v11321_v50 = vld [vmem:[#allocation3 + $0x564] ss:$8 sps:$4 sm:$0xff]  }
 0x52a   :  { %3052 = vmatpush1.bf16.msra.mxu1 %v11124_v28  ;;  %v11190_v28 = vld [vmem:[#allocation3 + $0x1f0] ss:$8 sps:$4 sm:$0xff]  }
 0x52b   :  { %3053 = vmatprep.subr.bf16.mxu1 %v11129_v51  ;;  %v11198_v51 = vld [vmem:[#allocation3 + $0x284] ss:$8 sps:$4 sm:$0xff]  }
 0x52c   :  { %3899 = vmatpush1.bf16.msra.mxu0 %v11241_v52  ;;  %v11319_v52 = vld [vmem:[#allocation3 + $0x560] ss:$8 sps:$4 sm:$0xff]  }
 0x52d   :  { %3900 = vmatprep.subr.bf16.mxu0 %v11249_v53  ;;  %v11327_v53 = vld [vmem:[#allocation3 + $0x574] ss:$8 sps:$4 sm:$0xff]  }
 0x52e   :  { %3054 = vmatpush1.bf16.msra.mxu1 %v11127_v54  ;;  %v11196_v54 = vld [vmem:[#allocation3 + $0x280] ss:$8 sps:$4 sm:$0xff]  }
 0x52f   :  { %3055 = vmatprep.subr.bf16.mxu1 %v11132_v27  ;;  %v3108_v27 = vrot.slane %v12659_v58, 4 }
 0x530   :  { %3901 = vmatpush1.bf16.msra.mxu0 %v11247_v55  ;;  %v11204_v55 = vld [vmem:[#allocation3 + $0x294] ss:$8 sps:$4 sm:$0xff]  }
 0x531   :  { %3902 = vmatprep.subr.bf16.mxu0 %v11255_v56  ;;  %v11325_v56 = vld [vmem:[#allocation3 + $0x570] ss:$8 sps:$4 sm:$0xff]  }
 0x532   :  { %3056 = vmatpush1.bf16.msra.mxu1 %v11130_v57  ;;  %v11333_v57 = vld [vmem:[#allocation3 + $0x604] ss:$8 sps:$4 sm:$0xff]  }
 0x533   :  { %3057 = vmatprep.subr.bf16.mxu1 %v11135_v59  ;;  %v11202_v59 = vld [vmem:[#allocation3 + $0x290] ss:$8 sps:$4 sm:$0xff]  }
 0x534   :  { %3903 = vmatpush1.bf16.msra.mxu0 %v11253_v60  ;;  %v11210_v60 = vld [vmem:[#allocation3 + $0x2a4] ss:$8 sps:$4 sm:$0xff]  }
 0x535   :  { %3904 = vmatprep.subr.bf16.mxu0 %v11261_v61  ;;  %v11331_v61 = vld [vmem:[#allocation3 + $0x600] ss:$8 sps:$4 sm:$0xff]  }
 0x536   :  { %3058 = vmatpush1.bf16.msra.mxu1 %v11133_v62  ;;  %v11339_v62 = vld [vmem:[#allocation3 + $0x614] ss:$8 sps:$4 sm:$0xff]  }
 0x537   :  { %3059 = vmatprep.subr.bf16.mxu1 %v11138_v63  ;;  %v11208_v63 = vld [vmem:[#allocation3 + $0x2a0] ss:$8 sps:$4 sm:$0xff]  }
 0x538   :  { %3905 = vmatpush1.bf16.msra.mxu0 %v11259_v0  ;;  %v11337_v0 = vld [vmem:[#allocation3 + $0x610] ss:$8 sps:$4 sm:$0xff]  }
 0x539   :  { %3906 = vmatprep.subr.bf16.mxu0 %v11267_v1  ;;  %v11345_v1 = vld [vmem:[#allocation3 + $0x624] ss:$8 sps:$4 sm:$0xff]  }
 0x53a   :  { %3060 = vmatpush1.bf16.msra.mxu1 %v11136_v2  ;;  %v11214_v2 = vld [vmem:[#allocation3 + $0x2b0] ss:$8 sps:$4 sm:$0xff]  }
 0x53b   :  { %3061 = vmatprep.subr.bf16.mxu1 %v11144_v3  ;;  %v11222_v3 = vld [vmem:[#allocation3 + $0x2c4] ss:$8 sps:$4 sm:$0xff]  }
 0x53c   :  { %3907 = vmatpush1.bf16.msra.mxu0 %v11265_v4  ;;  %v11343_v4 = vld [vmem:[#allocation3 + $0x620] ss:$8 sps:$4 sm:$0xff]  }
 0x53d   :  { %3908 = vmatprep.subr.bf16.mxu0 %v11273_v7  ;;  %v11351_v7 = vld [vmem:[#allocation3 + $0x634] ss:$8 sps:$4 sm:$0xff]  }
 0x53e   :  { %3062 = vmatpush1.bf16.msra.mxu1 %v11142_v8  ;;  %v11220_v8 = vld [vmem:[#allocation3 + $0x2c0] ss:$8 sps:$4 sm:$0xff]  }
 0x53f   :  { %3190 = vmatprep.subr.bf16.mxu1 %v11150_v12  ;;  %v11228_v12 = vld [vmem:[#allocation3 + $0x2d4] ss:$8 sps:$4 sm:$0xff]  }
 0x540   :  { %3909 = vmatpush1.bf16.msra.mxu0 %v11271_v6  ;;  %v11349_v6 = vld [vmem:[#allocation3 + $0x630] ss:$8 sps:$4 sm:$0xff]  }
 0x541   :  { %3080 = vmatmul.mubr.bf16.vlgmr.msra.gmra.mrb[88].mxu1 %v12659_v58  ;;  %3910 = vmatprep.subr.bf16.mxu0 %v11279_v9  ;;  %v11216_v58 = vld [vmem:[#allocation3 + $0x2b4] ss:$8 sps:$4 sm:$0xff]   ;;  %v11357_v9 = vld [vmem:[#allocation3 + $0x644] ss:$8 sps:$4 sm:$0xff]  }
 0x542   :  { %3191 = vmatpush1.bf16.msra.mxu1 %v11148_v10  ;;  %3222 = vmatprep.mubr.bf16.mxu1 %v12053_v36  ;;  %v11226_v10 = vld [vmem:[#allocation3 + $0x2d0] ss:$8 sps:$4 sm:$0xff]  }
 0x543   :  { %3192 = vmatprep.subr.bf16.mxu1 %v11156_v13  ;;  %v11234_v13 = vld [vmem:[#allocation3 + $0x2e4] ss:$8 sps:$4 sm:$0xff]  }
 0x544   :  { %3911 = vmatpush1.bf16.msra.mxu0 %v11277_v15  ;;  %v11355_v15 = vld [vmem:[#allocation3 + $0x640] ss:$8 sps:$4 sm:$0xff]  }
 0x545   :  { %4179 = vmatprep.subr.bf16.mxu0 %v11285_v16  ;;  %v11363_v16 = vld [vmem:[#allocation3 + $0x654] ss:$8 sps:$4 sm:$0xff]  }
 0x546   :  { %3193 = vmatpush1.bf16.msra.mxu1 %v11154_v19  ;;  %v11232_v19 = vld [vmem:[#allocation3 + $0x2e0] ss:$8 sps:$4 sm:$0xff]  }
 0x547   :  { %3194 = vmatprep.subr.bf16.mxu1 %v11162_v20  ;;  %3929 = vmatmul.mubr.bf16.vlgmr.msra.gmra.mrb[28].mxu0 %v12673_v32  ;;  %v11240_v20 = vld [vmem:[#allocation3 + $0x2f4] ss:$8 sps:$4 sm:$0xff]  }
 0x548   :  { %4180 = vmatpush1.bf16.msra.mxu0 %v11283_v21  ;;  %4211 = vmatprep.mubr.bf16.mxu0 %v12053_v36  ;;  %v11361_v21 = vld [vmem:[#allocation3 + $0x650] ss:$8 sps:$4 sm:$0xff]  }
 0x549   :  { %4181 = vmatprep.subr.bf16.mxu0 %v11291_v23  ;;  %v11369_v23 = vld [vmem:[#allocation3 + $0x664] ss:$8 sps:$4 sm:$0xff]  }
 0x54a   :  { %3195 = vmatpush1.bf16.msra.mxu1 %v11160_v31  ;;  %v11238_v31 = vld [vmem:[#allocation3 + $0x2f0] ss:$8 sps:$4 sm:$0xff]  }
 0x54b   :  { %3196 = vmatprep.subr.bf16.mxu1 %v11168_v33  ;;  %v11246_v33 = vld [vmem:[#allocation3 + $0x384] ss:$8 sps:$4 sm:$0xff]  }
 0x54c   :  { %4182 = vmatpush1.bf16.msra.mxu0 %v11289_v39  ;;  %v11367_v39 = vld [vmem:[#allocation3 + $0x660] ss:$8 sps:$4 sm:$0xff]  }
 0x54d   :  { %4183 = vmatprep.subr.bf16.mxu0 %v11297_v41  ;;  %v11375_v41 = vld [vmem:[#allocation3 + $0x674] ss:$8 sps:$4 sm:$0xff]  }
 0x54e   :  { %3197 = vmatpush1.bf16.msra.mxu1 %v11166_v47  ;;  %v11244_v47 = vld [vmem:[#allocation3 + $0x380] ss:$8 sps:$4 sm:$0xff]  }
 0x54f   :  { %3198 = vmatprep.subr.bf16.mxu1 %v11174_v14  ;;  %v3391_v14 = vrot.slane %v12667_v11, 4  ;;  %v11264_v11 = vld [vmem:[#allocation3 + $0x3b4] ss:$8 sps:$4 sm:$0xff]  }
 0x550   :  { %4184 = vmatpush1.bf16.msra.mxu0 %v11295_v17  ;;  %v11252_v17 = vld [vmem:[#allocation3 + $0x394] ss:$8 sps:$4 sm:$0xff]  }
 0x551   :  { %4185 = vmatprep.subr.bf16.mxu0 %v11303_v18  ;;  %v11373_v18 = vld [vmem:[#allocation3 + $0x670] ss:$8 sps:$4 sm:$0xff]  }
 0x552   :  { %3199 = vmatpush1.bf16.msra.mxu1 %v11172_v24  ;;  %v11381_v24 = vld [vmem:[#allocation3 + $0x704] ss:$8 sps:$4 sm:$0xff]  }
 0x553   :  { %3200 = vmatprep.subr.bf16.mxu1 %v11180_v22  ;;  %v11250_v22 = vld [vmem:[#allocation3 + $0x390] ss:$8 sps:$4 sm:$0xff]  }
 0x554   :  { %4186 = vmatpush1.bf16.msra.mxu0 %v11301_v25  ;;  %v11258_v25 = vld [vmem:[#allocation3 + $0x3a4] ss:$8 sps:$4 sm:$0xff]  }
 0x555   :  { %4187 = vmatprep.subr.bf16.mxu0 %v11309_v29  ;;  %v11379_v29 = vld [vmem:[#allocation3 + $0x700] ss:$8 sps:$4 sm:$0xff]  }
 0x556   :  { %3201 = vmatpush1.bf16.msra.mxu1 %v11178_v30  ;;  %v11387_v30 = vld [vmem:[#allocation3 + $0x714] ss:$8 sps:$4 sm:$0xff]  }
 0x557   :  { %3202 = vmatprep.subr.bf16.mxu1 %v11186_v34  ;;  %v11256_v34 = vld [vmem:[#allocation3 + $0x3a0] ss:$8 sps:$4 sm:$0xff]  }
 0x558   :  { %4188 = vmatpush1.bf16.msra.mxu0 %v11307_v35  ;;  %v11385_v35 = vld [vmem:[#allocation3 + $0x710] ss:$8 sps:$4 sm:$0xff]  }
 0x559   :  { %4189 = vmatprep.subr.bf16.mxu0 %v11315_v38  ;;  %v11262_v38 = vld [vmem:[#allocation3 + $0x3b0] ss:$8 sps:$4 sm:$0xff]  }
 0x55a   :  { %3203 = vmatpush1.bf16.msra.mxu1 %v11184_v42  ;;  %v11391_v42 = vld [vmem:[#allocation3 + $0x720] ss:$8 sps:$4 sm:$0xff]  }
 0x55b   :  { %3204 = vmatprep.subr.bf16.mxu1 %v11192_v44  ;;  %v11268_v44 = vld [vmem:[#allocation3 + $0x3c0] ss:$8 sps:$4 sm:$0xff]  }
 0x55c   :  { %4190 = vmatpush1.bf16.msra.mxu0 %v11313_v48  ;;  %v11397_v48 = vld [vmem:[#allocation3 + $0x730] ss:$8 sps:$4 sm:$0xff]  }
 0x55d   :  { %4191 = vmatprep.subr.bf16.mxu0 %v11321_v50  ;;  %v11405_v50 = vld [vmem:[#allocation3 + $0x744] ss:$8 sps:$4 sm:$0xff]  }
 0x55e   :  { %3205 = vmatpush1.bf16.msra.mxu1 %v11190_v28  ;;  %v11274_v28 = vld [vmem:[#allocation3 + $0x3d0] ss:$8 sps:$4 sm:$0xff]  }
 0x55f   :  { %3473 = vmatprep.subr.bf16.mxu1 %v11198_v51  ;;  %v11282_v51 = vld [vmem:[#allocation3 + $0x3e4] ss:$8 sps:$4 sm:$0xff]  }
 0x560   :  { %4192 = vmatpush1.bf16.msra.mxu0 %v11319_v52  ;;  %v11403_v52 = vld [vmem:[#allocation3 + $0x740] ss:$8 sps:$4 sm:$0xff]  }
 0x561   :  { %3223 = vmatmul.mubr.bf16.vlgmr.msra.gmra.mrb[92].mxu1 %v3108_v27  ;;  %4193 = vmatprep.subr.bf16.mxu0 %v11327_v53  ;;  %v11411_v53 = vld [vmem:[#allocation3 + $0x754] ss:$8 sps:$4 sm:$0xff]  }
 0x562   :  { %3474 = vmatpush1.bf16.msra.mxu1 %v11196_v54  ;;  %3505 = vmatprep.mubr.bf16.mxu1 %v12053_v36  ;;  %v11280_v54 = vld [vmem:[#allocation3 + $0x3e0] ss:$8 sps:$4 sm:$0xff]   ;;  %v11288_v27 = vld [vmem:[#allocation3 + $0x3f4] ss:$8 sps:$4 sm:$0xff]  }
 0x563   :  { %3475 = vmatprep.subr.bf16.mxu1 %v11204_v55  ;;  %v11409_v55 = vld [vmem:[#allocation3 + $0x750] ss:$8 sps:$4 sm:$0xff]  }
 0x564   :  { %4194 = vmatpush1.bf16.msra.mxu0 %v11325_v56  ;;  %v11417_v56 = vld [vmem:[#allocation3 + $0x764] ss:$8 sps:$4 sm:$0xff]  }
 0x565   :  { %4462 = vmatprep.subr.bf16.mxu0 %v11333_v57  ;;  %v11286_v57 = vld [vmem:[#allocation3 + $0x3f0] ss:$8 sps:$4 sm:$0xff]  }
 0x566   :  { %3476 = vmatpush1.bf16.msra.mxu1 %v11202_v59  ;;  %v11294_v59 = vld [vmem:[#allocation3 + $0x484] ss:$8 sps:$4 sm:$0xff]  }
 0x567   :  { %3477 = vmatprep.subr.bf16.mxu1 %v11210_v60  ;;  %4212 = vmatmul.mubr.bf16.vlgmr.msra.gmra.mrb[32].mxu0 %v12671_v26  ;;  %v11415_v60 = vld [vmem:[#allocation3 + $0x760] ss:$8 sps:$4 sm:$0xff]  }
 0x568   :  { %4463 = vmatpush1.bf16.msra.mxu0 %v11331_v61  ;;  %4494 = vmatprep.mubr.bf16.mxu0 %v12053_v36  ;;  %v11423_v61 = vld [vmem:[#allocation3 + $0x774] ss:$8 sps:$4 sm:$0xff]  }
 0x569   :  { %4464 = vmatprep.subr.bf16.mxu0 %v11339_v62  ;;  %v11292_v62 = vld [vmem:[#allocation3 + $0x480] ss:$8 sps:$4 sm:$0xff]  }
 0x56a   :  { %3478 = vmatpush1.bf16.msra.mxu1 %v11208_v63  ;;  %v3674_v63 = vrot.slane %v12665_v5, 4  ;;  %v11310_v5 = vld [vmem:[#allocation3 + $0x4b0] ss:$8 sps:$4 sm:$0xff]  }
 0x56b   :  { %3479 = vmatprep.subr.bf16.mxu1 %v11216_v58  ;;  %v11300_v58 = vld [vmem:[#allocation3 + $0x494] ss:$8 sps:$4 sm:$0xff]  }
 0x56c   :  { %4465 = vmatpush1.bf16.msra.mxu0 %v11337_v0  ;;  %v11421_v0 = vld [vmem:[#allocation3 + $0x770] ss:$8 sps:$4 sm:$0xff]  }
 0x56d   :  { %4466 = vmatprep.subr.bf16.mxu0 %v11345_v1  ;;  %v11298_v1 = vld [vmem:[#allocation3 + $0x490] ss:$8 sps:$4 sm:$0xff]  }
 0x56e   :  { %3480 = vmatpush1.bf16.msra.mxu1 %v11214_v2  ;;  %v11306_v2 = vld [vmem:[#allocation3 + $0x4a4] ss:$8 sps:$4 sm:$0xff]  }
 0x56f   :  { %3481 = vmatprep.subr.bf16.mxu1 %v11222_v3  ;;  %v11304_v3 = vld [vmem:[#allocation3 + $0x4a0] ss:$8 sps:$4 sm:$0xff]  }
 0x570   :  { %4467 = vmatpush1.bf16.msra.mxu0 %v11343_v4  ;;  %v11312_v4 = vld [vmem:[#allocation3 + $0x4b4] ss:$8 sps:$4 sm:$0xff]  }
 0x571   :  { %4468 = vmatprep.subr.bf16.mxu0 %v11351_v7  ;;  %v11318_v7 = vld [vmem:[#allocation3 + $0x4c4] ss:$8 sps:$4 sm:$0xff]  }
 0x572   :  { %3482 = vmatpush1.bf16.msra.mxu1 %v11220_v8  ;;  %v11316_v8 = vld [vmem:[#allocation3 + $0x4c0] ss:$8 sps:$4 sm:$0xff]  }
 0x573   :  { %3483 = vmatprep.subr.bf16.mxu1 %v11228_v12  ;;  %v11324_v12 = vld [vmem:[#allocation3 + $0x4d4] ss:$8 sps:$4 sm:$0xff]  }
 0x574   :  { %4469 = vmatpush1.bf16.msra.mxu0 %v11349_v6  ;;  %v11322_v6 = vld [vmem:[#allocation3 + $0x4d0] ss:$8 sps:$4 sm:$0xff]  }
 0x575   :  { %4470 = vmatprep.subr.bf16.mxu0 %v11357_v9  ;;  %v11330_v9 = vld [vmem:[#allocation3 + $0x4e4] ss:$8 sps:$4 sm:$0xff]  }
 0x576   :  { %3484 = vmatpush1.bf16.msra.mxu1 %v11226_v10  ;;  %v11328_v10 = vld [vmem:[#allocation3 + $0x4e0] ss:$8 sps:$4 sm:$0xff]  }
 0x577   :  { %3485 = vmatprep.subr.bf16.mxu1 %v11234_v13  ;;  %v11336_v13 = vld [vmem:[#allocation3 + $0x4f4] ss:$8 sps:$4 sm:$0xff]  }
 0x578   :  { %4471 = vmatpush1.bf16.msra.mxu0 %v11355_v15  ;;  %v11334_v15 = vld [vmem:[#allocation3 + $0x4f0] ss:$8 sps:$4 sm:$0xff]  }
 0x579   :  { %4472 = vmatprep.subr.bf16.mxu0 %v11363_v16  ;;  %v11342_v16 = vld [vmem:[#allocation3 + $0x584] ss:$8 sps:$4 sm:$0xff]  }
 0x57a   :  { %3486 = vmatpush1.bf16.msra.mxu1 %v11232_v19  ;;  %v11340_v19 = vld [vmem:[#allocation3 + $0x580] ss:$8 sps:$4 sm:$0xff]  }
 0x57b   :  { %3487 = vmatprep.subr.bf16.mxu1 %v11240_v20  ;;  %v3957_v20 = vrot.slane %v12673_v32, 4  ;;  %v11372_v32 = vld [vmem:[#allocation3 + $0x5d4] ss:$8 sps:$4 sm:$0xff]  }
 0x57c   :  { %4473 = vmatpush1.bf16.msra.mxu0 %v11361_v21  ;;  %v11348_v21 = vld [vmem:[#allocation3 + $0x594] ss:$8 sps:$4 sm:$0xff]  }
 0x57d   :  { %4474 = vmatprep.subr.bf16.mxu0 %v11369_v23  ;;  %v11346_v23 = vld [vmem:[#allocation3 + $0x590] ss:$8 sps:$4 sm:$0xff]  }
 0x57e   :  { %3488 = vmatpush1.bf16.msra.mxu1 %v11238_v31  ;;  %v11354_v31 = vld [vmem:[#allocation3 + $0x5a4] ss:$8 sps:$4 sm:$0xff]  }
 0x57f   :  { %3756 = vmatprep.subr.bf16.mxu1 %v11246_v33  ;;  %v11352_v33 = vld [vmem:[#allocation3 + $0x5a0] ss:$8 sps:$4 sm:$0xff]  }
 0x580   :  { %4475 = vmatpush1.bf16.msra.mxu0 %v11367_v39  ;;  %v11360_v39 = vld [vmem:[#allocation3 + $0x5b4] ss:$8 sps:$4 sm:$0xff]  }
 0x581   :  { %3506 = vmatmul.mubr.bf16.vlgmr.msra.gmra.mrb[96].mxu1 %v3391_v14  ;;  %4476 = vmatprep.subr.bf16.mxu0 %v11375_v41  ;;  %v11358_v41 = vld [vmem:[#allocation3 + $0x5b0] ss:$8 sps:$4 sm:$0xff]   ;;  %v11364_v14 = vld [vmem:[#allocation3 + $0x5c0] ss:$8 sps:$4 sm:$0xff]  }
 0x582   :  { %3757 = vmatpush1.bf16.msra.mxu1 %v11244_v47  ;;  %3788 = vmatprep.mubr.bf16.mxu1 %v12053_v36  ;;  %v11366_v47 = vld [vmem:[#allocation3 + $0x5c4] ss:$8 sps:$4 sm:$0xff]  }
 0x583   :  { %3758 = vmatprep.subr.bf16.mxu1 %v11252_v17  ;;  %v11370_v17 = vld [vmem:[#allocation3 + $0x5d0] ss:$8 sps:$4 sm:$0xff]  }
 0x584   :  { %4477 = vmatpush1.bf16.msra.mxu0 %v11373_v18  ;;  %v11378_v18 = vld [vmem:[#allocation3 + $0x5e4] ss:$8 sps:$4 sm:$0xff]  }
 0x585   :  { %4745 = vmatprep.subr.bf16.mxu0 %v11381_v24 }
 0x586   :  { %3759 = vmatpush1.bf16.msra.mxu1 %v11250_v22 }
 0x587   :  { %3760 = vmatprep.subr.bf16.mxu1 %v11258_v25  ;;  %4495 = vmatmul.mubr.bf16.vlgmr.msra.gmra.mrb[36].mxu0 %v12685_v49 }
 0x588   :  { %4746 = vmatpush1.bf16.msra.mxu0 %v11379_v29  ;;  %4777 = vmatprep.mubr.bf16.mxu0 %v12053_v36  ;;  %v11376_v29 = vld [vmem:[#allocation3 + $0x5e0] ss:$8 sps:$4 sm:$0xff]  }
 0x589   :  { %4747 = vmatprep.subr.bf16.mxu0 %v11387_v30 }
 0x58a   :  { %3761 = vmatpush1.bf16.msra.mxu1 %v11256_v34  ;;  %v11384_v34 = vld [vmem:[#allocation3 + $0x5f4] ss:$8 sps:$4 sm:$0xff]  }
 0x58b   :  { %3762 = vmatprep.subr.bf16.mxu1 %v11264_v11  ;;  %v11382_v11 = vld [vmem:[#allocation3 + $0x5f0] ss:$8 sps:$4 sm:$0xff]  }
 0x58c   :  { %4748 = vmatpush1.bf16.msra.mxu0 %v11385_v35 }
 0x58d   :  { %4749 = vmatprep.subr.bf16.mxu0 %v11393_v37  ;;  %v11390_v37 = vld [vmem:[#allocation3 + $0x684] ss:$8 sps:$4 sm:$0xff]  }
 0x58e   :  { %3763 = vmatpush1.bf16.msra.mxu1 %v11262_v38 }
 0x58f   :  { %3764 = vmatprep.subr.bf16.mxu1 %v11270_v40 }
 0x590   :  { %4750 = vmatpush1.bf16.msra.mxu0 %v11391_v42 }
 0x591   :  { %4751 = vmatprep.subr.bf16.mxu0 %v11399_v43  ;;  %v11388_v43 = vld [vmem:[#allocation3 + $0x680] ss:$8 sps:$4 sm:$0xff]  }
 0x592   :  { %3765 = vmatpush1.bf16.msra.mxu1 %v11268_v44  ;;  %v4240_v44 = vrot.slane %v12671_v26, 4  ;;  %v11420_v26 = vld [vmem:[#allocation3 + $0x6d4] ss:$8 sps:$4 sm:$0xff]  }
 0x593   :  { %3766 = vmatprep.subr.bf16.mxu1 %v11276_v46  ;;  %v11396_v46 = vld [vmem:[#allocation3 + $0x694] ss:$8 sps:$4 sm:$0xff]  }
 0x594   :  { %4752 = vmatpush1.bf16.msra.mxu0 %v11397_v48  ;;  %v11394_v48 = vld [vmem:[#allocation3 + $0x690] ss:$8 sps:$4 sm:$0xff]  }
 0x595   :  { %4753 = vmatprep.subr.bf16.mxu0 %v11405_v50  ;;  %v11402_v50 = vld [vmem:[#allocation3 + $0x6a4] ss:$8 sps:$4 sm:$0xff]  }
 0x596   :  { %3767 = vmatpush1.bf16.msra.mxu1 %v11274_v28  ;;  %v11400_v28 = vld [vmem:[#allocation3 + $0x6a0] ss:$8 sps:$4 sm:$0xff]  }
 0x597   :  { %3768 = vmatprep.subr.bf16.mxu1 %v11282_v51  ;;  %v11408_v51 = vld [vmem:[#allocation3 + $0x6b4] ss:$8 sps:$4 sm:$0xff]  }
 0x598   :  { %4754 = vmatpush1.bf16.msra.mxu0 %v11403_v52  ;;  %v11406_v52 = vld [vmem:[#allocation3 + $0x6b0] ss:$8 sps:$4 sm:$0xff]  }
 0x599   :  { %4755 = vmatprep.subr.bf16.mxu0 %v11411_v53  ;;  %v11414_v53 = vld [vmem:[#allocation3 + $0x6c4] ss:$8 sps:$4 sm:$0xff]  }
 0x59a   :  { %3769 = vmatpush1.bf16.msra.mxu1 %v11280_v54  ;;  %v11412_v54 = vld [vmem:[#allocation3 + $0x6c0] ss:$8 sps:$4 sm:$0xff]  }
 0x59b   :  { %3770 = vmatprep.subr.bf16.mxu1 %v11288_v27  ;;  %v11418_v27 = vld [vmem:[#allocation3 + $0x6d0] ss:$8 sps:$4 sm:$0xff]  }
 0x59c   :  { %4756 = vmatpush1.bf16.msra.mxu0 %v11409_v55  ;;  %v11426_v55 = vld [vmem:[#allocation3 + $0x6e4] ss:$8 sps:$4 sm:$0xff]  }
 0x59d   :  { %4757 = vmatprep.subr.bf16.mxu0 %v11417_v56 }
 0x59e   :  { %3771 = vmatpush1.bf16.msra.mxu1 %v11286_v57 }
 0x59f   :  { %4039 = vmatprep.subr.bf16.mxu1 %v11294_v59 }
 0x5a0   :  { %4758 = vmatpush1.bf16.msra.mxu0 %v11415_v60 }
 0x5a1   :  { %3789 = vmatmul.mubr.bf16.vlgmr.msra.gmra.mrb[100].mxu1 %v3674_v63  ;;  %4759 = vmatprep.subr.bf16.mxu0 %v11423_v61 }
 0x5a2   :  { %4040 = vmatpush1.bf16.msra.mxu1 %v11292_v62  ;;  %4071 = vmatprep.mubr.bf16.mxu1 %v12053_v36  ;;  %v11424_v62 = vld [vmem:[#allocation3 + $0x6e0] ss:$8 sps:$4 sm:$0xff]  }
 0x5a3   :  { %4041 = vmatprep.subr.bf16.mxu1 %v11300_v58  ;;  %v11429_v58 = vld [vmem:[#allocation3 + $0x6f4] ss:$8 sps:$4 sm:$0xff]  }
 0x5a4   :  { %4760 = vmatpush1.bf16.msra.mxu0 %v11421_v0  ;;  %v11427_v0 = vld [vmem:[#allocation3 + $0x6f0] ss:$8 sps:$4 sm:$0xff]  }
 0x5a6   :  { %4042 = vmatpush1.bf16.msra.mxu1 %v11298_v1 }
 0x5a7   :  { %4043 = vmatprep.subr.bf16.mxu1 %v11306_v2  ;;  %4778 = vmatmul.mubr.bf16.vlgmr.msra.gmra.mrb[40].mxu0 %v12683_v45  ;;  %v11432_v2 = vld [vmem:[#allocation3 + $0x784] ss:$8 sps:$4 sm:$0xff]  }
 0x5aa   :  { %4044 = vmatpush1.bf16.msra.mxu1 %v11304_v3 }
 0x5ab   :  { %4045 = vmatprep.subr.bf16.mxu1 %v11312_v4 }
 0x5ae   :  { %4046 = vmatpush1.bf16.msra.mxu1 %v11310_v5 }
 0x5af   :  { %4047 = vmatprep.subr.bf16.mxu1 %v11318_v7  ;;  %v11430_v7 = vld [vmem:[#allocation3 + $0x780] ss:$8 sps:$4 sm:$0xff]  }
 0x5b2   :  { %4048 = vmatpush1.bf16.msra.mxu1 %v11316_v8  ;;  %v4523_v8 = vrot.slane %v12685_v49, 4  ;;  %v11447_v49 = vld [vmem:[#allocation3 + $0x7d4] ss:$8 sps:$4 sm:$0xff]  }
 0x5b3   :  { %4049 = vmatprep.subr.bf16.mxu1 %v11324_v12  ;;  %v11435_v12 = vld [vmem:[#allocation3 + $0x794] ss:$8 sps:$4 sm:$0xff]  }
 0x5b6   :  { %4050 = vmatpush1.bf16.msra.mxu1 %v11322_v6  ;;  %v11433_v6 = vld [vmem:[#allocation3 + $0x790] ss:$8 sps:$4 sm:$0xff]  }
 0x5b7   :  { %4051 = vmatprep.subr.bf16.mxu1 %v11330_v9  ;;  %v11438_v9 = vld [vmem:[#allocation3 + $0x7a4] ss:$8 sps:$4 sm:$0xff]  }
 0x5ba   :  { %4052 = vmatpush1.bf16.msra.mxu1 %v11328_v10  ;;  %v11436_v10 = vld [vmem:[#allocation3 + $0x7a0] ss:$8 sps:$4 sm:$0xff]  }
 0x5bb   :  { %4053 = vmatprep.subr.bf16.mxu1 %v11336_v13  ;;  %v11441_v13 = vld [vmem:[#allocation3 + $0x7b4] ss:$8 sps:$4 sm:$0xff]  }
 0x5be   :  { %4054 = vmatpush1.bf16.msra.mxu1 %v11334_v15  ;;  %v11439_v15 = vld [vmem:[#allocation3 + $0x7b0] ss:$8 sps:$4 sm:$0xff]  }
 0x5bf   :  { %4322 = vmatprep.subr.bf16.mxu1 %v11342_v16  ;;  %v11444_v16 = vld [vmem:[#allocation3 + $0x7c4] ss:$8 sps:$4 sm:$0xff]  }
 0x5c1   :  { %4072 = vmatmul.mubr.bf16.vlgmr.msra.gmra.mrb[104].mxu1 %v3957_v20  ;;  %v11445_v20 = vld [vmem:[#allocation3 + $0x7d0] ss:$8 sps:$4 sm:$0xff]  }
 0x5c2   :  { %4323 = vmatpush1.bf16.msra.mxu1 %v11340_v19  ;;  %4354 = vmatprep.mubr.bf16.mxu1 %v12053_v36  ;;  %v11442_v19 = vld [vmem:[#allocation3 + $0x7c0] ss:$8 sps:$4 sm:$0xff]  }
 0x5c3   :  { %4324 = vmatprep.subr.bf16.mxu1 %v11348_v21  ;;  %v11450_v21 = vld [vmem:[#allocation3 + $0x7e4] ss:$8 sps:$4 sm:$0xff]  }
 0x5c6   :  { %4325 = vmatpush1.bf16.msra.mxu1 %v11346_v23 }
 0x5c7   :  { %4326 = vmatprep.subr.bf16.mxu1 %v11354_v31 }
 0x5ca   :  { %4327 = vmatpush1.bf16.msra.mxu1 %v11352_v33 }
 0x5cb   :  { %4328 = vmatprep.subr.bf16.mxu1 %v11360_v39 }
 0x5ce   :  { %4329 = vmatpush1.bf16.msra.mxu1 %v11358_v41 }
 0x5cf   :  { %4330 = vmatprep.subr.bf16.mxu1 %v11366_v47  ;;  %v11448_v47 = vld [vmem:[#allocation3 + $0x7e0] ss:$8 sps:$4 sm:$0xff]  }
 0x5d2   :  { %4331 = vmatpush1.bf16.msra.mxu1 %v11364_v14 }
 0x5d3   :  { %4332 = vmatprep.subr.bf16.mxu1 %v11372_v32  ;;  %v11453_v32 = vld [vmem:[#allocation3 + $0x7f4] ss:$8 sps:$4 sm:$0xff]  }
 0x5d4   :  { %v2822_v24 = vpop.f32.mrb[80].mxu1 }
 0x5d5   :  { %v2824_v22 = vpop.f32.mrb[81].mxu1 }
 0x5d6   :  { %4333 = vmatpush1.bf16.msra.mxu1 %v11370_v17  ;;  %v2826_v25 = vpop.f32.mrb[82].mxu1  ;;  %v11451_v17 = vld [vmem:[#allocation3 + $0x7f0] ss:$8 sps:$4 sm:$0xff]  }
 0x5d7   :  { %v2827_v30 = vpop.f32.mrb[83].mxu1  ;;  %4334 = vmatprep.subr.bf16.mxu1 %v11378_v18 }
 0x5da   :  { %4335 = vmatpush1.bf16.msra.mxu1 %v11376_v29  ;;  %v12700_v35 = vpop.f32.mrb[20].mxu0  ;;  %v4806_v29 = vrot.slane %v12683_v45, 4 }
 0x5db   :  { %4336 = vmatprep.subr.bf16.mxu1 %v11384_v34  ;;  %v12702_v38 = vpop.f32.mrb[21].mxu0 }
 0x5dc   :  { %v3368_v40 = vpop.f32.mrb[22].mxu0 }
 0x5dd   :  { %v3369_v42 = vpop.f32.mrb[23].mxu0 }
 0x5de   :  { %4337 = vmatpush1.bf16.msra.mxu1 %v11382_v11 }
 0x5df   :  { %4605 = vmatprep.subr.bf16.mxu1 %v11390_v37 }
 0x5e1   :  { %4355 = vmatmul.mubr.bf16.vlgmr.msra.gmra.mrb[108].mxu1 %v4240_v44 }
 0x5e2   :  { %4606 = vmatpush1.bf16.msra.mxu1 %v11388_v43  ;;  %4637 = vmatprep.mubr.bf16.mxu1 %v12053_v36 }
 0x5e3   :  { %4607 = vmatprep.subr.bf16.mxu1 %v11396_v46 }
 0x5e6   :  { %4608 = vmatpush1.bf16.msra.mxu1 %v11394_v48 }
 0x5e7   :  { %4609 = vmatprep.subr.bf16.mxu1 %v11402_v50 }
 0x5ea   :  { %4610 = vmatpush1.bf16.msra.mxu1 %v11400_v28 }
 0x5eb   :  { %4611 = vmatprep.subr.bf16.mxu1 %v11408_v51 }
 0x5ee   :  { %4612 = vmatpush1.bf16.msra.mxu1 %v11406_v52 }
 0x5ef   :  { %4613 = vmatprep.subr.bf16.mxu1 %v11414_v53 }
 0x5f2   :  { %4614 = vmatpush1.bf16.msra.mxu1 %v11412_v54 }
 0x5f3   :  { %4615 = vmatprep.subr.bf16.mxu1 %v11420_v26 }
 0x5f4   :  { %v2943_v56 = vpop.f32.mrb[84].mxu1 }
 0x5f5   :  { %v2944_v57 = vadd.f32 %v2943_v56, %v2822_v24  ;;  %v2945_v59 = vpop.f32.mrb[85].mxu1 }
 0x5f6   :  { %v2946_v60 = vadd.f32 %v2945_v59, %v2824_v22  ;;  %v2947_v61 = vpop.f32.mrb[86].mxu1  ;;  %4616 = vmatpush1.bf16.msra.mxu1 %v11418_v27 }
 0x5f7   :  { %v2948_v63 = vpop.f32.mrb[87].mxu1  ;;  %4617 = vmatprep.subr.bf16.mxu1 %v11426_v55 }
 0x5fa   :  { %4618 = vmatpush1.bf16.msra.mxu1 %v11424_v62  ;;  %v12706_v1 = vpop.f32.mrb[24].mxu0 }
 0x5fb   :  { %4619 = vmatprep.subr.bf16.mxu1 %v11429_v58  ;;  %v12708_v3 = vpop.f32.mrb[25].mxu0 }
 0x5fc   :  { %v3651_v4 = vpop.f32.mrb[26].mxu0 }
 0x5fd   :  { %v3652_v5 = vpop.f32.mrb[27].mxu0 }
 0x5fe   :  { %4620 = vmatpush1.bf16.msra.mxu1 %v11427_v0  ;;  %v11454_v5 = vld [vmem:[#allocation6 + $0x200] ss:$16 sps:$4 sm:$0xff]  }
 0x5ff   :  { %4888 = vmatprep.subr.bf16.mxu1 %v11432_v2 }
 0x601   :  { %4638 = vmatmul.mubr.bf16.vlgmr.msra.gmra.mrb[112].mxu1 %v4523_v8  ;;  %v11462_v8 = vld [vmem:[#allocation6 + $0x224] ss:$16 sps:$4 sm:$0xff]  }
 0x602   :  { %4889 = vmatpush1.bf16.msra.mxu1 %v11430_v7  ;;  %4920 = vmatprep.mubr.bf16.mxu1 %v12053_v36  ;;  %v11456_v7 = vld [vmem:[#allocation6 + $0x204] ss:$16 sps:$4 sm:$0xff]  }
 0x603   :  { %4890 = vmatprep.subr.bf16.mxu1 %v11435_v12  ;;  %5477 = vmatprep.subr.bf16.mxu0 %v11456_v7  ;;  %v11460_v12 = vld [vmem:[#allocation6 + $0x220] ss:$16 sps:$4 sm:$0xff]  }
 0x604   :  { %5478 = vmatpush1.bf16.msra.mxu0 %v11454_v5 }
 0x605   :  { %5479 = vmatprep.subr.bf16.mxu0 %v11462_v8 }
 0x606   :  { %4891 = vmatpush1.bf16.msra.mxu1 %v11433_v6  ;;  %v11468_v6 = vld [vmem:[#allocation6 + $0x244] ss:$16 sps:$4 sm:$0xff]  }
 0x607   :  { %4892 = vmatprep.subr.bf16.mxu1 %v11438_v9  ;;  %v11466_v9 = vld [vmem:[#allocation6 + $0x240] ss:$16 sps:$4 sm:$0xff]  }
 0x608   :  { %5480 = vmatpush1.bf16.msra.mxu0 %v11460_v12 }
 0x609   :  { %5481 = vmatprep.subr.bf16.mxu0 %v11468_v6 }
 0x60a   :  { %4893 = vmatpush1.bf16.msra.mxu1 %v11436_v10  ;;  %v11474_v10 = vld [vmem:[#allocation6 + $0x264] ss:$16 sps:$4 sm:$0xff]  }
 0x60b   :  { %4894 = vmatprep.subr.bf16.mxu1 %v11441_v13  ;;  %v11472_v13 = vld [vmem:[#allocation6 + $0x260] ss:$16 sps:$4 sm:$0xff]  }
 0x60c   :  { %5482 = vmatpush1.bf16.msra.mxu0 %v11466_v9 }
 0x60d   :  { %5483 = vmatprep.subr.bf16.mxu0 %v11474_v10 }
 0x60e   :  { %4895 = vmatpush1.bf16.msra.mxu1 %v11439_v15  ;;  %v11480_v15 = vld [vmem:[#allocation6 + $0x284] ss:$16 sps:$4 sm:$0xff]  }
 0x60f   :  { %4896 = vmatprep.subr.bf16.mxu1 %v11444_v16 }
 0x610   :  { %5484 = vmatpush1.bf16.msra.mxu0 %v11472_v13 }
 0x611   :  { %5485 = vmatprep.subr.bf16.mxu0 %v11480_v15 }
 0x612   :  { %4897 = vmatpush1.bf16.msra.mxu1 %v11442_v19  ;;  %v11478_v19 = vld [vmem:[#allocation6 + $0x280] ss:$16 sps:$4 sm:$0xff]  }
 0x613   :  { %4898 = vmatprep.subr.bf16.mxu1 %v11447_v49 }
 0x614   :  { %v3081_v23 = vpop.f32.mrb[88].mxu1  ;;  %5486 = vmatpush1.bf16.msra.mxu0 %v11478_v19 }
 0x615   :  { %v3088_v31 = vadd.f32 %v3081_v23, %v2944_v57  ;;  %v3083_v33 = vpop.f32.mrb[89].mxu1 }
 0x616   :  { %v3089_v39 = vadd.f32 %v3083_v33, %v2946_v60  ;;  %v3085_v41 = vpop.f32.mrb[90].mxu1  ;;  %4899 = vmatpush1.bf16.msra.mxu1 %v11445_v20 }
 0x617   :  { %v3086_v14 = vpop.f32.mrb[91].mxu1  ;;  %4900 = vmatprep.subr.bf16.mxu1 %v11450_v21 }
 0x618   :  { %v11492_v14 = vld [vmem:[#allocation6 + $0x2c4] ss:$16 sps:$4 sm:$0xff]  }
 0x61a   :  { %4901 = vmatpush1.bf16.msra.mxu1 %v11448_v47  ;;  %v3930_v18 = vpop.f32.mrb[28].mxu0  ;;  %v11484_v47 = vld [vmem:[#allocation6 + $0x2a0] ss:$16 sps:$4 sm:$0xff]  }
 0x61b   :  { %4902 = vmatprep.subr.bf16.mxu1 %v11453_v32  ;;  %v3932_v24 = vpop.f32.mrb[29].mxu0  ;;  %v11490_v32 = vld [vmem:[#allocation6 + $0x2c0] ss:$16 sps:$4 sm:$0xff]  }
 0x61c   :  { %v3934_v22 = vpop.f32.mrb[30].mxu0 }
 0x61d   :  { %v3935_v25 = vpop.f32.mrb[31].mxu0  ;;  %v11502_v22 = vld [vmem:[#allocation6 + $0x300] ss:$16 sps:$4 sm:$0xff]  }
 0x61e   :  { %4903 = vmatpush1.bf16.msra.mxu1 %v11451_v17  ;;  %v11498_v17 = vld [vmem:[#allocation6 + $0x2e4] ss:$16 sps:$4 sm:$0xff]  }
 0x61f   :  { %v11510_v25 = vld [vmem:[#allocation6 + $0x324] ss:$16 sps:$4 sm:$0xff]  }
 0x621   :  { %4921 = vmatmul.mubr.bf16.vlgmr.msra.gmra.mrb[116].mxu1 %v4806_v29  ;;  %v11508_v29 = vld [vmem:[#allocation6 + $0x320] ss:$16 sps:$4 sm:$0xff]  }
 0x622   :  { %5011 = vmatprep.mubr.bf16.mxu1 %v12053_v36 }
 0x634   :  { %v3224_v30 = vpop.f32.mrb[92].mxu1 }
 0x635   :  { %v3231_v34 = vadd.f32 %v3224_v30, %v3088_v31  ;;  %v3226_v11 = vpop.f32.mrb[93].mxu1  ;;  %v11486_v31 = vld [vmem:[#allocation6 + $0x2a4] ss:$16 sps:$4 sm:$0xff]  }
 0x636   :  { %v3232_v37 = vadd.f32 %v3226_v11, %v3089_v39  ;;  %v3228_v40 = vpop.f32.mrb[94].mxu1  ;;  %5487 = vmatprep.subr.bf16.mxu0 %v11486_v31  ;;  %v11516_v30 = vld [vmem:[#allocation6 + $0x344] ss:$16 sps:$4 sm:$0xff]  }
 0x637   :  { %v3371_v42 = vadd.f32 %v12700_v35, %v3231_v34  ;;  %v3229_v43 = vpop.f32.mrb[95].mxu1  ;;  %5488 = vmatpush1.bf16.msra.mxu0 %v11484_v47  ;;  %v11514_v34 = vld [vmem:[#allocation6 + $0x340] ss:$16 sps:$4 sm:$0xff]   ;;  %v11522_v11 = vld [vmem:[#allocation6 + $0x364] ss:$16 sps:$4 sm:$0xff]  }
 0x638   :  { %v3372_v44 = vadd.f32 %v12702_v38, %v3232_v37  ;;  %5489 = vmatprep.subr.bf16.mxu0 %v11492_v14  ;;  %v11520_v37 = vld [vmem:[#allocation6 + $0x360] ss:$16 sps:$4 sm:$0xff]   ;;  %v11528_v40 = vld [vmem:[#allocation6 + $0x384] ss:$16 sps:$4 sm:$0xff]   ;;  %v11457_v47 = vld [vmem:[#allocation6 + $0x208] ss:$16 sps:$4 sm:$0xff]  }
 0x639   :  { %v11526_v43 = vld [vmem:[#allocation6 + $0x380] ss:$16 sps:$4 sm:$0xff]   ;;  %v11465_v14 = vld [vmem:[#allocation6 + $0x22c] ss:$16 sps:$4 sm:$0xff]  }
 0x63a   :  { %v4213_v46 = vpop.f32.mrb[32].mxu0 }
 0x63b   :  { %v4215_v48 = vpop.f32.mrb[33].mxu0  ;;  %5490 = vmatpush1.bf16.msra.mxu0 %v11490_v32  ;;  %v11463_v32 = vld [vmem:[#allocation6 + $0x228] ss:$16 sps:$4 sm:$0xff]  }
 0x63c   :  { %v4217_v50 = vpop.f32.mrb[34].mxu0  ;;  %5491 = vmatprep.subr.bf16.mxu0 %v11498_v17  ;;  %v11471_v17 = vld [vmem:[#allocation6 + $0x24c] ss:$16 sps:$4 sm:$0xff]  }
 0x63d   :  { %v4218_v28 = vpop.f32.mrb[35].mxu0 }
 0x63e   :  { %v11534_v28 = vld [vmem:[#allocation6 + $0x3a4] ss:$16 sps:$4 sm:$0xff]  }
 0x654   :  { %v3507_v51 = vpop.f32.mrb[96].mxu1 }
 0x655   :  { %v3514_v52 = vadd.f32 %v3507_v51, %v3371_v42  ;;  %v3509_v45 = vpop.f32.mrb[97].mxu1 }
 0x656   :  { %v3515_v53 = vadd.f32 %v3509_v45, %v3372_v44  ;;  %v3511_v54 = vpop.f32.mrb[98].mxu1 }
 0x657   :  { %v3512_v36 = vpop.f32.mrb[99].mxu1  ;;  %v3654_v26 = vadd.f32 %v12706_v1, %v3514_v52  ;;  %v11540_v54 = vld [vmem:[#allocation6 + $0x3c4] ss:$16 sps:$4 sm:$0xff]  }
 0x658   :  { %v3655_v27 = vadd.f32 %v12708_v3, %v3515_v53  ;;  %v11532_v53 = vld [vmem:[#allocation6 + $0x3a0] ss:$16 sps:$4 sm:$0xff]  }
 0x659   :  { %v11538_v36 = vld [vmem:[#allocation6 + $0x3c0] ss:$16 sps:$4 sm:$0xff]  }
 0x65a   :  { %v12718_v55 = vpop.f32.mrb[36].mxu0 }
 0x65b   :  { %v12720_v35 = vpop.f32.mrb[37].mxu0 }
 0x65c   :  { %v4500_v56 = vpop.f32.mrb[38].mxu0 }
 0x65d   :  { %v4501_v38 = vpop.f32.mrb[39].mxu0 }
 0x674   :  { %v3790_v57 = vpop.f32.mrb[100].mxu1 }
 0x675   :  { %v3797_v59 = vadd.f32 %v3790_v57, %v3654_v26  ;;  %v3792_v60 = vpop.f32.mrb[101].mxu1 }
 0x676   :  { %v3798_v61 = vadd.f32 %v3792_v60, %v3655_v27  ;;  %v3794_v62 = vpop.f32.mrb[102].mxu1  ;;  %v4934_v60 = vlaneseq }
 0x677   :  { %v3937_v63 = vadd.f32 %v3930_v18, %v3797_v59  ;;  %v3795_v58 = vpop.f32.mrb[103].mxu1  ;;  %v11496_v18 = vld [vmem:[#allocation6 + $0x2e0] ss:$16 sps:$4 sm:$0xff]  }
 0x678   :  { %v3938_v0 = vadd.f32 %v3932_v24, %v3798_v61  ;;  %v11504_v24 = vld [vmem:[#allocation6 + $0x304] ss:$16 sps:$4 sm:$0xff]   ;;  %5492 = vmatpush1.bf16.msra.mxu0 %v11496_v18  ;;  %v12730_v61 = vshrl.u32 %v4934_v60, 7  ;;  %v11469_v18 = vld [vmem:[#allocation6 + $0x248] ss:$16 sps:$4 sm:$0xff]  }
 0x679   :  { %5493 = vmatprep.subr.bf16.mxu0 %v11504_v24  ;;  %v11477_v24 = vld [vmem:[#allocation6 + $0x26c] ss:$16 sps:$4 sm:$0xff]  }
 0x67a   :  { %v12722_v2 = vpop.f32.mrb[40].mxu0  ;;  %v12733_v62 = vsub.s32 0, %v12730_v61  ;;  %v12737_v58 = vsub.s32 1, %v12730_v61 }
 0x67b   :  { %v12724_v4 = vpop.f32.mrb[41].mxu0 }
 0x67c   :  { %v4783_v1 = vpop.f32.mrb[42].mxu0  ;;  %5494 = vmatpush1.bf16.msra.mxu0 %v11502_v22  ;;  %v11475_v22 = vld [vmem:[#allocation6 + $0x268] ss:$16 sps:$4 sm:$0xff]  }
 0x67d   :  { %v4784_v3 = vpop.f32.mrb[43].mxu0  ;;  %5495 = vmatprep.subr.bf16.mxu0 %v11510_v25  ;;  %v11483_v25 = vld [vmem:[#allocation6 + $0x28c] ss:$16 sps:$4 sm:$0xff]  }
 0x680   :  { %5496 = vmatpush1.bf16.msra.mxu0 %v11508_v29  ;;  %v11481_v29 = vld [vmem:[#allocation6 + $0x288] ss:$16 sps:$4 sm:$0xff]  }
 0x681   :  { %5497 = vmatprep.subr.bf16.mxu0 %v11516_v30  ;;  %v11489_v30 = vld [vmem:[#allocation6 + $0x2ac] ss:$16 sps:$4 sm:$0xff]  }
 0x684   :  { %5498 = vmatpush1.bf16.msra.mxu0 %v11514_v34  ;;  %v11487_v34 = vld [vmem:[#allocation6 + $0x2a8] ss:$16 sps:$4 sm:$0xff]  }
 0x685   :  { %5499 = vmatprep.subr.bf16.mxu0 %v11522_v11  ;;  %v11495_v11 = vld [vmem:[#allocation6 + $0x2cc] ss:$16 sps:$4 sm:$0xff]  }
 0x688   :  { %5500 = vmatpush1.bf16.msra.mxu0 %v11520_v37  ;;  %v11493_v37 = vld [vmem:[#allocation6 + $0x2c8] ss:$16 sps:$4 sm:$0xff]  }
 0x689   :  { %5501 = vmatprep.subr.bf16.mxu0 %v11528_v40  ;;  %v11501_v40 = vld [vmem:[#allocation6 + $0x2ec] ss:$16 sps:$4 sm:$0xff]  }
 0x68c   :  { %5502 = vmatpush1.bf16.msra.mxu0 %v11526_v43  ;;  %v11507_v43 = vld [vmem:[#allocation6 + $0x30c] ss:$16 sps:$4 sm:$0xff]  }
 0x68d   :  { %5503 = vmatprep.subr.bf16.mxu0 %v11534_v28  ;;  %v11517_v28 = vld [vmem:[#allocation6 + $0x348] ss:$16 sps:$4 sm:$0xff]  }
 0x690   :  { %5504 = vmatpush1.bf16.msra.mxu0 %v11532_v53  ;;  %v11529_v53 = vld [vmem:[#allocation6 + $0x388] ss:$16 sps:$4 sm:$0xff]  }
 0x691   :  { %5505 = vmatprep.subr.bf16.mxu0 %v11540_v54  ;;  %v11537_v54 = vld [vmem:[#allocation6 + $0x3ac] ss:$16 sps:$4 sm:$0xff]  }
 0x694   :  { %v4073_v16 = vpop.f32.mrb[104].mxu1  ;;  %5506 = vmatpush1.bf16.msra.mxu0 %v11538_v36  ;;  %v11535_v36 = vld [vmem:[#allocation6 + $0x3a8] ss:$16 sps:$4 sm:$0xff]  }
 0x695   :  { %v4080_v49 = vadd.f32 %v4073_v16, %v3937_v63  ;;  %v4075_v20 = vpop.f32.mrb[105].mxu1  ;;  %v4932_v63 = vld [vmem:[%s12122_s24] sm:$0x3]  ;;  %s13085_s24 = sld [smem:[#allocation22_spill]] }
 0x696   :  { %v4081_v21 = vadd.f32 %v4075_v20, %v3938_v0  ;;  %v4077_v23 = vpop.f32.mrb[106].mxu1  ;;  %v4931_v0 = vld [vmem:[%s12127_s30] sm:$0x3]  ;;  %v4937_v1 = vrot.slane %v4932_v63, %v12733_v62  ;;  %v4941_v5 = vrot.slane %v4932_v63, %v12737_v58  ;;  %s13086_s30 = sld [smem:[#allocation19_spill]] }
 0x697   :  { %v4078_v33 = vpop.f32.mrb[107].mxu1  ;;  %v4220_v39 = vadd.f32 %v4213_v46, %v4080_v49  ;;  %v4954_v12 = vrot.slane %v4931_v0, %v12737_v58 }
 0x698   :  { %v4221_v41 = vadd.f32 %v4215_v48, %v4081_v21  ;;  %v11459_v33 = vld [vmem:[#allocation6 + $0x20c] ss:$16 sps:$4 sm:$0xff]  }
 0x6b4   :  { %v4356_v42 = vpop.f32.mrb[108].mxu1 }
 0x6b5   :  { %v4363_v44 = vadd.f32 %v4356_v42, %v4220_v39  ;;  %v4358_v46 = vpop.f32.mrb[109].mxu1  ;;  %v11499_v42 = vld [vmem:[#allocation6 + $0x2e8] ss:$16 sps:$4 sm:$0xff]  }
 0x6b6   :  { %v4364_v48 = vadd.f32 %v4358_v46, %v4221_v41  ;;  %v4360_v50 = vpop.f32.mrb[110].mxu1  ;;  %v4965_v41 = vld [vmem:[%s12132_s6] sm:$0xf]  ;;  %s13087_s6 = sld [smem:[#allocation24_spill]] }
 0x6b7   :  { %v4503_v51 = vadd.f32 %v12718_v55, %v4363_v44  ;;  %v4361_v52 = vpop.f32.mrb[111].mxu1  ;;  %v11505_v44 = vld [vmem:[#allocation6 + $0x308] ss:$16 sps:$4 sm:$0xff]   ;;  %v11513_v46 = vld [vmem:[#allocation6 + $0x32c] ss:$16 sps:$4 sm:$0xff]  }
 0x6b8   :  { %v4504_v45 = vadd.f32 %v12720_v35, %v4364_v48  ;;  %v11511_v48 = vld [vmem:[#allocation6 + $0x328] ss:$16 sps:$4 sm:$0xff]   ;;  %v11519_v50 = vld [vmem:[#allocation6 + $0x34c] ss:$16 sps:$4 sm:$0xff]  }
 0x6b9   :  { %v11523_v52 = vld [vmem:[#allocation6 + $0x368] ss:$16 sps:$4 sm:$0xff]  }
 0x6d4   :  { %v4639_v26 = vpop.f32.mrb[112].mxu1 }
 0x6d5   :  { %v4646_v27 = vadd.f32 %v4639_v26, %v4503_v51  ;;  %v4641_v56 = vpop.f32.mrb[113].mxu1  ;;  %v11525_v51 = vld [vmem:[#allocation6 + $0x36c] ss:$16 sps:$4 sm:$0xff]  }
 0x6d6   :  { %v4647_v38 = vadd.f32 %v4641_v56, %v4504_v45  ;;  %v4643_v57 = vpop.f32.mrb[114].mxu1  ;;  %v11531_v45 = vld [vmem:[#allocation6 + $0x38c] ss:$16 sps:$4 sm:$0xff]   ;;  %v11546_v56 = vld [vmem:[#allocation6 + $0x3e4] ss:$16 sps:$4 sm:$0xff]  }
 0x6d7   :  { %v4644_v59 = vpop.f32.mrb[115].mxu1  ;;  %v4786_v55 = vadd.f32 %v12722_v2, %v4646_v27  ;;  %v4950_v2 = vrot.slane %v4931_v0, %v12733_v62  ;;  %v11543_v26 = vld [vmem:[#allocation6 + $0x3cc] ss:$16 sps:$4 sm:$0xff]   ;;  %v11541_v27 = vld [vmem:[#allocation6 + $0x3c8] ss:$16 sps:$4 sm:$0xff]   ;;  %5507 = vmatprep.subr.bf16.mxu0 %v11546_v56 }
 0x6d8   :  { %v4787_v35 = vadd.f32 %v12724_v4, %v4647_v38  ;;  %v11549_v38 = vld [vmem:[#allocation6 + $0x3ec] ss:$16 sps:$4 sm:$0xff]   ;;  %v11544_v57 = vld [vmem:[#allocation6 + $0x3e0] ss:$16 sps:$4 sm:$0xff]   ;;  %v11547_v59 = vld [vmem:[#allocation6 + $0x3e8] ss:$16 sps:$4 sm:$0xff]  }
 0x6d9   :  { %5508 = vmatpush1.bf16.msra.mxu0 %v11544_v57  ;;  %v11627_v56 = vld [vmem:[#allocation6 + $0x18c] ss:$16 sps:$4 sm:$0xff]   ;;  %v11625_v57 = vld [vmem:[#allocation6 + $0x188] ss:$16 sps:$4 sm:$0xff]  }
 0x6f4   :  { %v4922_v3 = vpop.f32.mrb[116].mxu1 }
 0x6f5   :  { %v4929_v7 = vadd.f32 %v4922_v3, %v4786_v55  ;;  %v4924_v4 = vpop.f32.mrb[117].mxu1  ;;  %v11552_v55 = vld [vmem:[#allocation6 + $0x4] ss:$16 sps:$4 sm:$0xff]  }
 0x6f6   :  { %v4930_v8 = vadd.f32 %v4924_v4, %v4787_v35  ;;  %v4926_v6 = vpop.f32.mrb[118].mxu1  ;;  %v11555_v35 = vld [vmem:[#allocation6 + $0xc] ss:$16 sps:$4 sm:$0xff]   ;;  %5879 = vmatprep.subr.bf16.mxu0 %v11552_v55  ;;  %v11553_v4 = vld [vmem:[#allocation6 + $0x8] ss:$16 sps:$4 sm:$0xff]  }
 0x6f7   :  { %v4944_v9 = vadd.f32 %v4937_v1, %v4929_v7  ;;  %v4927_v10 = vpop.f32.mrb[119].mxu1  ;;  %v11561_v6 = vld [vmem:[#allocation6 + $0x2c] ss:$16 sps:$4 sm:$0xff]  }
 0x6f8   :  { %v4945_v13 = vadd.f32 %v4941_v5, %v4930_v8  ;;  %v11559_v10 = vld [vmem:[#allocation6 + $0x28] ss:$16 sps:$4 sm:$0xff]   ;;  %v11633_v55 = vld [vmem:[#allocation6 + $0x1ac] ss:$16 sps:$4 sm:$0xff]  }
 0x6f9   :  { %v4957_v15 = vmul.f32 %v4950_v2, %v4944_v9  ;;  %v11550_v2 = vld [vmem:[#allocation6] ss:$16 sps:$4 sm:$0xff]  }
 0x6fa   :  { %v4958_v16 = vmul.f32 %v4954_v12, %v4945_v13  ;;  %v11558_v12 = vld [vmem:[#allocation6 + $0x24] ss:$16 sps:$4 sm:$0xff]   ;;  %v11556_v9 = vld [vmem:[#allocation6 + $0x20] ss:$16 sps:$4 sm:$0xff]  }
 0x6fb   :  { %v4961_v19 = vmul.f32 0.2, %v4957_v15  ;;  %vm4959_vm8 = vcmp.ge.f32.partialorder %v4957_v15, 0.0  ;;  %v11564_v13 = vld [vmem:[#allocation6 + $0x44] ss:$16 sps:$4 sm:$0xff]  }
 0x6fc   :  { %vm4960_vm9 = vcmp.ge.f32.partialorder %v4958_v16, 0.0  ;;  %v4962_v49 = vmul.f32 0.2, %v4958_v16 }
 0x6fd   :  { %v4963_v20 = vsel %vm4959_vm8, %v4957_v15, %v4961_v19  ;;  %v11567_v15 = vld [vmem:[#allocation6 + $0x4c] ss:$16 sps:$4 sm:$0xff]   ;;  %v11565_v19 = vld [vmem:[#allocation6 + $0x48] ss:$16 sps:$4 sm:$0xff]  }
 0x6fe   :  { %v4964_v21 = vsel %vm4960_vm9, %v4958_v16, %v4962_v49  ;;  %v4966_v23 = vpack.c.bf16 %v4963_v20, %v4963_v20  ;;  %v11562_v16 = vld [vmem:[#allocation6 + $0x40] ss:$16 sps:$4 sm:$0xff]   ;;  %v11570_v49 = vld [vmem:[#allocation6 + $0x64] ss:$16 sps:$4 sm:$0xff]   ;;  %v11573_v20 = vld [vmem:[#allocation6 + $0x6c] ss:$16 sps:$4 sm:$0xff]  }
 0x6ff   :  { %v4967_v31 = vpack.c.bf16 %v4964_v21, %v4964_v21  ;;  %v11568_v21 = vld [vmem:[#allocation6 + $0x60] ss:$16 sps:$4 sm:$0xff]  }
 0x700   :  { %v4974_v39 = vsel %vm4972_vm10, %v4966_v23, 0  ;;  %v11571_v23 = vld [vmem:[#allocation6 + $0x68] ss:$16 sps:$4 sm:$0xff]  }
 0x701   :  { %9583 = vmatprep.subr.msk.bf16.mxu1 %vm4972_vm10, %v4967_v31  ;;  %v11576_v31 = vld [vmem:[#allocation6 + $0x84] ss:$16 sps:$4 sm:$0xff]   ;;  %vm7729_vm10 = vcmask 123904  }
 0x702   :  { %4980 = vmatpush1.bf16.msra.mxu1 %v4974_v39  ;;  %v11574_v39 = vld [vmem:[#allocation6 + $0x80] ss:$16 sps:$4 sm:$0xff]  }
 0x703   :  { %5518 = vmatprep.subr.bf16.mxu1 %v11459_v33  ;;  %v11579_v33 = vld [vmem:[#allocation6 + $0x8c] ss:$16 sps:$4 sm:$0xff]  }
 0x705   :  { %9584 = vmatmul.mubr.msk.bf16.vlgmr.msra.gmra.mrb[120].mxu1 %vm4968_vm11, %v4965_v41  ;;  %v11577_v41 = vld [vmem:[#allocation6 + $0x88] ss:$16 sps:$4 sm:$0xff]  }
 0x706   :  { %5519 = vmatpush1.bf16.msra.mxu1 %v11457_v47  ;;  %v11582_v47 = vld [vmem:[#allocation6 + $0xa4] ss:$16 sps:$4 sm:$0xff]  }
 0x707   :  { %5520 = vmatprep.subr.bf16.mxu1 %v11465_v14  ;;  %v11585_v14 = vld [vmem:[#allocation6 + $0xac] ss:$16 sps:$4 sm:$0xff]  }
 0x70a   :  { %5521 = vmatpush1.bf16.msra.mxu1 %v11463_v32  ;;  %v11580_v32 = vld [vmem:[#allocation6 + $0xa0] ss:$16 sps:$4 sm:$0xff]  }
 0x70b   :  { %5522 = vmatprep.subr.bf16.mxu1 %v11471_v17  ;;  %v11583_v17 = vld [vmem:[#allocation6 + $0xa8] ss:$16 sps:$4 sm:$0xff]  }
 0x70e   :  { %5523 = vmatpush1.bf16.msra.mxu1 %v11469_v18  ;;  %v11588_v18 = vld [vmem:[#allocation6 + $0xc4] ss:$16 sps:$4 sm:$0xff]  }
 0x70f   :  { %5524 = vmatprep.subr.bf16.mxu1 %v11477_v24  ;;  %v11591_v24 = vld [vmem:[#allocation6 + $0xcc] ss:$16 sps:$4 sm:$0xff]  }
 0x712   :  { %5525 = vmatpush1.bf16.msra.mxu1 %v11475_v22  ;;  %v11586_v22 = vld [vmem:[#allocation6 + $0xc0] ss:$16 sps:$4 sm:$0xff]  }
 0x713   :  { %5526 = vmatprep.subr.bf16.mxu1 %v11483_v25  ;;  %v11589_v25 = vld [vmem:[#allocation6 + $0xc8] ss:$16 sps:$4 sm:$0xff]  }
 0x716   :  { %5527 = vmatpush1.bf16.msra.mxu1 %v11481_v29  ;;  %v11594_v29 = vld [vmem:[#allocation6 + $0xe4] ss:$16 sps:$4 sm:$0xff]  }
 0x717   :  { %5528 = vmatprep.subr.bf16.mxu1 %v11489_v30  ;;  %v11597_v30 = vld [vmem:[#allocation6 + $0xec] ss:$16 sps:$4 sm:$0xff]  }
 0x71a   :  { %5529 = vmatpush1.bf16.msra.mxu1 %v11487_v34  ;;  %v11592_v34 = vld [vmem:[#allocation6 + $0xe0] ss:$16 sps:$4 sm:$0xff]  }
 0x71b   :  { %5530 = vmatprep.subr.bf16.mxu1 %v11495_v11  ;;  %v11595_v11 = vld [vmem:[#allocation6 + $0xe8] ss:$16 sps:$4 sm:$0xff]  }
 0x71e   :  { %5531 = vmatpush1.bf16.msra.mxu1 %v11493_v37  ;;  %v11600_v37 = vld [vmem:[#allocation6 + $0x104] ss:$16 sps:$4 sm:$0xff]  }
 0x71f   :  { %5532 = vmatprep.subr.bf16.mxu1 %v11501_v40  ;;  %v11603_v40 = vld [vmem:[#allocation6 + $0x10c] ss:$16 sps:$4 sm:$0xff]  }
 0x722   :  { %5533 = vmatpush1.bf16.msra.mxu1 %v11499_v42  ;;  %v11598_v42 = vld [vmem:[#allocation6 + $0x100] ss:$16 sps:$4 sm:$0xff]  }
 0x723   :  { %5534 = vmatprep.subr.bf16.mxu1 %v11507_v43  ;;  %v11601_v43 = vld [vmem:[#allocation6 + $0x108] ss:$16 sps:$4 sm:$0xff]  }
 0x726   :  { %5535 = vmatpush1.bf16.msra.mxu1 %v11505_v44  ;;  %v11606_v44 = vld [vmem:[#allocation6 + $0x124] ss:$16 sps:$4 sm:$0xff]  }
 0x727   :  { %5536 = vmatprep.subr.bf16.mxu1 %v11513_v46  ;;  %v11609_v46 = vld [vmem:[#allocation6 + $0x12c] ss:$16 sps:$4 sm:$0xff]  }
 0x72a   :  { %5537 = vmatpush1.bf16.msra.mxu1 %v11511_v48  ;;  %v11604_v48 = vld [vmem:[#allocation6 + $0x120] ss:$16 sps:$4 sm:$0xff]  }
 0x72b   :  { %5538 = vmatprep.subr.bf16.mxu1 %v11519_v50  ;;  %v11607_v50 = vld [vmem:[#allocation6 + $0x128] ss:$16 sps:$4 sm:$0xff]  }
 0x72e   :  { %5539 = vmatpush1.bf16.msra.mxu1 %v11517_v28  ;;  %v11612_v28 = vld [vmem:[#allocation6 + $0x144] ss:$16 sps:$4 sm:$0xff]  }
 0x72f   :  { %5540 = vmatprep.subr.bf16.mxu1 %v11525_v51  ;;  %v11615_v51 = vld [vmem:[#allocation6 + $0x14c] ss:$16 sps:$4 sm:$0xff]  }
 0x732   :  { %5541 = vmatpush1.bf16.msra.mxu1 %v11523_v52  ;;  %v11610_v52 = vld [vmem:[#allocation6 + $0x140] ss:$16 sps:$4 sm:$0xff]  }
 0x733   :  { %5542 = vmatprep.subr.bf16.mxu1 %v11531_v45  ;;  %v11613_v45 = vld [vmem:[#allocation6 + $0x148] ss:$16 sps:$4 sm:$0xff]  }
 0x736   :  { %5543 = vmatpush1.bf16.msra.mxu1 %v11529_v53  ;;  %v11618_v53 = vld [vmem:[#allocation6 + $0x164] ss:$16 sps:$4 sm:$0xff]  }
 0x737   :  { %5544 = vmatprep.subr.bf16.mxu1 %v11537_v54  ;;  %v11621_v54 = vld [vmem:[#allocation6 + $0x16c] ss:$16 sps:$4 sm:$0xff]  }
 0x73a   :  { %5545 = vmatpush1.bf16.msra.mxu1 %v11535_v36  ;;  %v11616_v36 = vld [vmem:[#allocation6 + $0x160] ss:$16 sps:$4 sm:$0xff]  }
 0x73b   :  { %5546 = vmatprep.subr.bf16.mxu1 %v11543_v26  ;;  %v11619_v26 = vld [vmem:[#allocation6 + $0x168] ss:$16 sps:$4 sm:$0xff]  }
 0x73e   :  { %5547 = vmatpush1.bf16.msra.mxu1 %v11541_v27  ;;  %v11624_v27 = vld [vmem:[#allocation6 + $0x184] ss:$16 sps:$4 sm:$0xff]  }
 0x73f   :  { %5548 = vmatprep.subr.bf16.mxu1 %v11549_v38  ;;  %v11622_v38 = vld [vmem:[#allocation6 + $0x180] ss:$16 sps:$4 sm:$0xff]  }
 0x742   :  { %5549 = vmatpush1.bf16.msra.mxu1 %v11547_v59  ;;  %v11630_v59 = vld [vmem:[#allocation6 + $0x1a4] ss:$16 sps:$4 sm:$0xff]  }
 0x743   :  { %5920 = vmatprep.subr.bf16.mxu1 %v11555_v35  ;;  %v11628_v35 = vld [vmem:[#allocation6 + $0x1a0] ss:$16 sps:$4 sm:$0xff]  }
 0x7d8   :  { %v5013_v60 = vpop.f32.mrb[120].mxu1 }
 0x7d9   :  { %v12745_v63 = vpack.c.bf16 %v5013_v60, %v5013_v60  ;;  %v5015_v0 = vpop.f32.mrb[121].mxu1  ;;  %v11631_v60 = vld [vmem:[#allocation6 + $0x1a8] ss:$16 sps:$4 sm:$0xff]  }
 0x7da   :  { %v12747_v1 = vpack.c.bf16 %v5015_v0, %v5015_v0  ;;  %v5017_v3 = vpop.f32.mrb[122].mxu1  ;;  %v11636_v0 = vld [vmem:[#allocation6 + $0x1c4] ss:$16 sps:$4 sm:$0xff]  }
 0x7db   :  { %v5018_v5 = vpop.f32.mrb[123].mxu1  ;;  %v5153_v8 = vrot.slane %v12745_v63, 1  ;;  %v11639_v3 = vld [vmem:[#allocation6 + $0x1cc] ss:$16 sps:$4 sm:$0xff]  }
 0x7dc   :  { %v5154_v7 = vrot.slane %v12747_v1, 1  ;;  %v11634_v5 = vld [vmem:[#allocation6 + $0x1c0] ss:$16 sps:$4 sm:$0xff]  }
 0x7de   :  { %5509 = vmatprep.mubr.bf16.mxu0 %v5154_v7  ;;  %5550 = vmatprep.mubr.bf16.mxu1 %v5154_v7  ;;  %v11637_v7 = vld [vmem:[#allocation6 + $0x1c8] ss:$16 sps:$4 sm:$0xff]  }
 0x7df   :  { %5510 = vmatmul.mubr.bf16.vlgmr.msra.gmra.mrb[44].mxu0 %v5153_v8  ;;  %5551 = vmatmul.mubr.bf16.vlgmr.msra.gmra.mrb[124].mxu1 %v5153_v8  ;;  %v11640_v8 = vld [vmem:[#allocation6 + $0x1e0] ss:$16 sps:$4 sm:$0xff]  }
 0x7e0   :  { %5880 = vmatpush1.bf16.msra.mxu0 %v11550_v2  ;;  %5921 = vmatpush1.bf16.msra.mxu1 %v11553_v4  ;;  %v11642_v2 = vld [vmem:[#allocation6 + $0x1e4] ss:$16 sps:$4 sm:$0xff]   ;;  %v11645_v4 = vld [vmem:[#allocation6 + $0x1ec] ss:$16 sps:$4 sm:$0xff]  }
 0x7e1   :  { %5911 = vmatprep.mubr.bf16.mxu0 %v12747_v1  ;;  %5952 = vmatprep.mubr.bf16.mxu1 %v12747_v1 }
 0x7e2   :  { %5881 = vmatprep.subr.bf16.mxu0 %v11558_v12  ;;  %5922 = vmatprep.subr.bf16.mxu1 %v11561_v6  ;;  %v11643_v12 = vld [vmem:[#allocation6 + $0x1e8] ss:$16 sps:$4 sm:$0xff]   ;;  %v11648_v6 = vld [vmem:[#allocation6 + $0x404] ss:$16 sps:$4 sm:$0xff]  }
 0x7e4   :  { %5882 = vmatpush1.bf16.msra.mxu0 %v11556_v9  ;;  %5923 = vmatpush1.bf16.msra.mxu1 %v11559_v10  ;;  %v11651_v9 = vld [vmem:[#allocation6 + $0x40c] ss:$16 sps:$4 sm:$0xff]   ;;  %v11646_v10 = vld [vmem:[#allocation6 + $0x400] ss:$16 sps:$4 sm:$0xff]  }
 0x7e5   :  { %5883 = vmatprep.subr.bf16.mxu0 %v11564_v13  ;;  %5924 = vmatprep.subr.bf16.mxu1 %v11567_v15  ;;  %v11649_v13 = vld [vmem:[#allocation6 + $0x408] ss:$16 sps:$4 sm:$0xff]   ;;  %v6027_v15 = vrot.slane %v12747_v1, 2 }
 0x7e8   :  { %5884 = vmatpush1.bf16.msra.mxu0 %v11562_v16  ;;  %5925 = vmatpush1.bf16.msra.mxu1 %v11565_v19  ;;  %v11654_v16 = vld [vmem:[#allocation6 + $0x424] ss:$16 sps:$4 sm:$0xff]   ;;  %v11657_v19 = vld [vmem:[#allocation6 + $0x42c] ss:$16 sps:$4 sm:$0xff]  }
 0x7e9   :  { %5885 = vmatprep.subr.bf16.mxu0 %v11570_v49  ;;  %5926 = vmatprep.subr.bf16.mxu1 %v11573_v20  ;;  %v11652_v49 = vld [vmem:[#allocation6 + $0x420] ss:$16 sps:$4 sm:$0xff]   ;;  %v11655_v20 = vld [vmem:[#allocation6 + $0x428] ss:$16 sps:$4 sm:$0xff]  }
 0x7ec   :  { %5886 = vmatpush1.bf16.msra.mxu0 %v11568_v21  ;;  %5927 = vmatpush1.bf16.msra.mxu1 %v11571_v23  ;;  %v11660_v21 = vld [vmem:[#allocation6 + $0x444] ss:$16 sps:$4 sm:$0xff]   ;;  %v11663_v23 = vld [vmem:[#allocation6 + $0x44c] ss:$16 sps:$4 sm:$0xff]  }
 0x7ed   :  { %5887 = vmatprep.subr.bf16.mxu0 %v11576_v31  ;;  %5928 = vmatprep.subr.bf16.mxu1 %v11579_v33  ;;  %v11658_v31 = vld [vmem:[#allocation6 + $0x440] ss:$16 sps:$4 sm:$0xff]   ;;  %v11661_v33 = vld [vmem:[#allocation6 + $0x448] ss:$16 sps:$4 sm:$0xff]  }
 0x7f0   :  { %5888 = vmatpush1.bf16.msra.mxu0 %v11574_v39  ;;  %5929 = vmatpush1.bf16.msra.mxu1 %v11577_v41  ;;  %v11666_v39 = vld [vmem:[#allocation6 + $0x464] ss:$16 sps:$4 sm:$0xff]   ;;  %v11669_v41 = vld [vmem:[#allocation6 + $0x46c] ss:$16 sps:$4 sm:$0xff]  }
 0x7f1   :  { %5889 = vmatprep.subr.bf16.mxu0 %v11582_v47  ;;  %5930 = vmatprep.subr.bf16.mxu1 %v11585_v14  ;;  %v11664_v47 = vld [vmem:[#allocation6 + $0x460] ss:$16 sps:$4 sm:$0xff]   ;;  %v11667_v14 = vld [vmem:[#allocation6 + $0x468] ss:$16 sps:$4 sm:$0xff]  }
 0x7f4   :  { %5890 = vmatpush1.bf16.msra.mxu0 %v11580_v32  ;;  %5931 = vmatpush1.bf16.msra.mxu1 %v11583_v17  ;;  %v11672_v32 = vld [vmem:[#allocation6 + $0x484] ss:$16 sps:$4 sm:$0xff]   ;;  %v11675_v17 = vld [vmem:[#allocation6 + $0x48c] ss:$16 sps:$4 sm:$0xff]  }
 0x7f5   :  { %5891 = vmatprep.subr.bf16.mxu0 %v11588_v18  ;;  %5932 = vmatprep.subr.bf16.mxu1 %v11591_v24  ;;  %v11670_v18 = vld [vmem:[#allocation6 + $0x480] ss:$16 sps:$4 sm:$0xff]   ;;  %v11673_v24 = vld [vmem:[#allocation6 + $0x488] ss:$16 sps:$4 sm:$0xff]  }
 0x7f8   :  { %5892 = vmatpush1.bf16.msra.mxu0 %v11586_v22  ;;  %5933 = vmatpush1.bf16.msra.mxu1 %v11589_v25  ;;  %v11678_v22 = vld [vmem:[#allocation6 + $0x4a4] ss:$16 sps:$4 sm:$0xff]   ;;  %v11681_v25 = vld [vmem:[#allocation6 + $0x4ac] ss:$16 sps:$4 sm:$0xff]  }
 0x7f9   :  { %5893 = vmatprep.subr.bf16.mxu0 %v11594_v29  ;;  %5934 = vmatprep.subr.bf16.mxu1 %v11597_v30  ;;  %v11676_v29 = vld [vmem:[#allocation6 + $0x4a0] ss:$16 sps:$4 sm:$0xff]   ;;  %v11679_v30 = vld [vmem:[#allocation6 + $0x4a8] ss:$16 sps:$4 sm:$0xff]  }
 0x7fc   :  { %5894 = vmatpush1.bf16.msra.mxu0 %v11592_v34  ;;  %5935 = vmatpush1.bf16.msra.mxu1 %v11595_v11  ;;  %v11684_v34 = vld [vmem:[#allocation6 + $0x4c4] ss:$16 sps:$4 sm:$0xff]   ;;  %v11687_v11 = vld [vmem:[#allocation6 + $0x4cc] ss:$16 sps:$4 sm:$0xff]  }
 0x7fd   :  { %5895 = vmatprep.subr.bf16.mxu0 %v11600_v37  ;;  %5936 = vmatprep.subr.bf16.mxu1 %v11603_v40  ;;  %v11682_v37 = vld [vmem:[#allocation6 + $0x4c0] ss:$16 sps:$4 sm:$0xff]   ;;  %v11685_v40 = vld [vmem:[#allocation6 + $0x4c8] ss:$16 sps:$4 sm:$0xff]  }
 0x800   :  { %5896 = vmatpush1.bf16.msra.mxu0 %v11598_v42  ;;  %5937 = vmatpush1.bf16.msra.mxu1 %v11601_v43  ;;  %v11690_v42 = vld [vmem:[#allocation6 + $0x4e4] ss:$16 sps:$4 sm:$0xff]   ;;  %v11693_v43 = vld [vmem:[#allocation6 + $0x4ec] ss:$16 sps:$4 sm:$0xff]  }
 0x801   :  { %5897 = vmatprep.subr.bf16.mxu0 %v11606_v44  ;;  %5938 = vmatprep.subr.bf16.mxu1 %v11609_v46  ;;  %v11688_v44 = vld [vmem:[#allocation6 + $0x4e0] ss:$16 sps:$4 sm:$0xff]   ;;  %v11691_v46 = vld [vmem:[#allocation6 + $0x4e8] ss:$16 sps:$4 sm:$0xff]  }
 0x804   :  { %5898 = vmatpush1.bf16.msra.mxu0 %v11604_v48  ;;  %5939 = vmatpush1.bf16.msra.mxu1 %v11607_v50  ;;  %v11696_v48 = vld [vmem:[#allocation6 + $0x504] ss:$16 sps:$4 sm:$0xff]   ;;  %v11699_v50 = vld [vmem:[#allocation6 + $0x50c] ss:$16 sps:$4 sm:$0xff]  }
 0x805   :  { %5899 = vmatprep.subr.bf16.mxu0 %v11612_v28  ;;  %5940 = vmatprep.subr.bf16.mxu1 %v11615_v51  ;;  %v11694_v28 = vld [vmem:[#allocation6 + $0x500] ss:$16 sps:$4 sm:$0xff]   ;;  %v11697_v51 = vld [vmem:[#allocation6 + $0x508] ss:$16 sps:$4 sm:$0xff]  }
 0x808   :  { %5900 = vmatpush1.bf16.msra.mxu0 %v11610_v52  ;;  %5941 = vmatpush1.bf16.msra.mxu1 %v11613_v45  ;;  %v11702_v52 = vld [vmem:[#allocation6 + $0x524] ss:$16 sps:$4 sm:$0xff]   ;;  %v11705_v45 = vld [vmem:[#allocation6 + $0x52c] ss:$16 sps:$4 sm:$0xff]  }
 0x809   :  { %5901 = vmatprep.subr.bf16.mxu0 %v11618_v53  ;;  %5942 = vmatprep.subr.bf16.mxu1 %v11621_v54  ;;  %v11700_v53 = vld [vmem:[#allocation6 + $0x520] ss:$16 sps:$4 sm:$0xff]   ;;  %v11703_v54 = vld [vmem:[#allocation6 + $0x528] ss:$16 sps:$4 sm:$0xff]  }
 0x80c   :  { %5902 = vmatpush1.bf16.msra.mxu0 %v11616_v36  ;;  %5943 = vmatpush1.bf16.msra.mxu1 %v11619_v26  ;;  %v11708_v36 = vld [vmem:[#allocation6 + $0x544] ss:$16 sps:$4 sm:$0xff]   ;;  %v11711_v26 = vld [vmem:[#allocation6 + $0x54c] ss:$16 sps:$4 sm:$0xff]  }
 0x80d   :  { %5903 = vmatprep.subr.bf16.mxu0 %v11624_v27  ;;  %5944 = vmatprep.subr.bf16.mxu1 %v11627_v56  ;;  %v11706_v27 = vld [vmem:[#allocation6 + $0x540] ss:$16 sps:$4 sm:$0xff]   ;;  %v11709_v56 = vld [vmem:[#allocation6 + $0x548] ss:$16 sps:$4 sm:$0xff]  }
 0x810   :  { %5904 = vmatpush1.bf16.msra.mxu0 %v11622_v38  ;;  %5945 = vmatpush1.bf16.msra.mxu1 %v11625_v57  ;;  %v11714_v38 = vld [vmem:[#allocation6 + $0x564] ss:$16 sps:$4 sm:$0xff]   ;;  %v11717_v57 = vld [vmem:[#allocation6 + $0x56c] ss:$16 sps:$4 sm:$0xff]  }
 0x811   :  { %5905 = vmatprep.subr.bf16.mxu0 %v11630_v59  ;;  %5946 = vmatprep.subr.bf16.mxu1 %v11633_v55  ;;  %v11712_v59 = vld [vmem:[#allocation6 + $0x560] ss:$16 sps:$4 sm:$0xff]   ;;  %v11715_v55 = vld [vmem:[#allocation6 + $0x568] ss:$16 sps:$4 sm:$0xff]  }
 0x814   :  { %5906 = vmatpush1.bf16.msra.mxu0 %v11628_v35  ;;  %5947 = vmatpush1.bf16.msra.mxu1 %v11631_v60  ;;  %v11720_v35 = vld [vmem:[#allocation6 + $0x584] ss:$16 sps:$4 sm:$0xff]   ;;  %v11723_v60 = vld [vmem:[#allocation6 + $0x58c] ss:$16 sps:$4 sm:$0xff]  }
 0x815   :  { %5907 = vmatprep.subr.bf16.mxu0 %v11636_v0  ;;  %5948 = vmatprep.subr.bf16.mxu1 %v11639_v3  ;;  %v11718_v0 = vld [vmem:[#allocation6 + $0x580] ss:$16 sps:$4 sm:$0xff]   ;;  %v11721_v3 = vld [vmem:[#allocation6 + $0x588] ss:$16 sps:$4 sm:$0xff]  }
 0x818   :  { %5908 = vmatpush1.bf16.msra.mxu0 %v11634_v5  ;;  %5949 = vmatpush1.bf16.msra.mxu1 %v11637_v7  ;;  %v11726_v5 = vld [vmem:[#allocation6 + $0x5a4] ss:$16 sps:$4 sm:$0xff]   ;;  %v11729_v7 = vld [vmem:[#allocation6 + $0x5ac] ss:$16 sps:$4 sm:$0xff]  }
 0x819   :  { %5909 = vmatprep.subr.bf16.mxu0 %v11642_v2  ;;  %5950 = vmatprep.subr.bf16.mxu1 %v11645_v4  ;;  %v11724_v2 = vld [vmem:[#allocation6 + $0x5a0] ss:$16 sps:$4 sm:$0xff]   ;;  %v11727_v4 = vld [vmem:[#allocation6 + $0x5a8] ss:$16 sps:$4 sm:$0xff]  }
 0x81c   :  { %5910 = vmatpush1.bf16.msra.mxu0 %v11640_v8  ;;  %5951 = vmatpush1.bf16.msra.mxu1 %v11643_v12  ;;  %v11732_v8 = vld [vmem:[#allocation6 + $0x5c4] ss:$16 sps:$4 sm:$0xff]   ;;  %v11735_v12 = vld [vmem:[#allocation6 + $0x5cc] ss:$16 sps:$4 sm:$0xff]  }
 0x81d   :  { %6350 = vmatprep.subr.bf16.mxu0 %v11648_v6  ;;  %6391 = vmatprep.subr.bf16.mxu1 %v11651_v9  ;;  %v11730_v6 = vld [vmem:[#allocation6 + $0x5c0] ss:$16 sps:$4 sm:$0xff]   ;;  %v11733_v9 = vld [vmem:[#allocation6 + $0x5c8] ss:$16 sps:$4 sm:$0xff]  }
 0x81f   :  { %5912 = vmatmul.mubr.bf16.vlgmr.msra.gmra.mrb[48].mxu0 %v12745_v63  ;;  %5953 = vmatmul.mubr.bf16.vlgmr.msra.gmra.mrb[128].mxu1 %v12745_v63 }
 0x820   :  { %6351 = vmatpush1.bf16.msra.mxu0 %v11646_v10  ;;  %6382 = vmatprep.mubr.bf16.mxu0 %v6027_v15  ;;  %v11738_v10 = vld [vmem:[#allocation6 + $0x5e4] ss:$16 sps:$4 sm:$0xff]  }
 0x821   :  { %6392 = vmatpush1.bf16.msra.mxu1 %v11649_v13  ;;  %6423 = vmatprep.mubr.bf16.mxu1 %v6027_v15  ;;  %v11741_v13 = vld [vmem:[#allocation6 + $0x5ec] ss:$16 sps:$4 sm:$0xff]   ;;  %v11736_v15 = vld [vmem:[#allocation6 + $0x5e0] ss:$16 sps:$4 sm:$0xff]  }
 0x822   :  { %6352 = vmatprep.subr.bf16.mxu0 %v11654_v16  ;;  %6393 = vmatprep.subr.bf16.mxu1 %v11657_v19  ;;  %v11739_v16 = vld [vmem:[#allocation6 + $0x5e8] ss:$16 sps:$4 sm:$0xff]   ;;  %v11744_v19 = vld [vmem:[#allocation6 + $0x604] ss:$16 sps:$4 sm:$0xff]  }
 0x824   :  { %6353 = vmatpush1.bf16.msra.mxu0 %v11652_v49  ;;  %v11747_v49 = vld [vmem:[#allocation6 + $0x60c] ss:$16 sps:$4 sm:$0xff]  }
 0x825   :  { %6394 = vmatpush1.bf16.msra.mxu1 %v11655_v20  ;;  %6354 = vmatprep.subr.bf16.mxu0 %v11660_v21  ;;  %v11742_v20 = vld [vmem:[#allocation6 + $0x600] ss:$16 sps:$4 sm:$0xff]   ;;  %v6026_v21 = vrot.slane %v12745_v63, 2 }
 0x826   :  { %6395 = vmatprep.subr.bf16.mxu1 %v11663_v23  ;;  %v11745_v23 = vld [vmem:[#allocation6 + $0x608] ss:$16 sps:$4 sm:$0xff]  }
 0x828   :  { %6355 = vmatpush1.bf16.msra.mxu0 %v11658_v31  ;;  %v11750_v31 = vld [vmem:[#allocation6 + $0x624] ss:$16 sps:$4 sm:$0xff]  }
 0x829   :  { %6396 = vmatpush1.bf16.msra.mxu1 %v11661_v33  ;;  %6356 = vmatprep.subr.bf16.mxu0 %v11666_v39  ;;  %v6502_v33 = vrot.slane %v12747_v1, 3  ;;  %v11753_v39 = vld [vmem:[#allocation6 + $0x62c] ss:$16 sps:$4 sm:$0xff]  }
 0x82a   :  { %6397 = vmatprep.subr.bf16.mxu1 %v11669_v41  ;;  %v11748_v41 = vld [vmem:[#allocation6 + $0x620] ss:$16 sps:$4 sm:$0xff]   ;;  %v11765_v1 = vld [vmem:[#allocation6 + $0x66c] ss:$16 sps:$4 sm:$0xff]  }
 0x82c   :  { %6357 = vmatpush1.bf16.msra.mxu0 %v11664_v47  ;;  %v11751_v47 = vld [vmem:[#allocation6 + $0x628] ss:$16 sps:$4 sm:$0xff]  }
 0x82d   :  { %6398 = vmatpush1.bf16.msra.mxu1 %v11667_v14  ;;  %6358 = vmatprep.subr.bf16.mxu0 %v11672_v32  ;;  %v11756_v14 = vld [vmem:[#allocation6 + $0x644] ss:$16 sps:$4 sm:$0xff]   ;;  %v11759_v32 = vld [vmem:[#allocation6 + $0x64c] ss:$16 sps:$4 sm:$0xff]  }
 0x82e   :  { %6399 = vmatprep.subr.bf16.mxu1 %v11675_v17  ;;  %v11754_v17 = vld [vmem:[#allocation6 + $0x640] ss:$16 sps:$4 sm:$0xff]  }
 0x830   :  { %6359 = vmatpush1.bf16.msra.mxu0 %v11670_v18  ;;  %v11757_v18 = vld [vmem:[#allocation6 + $0x648] ss:$16 sps:$4 sm:$0xff]  }
 0x831   :  { %6400 = vmatpush1.bf16.msra.mxu1 %v11673_v24  ;;  %6360 = vmatprep.subr.bf16.mxu0 %v11678_v22  ;;  %v11762_v24 = vld [vmem:[#allocation6 + $0x664] ss:$16 sps:$4 sm:$0xff]   ;;  %v11760_v22 = vld [vmem:[#allocation6 + $0x660] ss:$16 sps:$4 sm:$0xff]  }
 0x832   :  { %6401 = vmatprep.subr.bf16.mxu1 %v11681_v25  ;;  %v11763_v25 = vld [vmem:[#allocation6 + $0x668] ss:$16 sps:$4 sm:$0xff]  }
 0x834   :  { %6361 = vmatpush1.bf16.msra.mxu0 %v11676_v29  ;;  %v11768_v29 = vld [vmem:[#allocation6 + $0x684] ss:$16 sps:$4 sm:$0xff]  }
 0x835   :  { %6402 = vmatpush1.bf16.msra.mxu1 %v11679_v30  ;;  %6362 = vmatprep.subr.bf16.mxu0 %v11684_v34  ;;  %v11771_v30 = vld [vmem:[#allocation6 + $0x68c] ss:$16 sps:$4 sm:$0xff]   ;;  %v11766_v34 = vld [vmem:[#allocation6 + $0x680] ss:$16 sps:$4 sm:$0xff]  }
 0x836   :  { %6403 = vmatprep.subr.bf16.mxu1 %v11687_v11  ;;  %v11769_v11 = vld [vmem:[#allocation6 + $0x688] ss:$16 sps:$4 sm:$0xff]  }
 0x838   :  { %6363 = vmatpush1.bf16.msra.mxu0 %v11682_v37  ;;  %v11774_v37 = vld [vmem:[#allocation6 + $0x6a4] ss:$16 sps:$4 sm:$0xff]  }
 0x839   :  { %6404 = vmatpush1.bf16.msra.mxu1 %v11685_v40  ;;  %6364 = vmatprep.subr.bf16.mxu0 %v11690_v42  ;;  %v11777_v40 = vld [vmem:[#allocation6 + $0x6ac] ss:$16 sps:$4 sm:$0xff]   ;;  %v11772_v42 = vld [vmem:[#allocation6 + $0x6a0] ss:$16 sps:$4 sm:$0xff]  }
 0x83a   :  { %6405 = vmatprep.subr.bf16.mxu1 %v11693_v43  ;;  %v11775_v43 = vld [vmem:[#allocation6 + $0x6a8] ss:$16 sps:$4 sm:$0xff]  }
 0x83c   :  { %6365 = vmatpush1.bf16.msra.mxu0 %v11688_v44  ;;  %v11780_v44 = vld [vmem:[#allocation6 + $0x6c4] ss:$16 sps:$4 sm:$0xff]  }
 0x83d   :  { %6406 = vmatpush1.bf16.msra.mxu1 %v11691_v46  ;;  %6366 = vmatprep.subr.bf16.mxu0 %v11696_v48  ;;  %v11783_v46 = vld [vmem:[#allocation6 + $0x6cc] ss:$16 sps:$4 sm:$0xff]   ;;  %v11778_v48 = vld [vmem:[#allocation6 + $0x6c0] ss:$16 sps:$4 sm:$0xff]  }
 0x83e   :  { %6407 = vmatprep.subr.bf16.mxu1 %v11699_v50  ;;  %v11781_v50 = vld [vmem:[#allocation6 + $0x6c8] ss:$16 sps:$4 sm:$0xff]  }
 0x840   :  { %6367 = vmatpush1.bf16.msra.mxu0 %v11694_v28  ;;  %v11786_v28 = vld [vmem:[#allocation6 + $0x6e4] ss:$16 sps:$4 sm:$0xff]  }
 0x841   :  { %6408 = vmatpush1.bf16.msra.mxu1 %v11697_v51  ;;  %6368 = vmatprep.subr.bf16.mxu0 %v11702_v52  ;;  %v11789_v51 = vld [vmem:[#allocation6 + $0x6ec] ss:$16 sps:$4 sm:$0xff]   ;;  %v11784_v52 = vld [vmem:[#allocation6 + $0x6e0] ss:$16 sps:$4 sm:$0xff]  }
 0x842   :  { %6409 = vmatprep.subr.bf16.mxu1 %v11705_v45  ;;  %v11787_v45 = vld [vmem:[#allocation6 + $0x6e8] ss:$16 sps:$4 sm:$0xff]  }
 0x844   :  { %6369 = vmatpush1.bf16.msra.mxu0 %v11700_v53  ;;  %v11792_v53 = vld [vmem:[#allocation6 + $0x704] ss:$16 sps:$4 sm:$0xff]  }
 0x845   :  { %6410 = vmatpush1.bf16.msra.mxu1 %v11703_v54  ;;  %6370 = vmatprep.subr.bf16.mxu0 %v11708_v36  ;;  %v11795_v54 = vld [vmem:[#allocation6 + $0x70c] ss:$16 sps:$4 sm:$0xff]   ;;  %v11790_v36 = vld [vmem:[#allocation6 + $0x700] ss:$16 sps:$4 sm:$0xff]  }
 0x846   :  { %6411 = vmatprep.subr.bf16.mxu1 %v11711_v26  ;;  %v11793_v26 = vld [vmem:[#allocation6 + $0x708] ss:$16 sps:$4 sm:$0xff]  }
 0x848   :  { %6371 = vmatpush1.bf16.msra.mxu0 %v11706_v27  ;;  %v11798_v27 = vld [vmem:[#allocation6 + $0x724] ss:$16 sps:$4 sm:$0xff]  }
 0x849   :  { %6412 = vmatpush1.bf16.msra.mxu1 %v11709_v56  ;;  %6372 = vmatprep.subr.bf16.mxu0 %v11714_v38  ;;  %v11801_v56 = vld [vmem:[#allocation6 + $0x72c] ss:$16 sps:$4 sm:$0xff]   ;;  %v11796_v38 = vld [vmem:[#allocation6 + $0x720] ss:$16 sps:$4 sm:$0xff]  }
 0x84a   :  { %6413 = vmatprep.subr.bf16.mxu1 %v11717_v57  ;;  %v11799_v57 = vld [vmem:[#allocation6 + $0x728] ss:$16 sps:$4 sm:$0xff]  }
 0x84c   :  { %6373 = vmatpush1.bf16.msra.mxu0 %v11712_v59  ;;  %v11804_v59 = vld [vmem:[#allocation6 + $0x744] ss:$16 sps:$4 sm:$0xff]  }
 0x84d   :  { %6414 = vmatpush1.bf16.msra.mxu1 %v11715_v55  ;;  %6374 = vmatprep.subr.bf16.mxu0 %v11720_v35  ;;  %v11807_v55 = vld [vmem:[#allocation6 + $0x74c] ss:$16 sps:$4 sm:$0xff]   ;;  %v11802_v35 = vld [vmem:[#allocation6 + $0x740] ss:$16 sps:$4 sm:$0xff]  }
 0x84e   :  { %6415 = vmatprep.subr.bf16.mxu1 %v11723_v60  ;;  %v11805_v60 = vld [vmem:[#allocation6 + $0x748] ss:$16 sps:$4 sm:$0xff]  }
 0x850   :  { %6375 = vmatpush1.bf16.msra.mxu0 %v11718_v0  ;;  %v11810_v0 = vld [vmem:[#allocation6 + $0x764] ss:$16 sps:$4 sm:$0xff]  }
 0x851   :  { %6416 = vmatpush1.bf16.msra.mxu1 %v11721_v3  ;;  %6376 = vmatprep.subr.bf16.mxu0 %v11726_v5  ;;  %v11813_v3 = vld [vmem:[#allocation6 + $0x76c] ss:$16 sps:$4 sm:$0xff]   ;;  %v11808_v5 = vld [vmem:[#allocation6 + $0x760] ss:$16 sps:$4 sm:$0xff]  }
 0x852   :  { %6417 = vmatprep.subr.bf16.mxu1 %v11729_v7  ;;  %v11811_v7 = vld [vmem:[#allocation6 + $0x768] ss:$16 sps:$4 sm:$0xff]  }
 0x854   :  { %6377 = vmatpush1.bf16.msra.mxu0 %v11724_v2  ;;  %v11816_v2 = vld [vmem:[#allocation6 + $0x784] ss:$16 sps:$4 sm:$0xff]  }
 0x855   :  { %6418 = vmatpush1.bf16.msra.mxu1 %v11727_v4  ;;  %6378 = vmatprep.subr.bf16.mxu0 %v11732_v8  ;;  %v11819_v4 = vld [vmem:[#allocation6 + $0x78c] ss:$16 sps:$4 sm:$0xff]   ;;  %v11814_v8 = vld [vmem:[#allocation6 + $0x780] ss:$16 sps:$4 sm:$0xff]  }
 0x856   :  { %6419 = vmatprep.subr.bf16.mxu1 %v11735_v12  ;;  %v11817_v12 = vld [vmem:[#allocation6 + $0x788] ss:$16 sps:$4 sm:$0xff]  }
 0x858   :  { %6379 = vmatpush1.bf16.msra.mxu0 %v11730_v6  ;;  %v11822_v6 = vld [vmem:[#allocation6 + $0x7a4] ss:$16 sps:$4 sm:$0xff]  }
 0x859   :  { %6420 = vmatpush1.bf16.msra.mxu1 %v11733_v9  ;;  %6380 = vmatprep.subr.bf16.mxu0 %v11738_v10  ;;  %v11825_v9 = vld [vmem:[#allocation6 + $0x7ac] ss:$16 sps:$4 sm:$0xff]   ;;  %v11820_v10 = vld [vmem:[#allocation6 + $0x7a0] ss:$16 sps:$4 sm:$0xff]  }
 0x85a   :  { %6421 = vmatprep.subr.bf16.mxu1 %v11741_v13  ;;  %v11823_v13 = vld [vmem:[#allocation6 + $0x7a8] ss:$16 sps:$4 sm:$0xff]  }
 0x85c   :  { %6381 = vmatpush1.bf16.msra.mxu0 %v11736_v15  ;;  %v11828_v15 = vld [vmem:[#allocation6 + $0x7c4] ss:$16 sps:$4 sm:$0xff]  }
 0x85d   :  { %6422 = vmatpush1.bf16.msra.mxu1 %v11739_v16  ;;  %6825 = vmatprep.subr.bf16.mxu0 %v11744_v19  ;;  %v11831_v16 = vld [vmem:[#allocation6 + $0x7cc] ss:$16 sps:$4 sm:$0xff]   ;;  %v11826_v19 = vld [vmem:[#allocation6 + $0x7c0] ss:$16 sps:$4 sm:$0xff]  }
 0x85e   :  { %6866 = vmatprep.subr.bf16.mxu1 %v11747_v49  ;;  %v11829_v49 = vld [vmem:[#allocation6 + $0x7c8] ss:$16 sps:$4 sm:$0xff]  }
 0x85f   :  { %6383 = vmatmul.mubr.bf16.vlgmr.msra.gmra.mrb[52].mxu0 %v6026_v21 }
 0x860   :  { %6424 = vmatmul.mubr.bf16.vlgmr.msra.gmra.mrb[132].mxu1 %v6026_v21  ;;  %6826 = vmatpush1.bf16.msra.mxu0 %v11742_v20  ;;  %v11834_v20 = vld [vmem:[#allocation6 + $0x7e4] ss:$16 sps:$4 sm:$0xff]   ;;  %v11837_v21 = vld [vmem:[#allocation6 + $0x7ec] ss:$16 sps:$4 sm:$0xff]  }
 0x861   :  { %6857 = vmatprep.mubr.bf16.mxu0 %v6502_v33  ;;  %6867 = vmatpush1.bf16.msra.mxu1 %v11745_v23  ;;  %v11832_v23 = vld [vmem:[#allocation6 + $0x7e0] ss:$16 sps:$4 sm:$0xff]  }
 0x862   :  { %6898 = vmatprep.mubr.bf16.mxu1 %v6502_v33  ;;  %6827 = vmatprep.subr.bf16.mxu0 %v11750_v31  ;;  %v11835_v31 = vld [vmem:[#allocation6 + $0x7e8] ss:$16 sps:$4 sm:$0xff]   ;;  %v6501_v33 = vrot.slane %v12745_v63, 3  ;;  %v11841_v63 = vld [vmem:[%s13075_s5 + $0x80] sm:$0xff]  }
 0x863   :  { %6868 = vmatprep.subr.bf16.mxu1 %v11753_v39 }
 0x864   :  { %6828 = vmatpush1.bf16.msra.mxu0 %v11748_v41 }
 0x865   :  { %6869 = vmatpush1.bf16.msra.mxu1 %v11751_v47  ;;  %6829 = vmatprep.subr.bf16.mxu0 %v11756_v14 }
 0x866   :  { %6870 = vmatprep.subr.bf16.mxu1 %v11759_v32 }
 0x868   :  { %6830 = vmatpush1.bf16.msra.mxu0 %v11754_v17 }
 0x869   :  { %6871 = vmatpush1.bf16.msra.mxu1 %v11757_v18  ;;  %6831 = vmatprep.subr.bf16.mxu0 %v11762_v24 }
 0x86a   :  { %6872 = vmatprep.subr.bf16.mxu1 %v11765_v1  ;;  %v11838_v1 = vld [vmem:[%s13075_s5 + $0x40] sm:$0xff]  }
 0x86c   :  { %6832 = vmatpush1.bf16.msra.mxu0 %v11760_v22  ;;  %v11839_v22 = vld [vmem:[%s13075_s5 + $0xc0] sm:$0xff]  }
 0x86d   :  { %6873 = vmatpush1.bf16.msra.mxu1 %v11763_v25  ;;  %6833 = vmatprep.subr.bf16.mxu0 %v11768_v29  ;;  %v11840_v25 = vld [vmem:[%s13075_s5] sm:$0xff]   ;;  %v11842_v29 = vld [vmem:[%s13075_s5 + $0x48] sm:$0xff]  }
 0x86e   :  { %6874 = vmatprep.subr.bf16.mxu1 %v11771_v30  ;;  %v11843_v30 = vld [vmem:[%s13075_s5 + $0xc8] sm:$0xff]  }
 0x870   :  { %6834 = vmatpush1.bf16.msra.mxu0 %v11766_v34  ;;  %v11844_v34 = vld [vmem:[%s13075_s5 + $0x8] sm:$0xff]  }
 0x871   :  { %6875 = vmatpush1.bf16.msra.mxu1 %v11769_v11  ;;  %6835 = vmatprep.subr.bf16.mxu0 %v11774_v37  ;;  %v11845_v11 = vld [vmem:[%s13075_s5 + $0x88] sm:$0xff]   ;;  %v11846_v37 = vld [vmem:[%s13075_s5 + $0x50] sm:$0xff]  }
 0x872   :  { %6876 = vmatprep.subr.bf16.mxu1 %v11777_v40  ;;  %v11847_v40 = vld [vmem:[%s13075_s5 + $0xd0] sm:$0xff]  }
 0x874   :  { %6836 = vmatpush1.bf16.msra.mxu0 %v11772_v42  ;;  %v11848_v42 = vld [vmem:[%s13075_s5 + $0x10] sm:$0xff]  }
 0x875   :  { %6877 = vmatpush1.bf16.msra.mxu1 %v11775_v43  ;;  %6837 = vmatprep.subr.bf16.mxu0 %v11780_v44  ;;  %v11849_v43 = vld [vmem:[%s13075_s5 + $0x90] sm:$0xff]   ;;  %v11850_v44 = vld [vmem:[%s13075_s5 + $0x58] sm:$0xff]  }
 0x876   :  { %6878 = vmatprep.subr.bf16.mxu1 %v11783_v46  ;;  %v11851_v46 = vld [vmem:[%s13075_s5 + $0xd8] sm:$0xff]  }
 0x878   :  { %6838 = vmatpush1.bf16.msra.mxu0 %v11778_v48  ;;  %v11852_v48 = vld [vmem:[%s13075_s5 + $0x18] sm:$0xff]  }
 0x879   :  { %6879 = vmatpush1.bf16.msra.mxu1 %v11781_v50  ;;  %6839 = vmatprep.subr.bf16.mxu0 %v11786_v28  ;;  %v11853_v50 = vld [vmem:[%s13075_s5 + $0x98] sm:$0xff]   ;;  %v11854_v28 = vld [vmem:[%s13075_s5 + $0x60] sm:$0xff]  }
 0x87a   :  { %6880 = vmatprep.subr.bf16.mxu1 %v11789_v51  ;;  %v11855_v51 = vld [vmem:[%s13075_s5 + $0xe0] sm:$0xff]  }
 0x87c   :  { %6840 = vmatpush1.bf16.msra.mxu0 %v11784_v52  ;;  %v11856_v52 = vld [vmem:[%s13075_s5 + $0x20] sm:$0xff]  }
 0x87d   :  { %6881 = vmatpush1.bf16.msra.mxu1 %v11787_v45  ;;  %6841 = vmatprep.subr.bf16.mxu0 %v11792_v53  ;;  %v11857_v45 = vld [vmem:[%s13075_s5 + $0xa0] sm:$0xff]  }
 0x87e   :  { %6882 = vmatprep.subr.bf16.mxu1 %v11795_v54 }
 0x880   :  { %6842 = vmatpush1.bf16.msra.mxu0 %v11790_v36 }
 0x881   :  { %6883 = vmatpush1.bf16.msra.mxu1 %v11793_v26  ;;  %6843 = vmatprep.subr.bf16.mxu0 %v11798_v27 }
 0x882   :  { %6884 = vmatprep.subr.bf16.mxu1 %v11801_v56 }
 0x884   :  { %6844 = vmatpush1.bf16.msra.mxu0 %v11796_v38 }
 0x885   :  { %6885 = vmatpush1.bf16.msra.mxu1 %v11799_v57  ;;  %6845 = vmatprep.subr.bf16.mxu0 %v11804_v59 }
 0x886   :  { %6886 = vmatprep.subr.bf16.mxu1 %v11807_v55 }
 0x888   :  { %6846 = vmatpush1.bf16.msra.mxu0 %v11802_v35  ;;  %v11858_v35 = vld [vmem:[%s13075_s5 + $0x68] sm:$0xff]  }
 0x889   :  { %6887 = vmatpush1.bf16.msra.mxu1 %v11805_v60  ;;  %6847 = vmatprep.subr.bf16.mxu0 %v11810_v0  ;;  %v11859_v60 = vld [vmem:[%s13075_s5 + $0xe8] sm:$0xff]  }
 0x88a   :  { %6888 = vmatprep.subr.bf16.mxu1 %v11813_v3 }
 0x88c   :  { %6848 = vmatpush1.bf16.msra.mxu0 %v11808_v5  ;;  %v11860_v5 = vld [vmem:[%s13075_s5 + $0x28] sm:$0xff]  }
 0x88d   :  { %6889 = vmatpush1.bf16.msra.mxu1 %v11811_v7  ;;  %6849 = vmatprep.subr.bf16.mxu0 %v11816_v2  ;;  %v11861_v7 = vld [vmem:[%s13075_s5 + $0xa8] sm:$0xff]   ;;  %v11862_v2 = vld [vmem:[%s13075_s5 + $0x70] sm:$0xff]  }
 0x88e   :  { %6890 = vmatprep.subr.bf16.mxu1 %v11819_v4  ;;  %v11863_v4 = vld [vmem:[%s13075_s5 + $0xf0] sm:$0xff]  }
 0x890   :  { %6850 = vmatpush1.bf16.msra.mxu0 %v11814_v8  ;;  %v11864_v8 = vld [vmem:[%s13075_s5 + $0x30] sm:$0xff]  }
 0x891   :  { %6891 = vmatpush1.bf16.msra.mxu1 %v11817_v12  ;;  %6851 = vmatprep.subr.bf16.mxu0 %v11822_v6  ;;  %v11865_v12 = vld [vmem:[%s13075_s5 + $0xb0] sm:$0xff]   ;;  %v11866_v6 = vld [vmem:[%s13075_s5 + $0x78] sm:$0xff]  }
 0x892   :  { %6892 = vmatprep.subr.bf16.mxu1 %v11825_v9  ;;  %v11867_v9 = vld [vmem:[%s13075_s5 + $0xf8] sm:$0xff]  }
 0x894   :  { %6852 = vmatpush1.bf16.msra.mxu0 %v11820_v10  ;;  %v11868_v10 = vld [vmem:[%s13075_s5 + $0x38] sm:$0xff]  }
 0x895   :  { %6893 = vmatpush1.bf16.msra.mxu1 %v11823_v13  ;;  %6853 = vmatprep.subr.bf16.mxu0 %v11828_v15  ;;  %v11869_v13 = vld [vmem:[%s13075_s5 + $0xb8] sm:$0xff]  }
 0x896   :  { %6894 = vmatprep.subr.bf16.mxu1 %v11831_v16 }
 0x898   :  { %6854 = vmatpush1.bf16.msra.mxu0 %v11826_v19 }
 0x899   :  { %6895 = vmatpush1.bf16.msra.mxu1 %v11829_v49  ;;  %6855 = vmatprep.subr.bf16.mxu0 %v11834_v20 }
 0x89a   :  { %6896 = vmatprep.subr.bf16.mxu1 %v11837_v21 }
 0x89c   :  { %6856 = vmatpush1.bf16.msra.mxu0 %v11832_v23 }
 0x89d   :  { %6897 = vmatpush1.bf16.msra.mxu1 %v11835_v31  ;;  %10225 = vmatprep.subr.bf16.mxu0 %v11838_v1 }
 0x89e   :  { %10247 = vmatprep.subr.bf16.mxu1 %v11839_v22 }
 0x89f   :  { %6858 = vmatmul.mubr.bf16.vlgmr.msra.gmra.mrb[56].mxu0 %v6501_v33 }
 0x8a0   :  { %6899 = vmatmul.mubr.bf16.vlgmr.msra.gmra.mrb[136].mxu1 %v6501_v33  ;;  %10226 = vmatpush3.bf16.msra.mxu0 %v11840_v25 }
 0x8a1   :  { %10248 = vmatpush3.bf16.msra.mxu1 %v11841_v63  ;;  %10227 = vmatprep.subr.bf16.mxu0 %v11842_v29 }
 0x8a2   :  { %10249 = vmatprep.subr.bf16.mxu1 %v11843_v30 }
 0x8a4   :  { %10228 = vmatpush3.bf16.msra.mxu0 %v11844_v34 }
 0x8a5   :  { %10250 = vmatpush3.bf16.msra.mxu1 %v11845_v11  ;;  %10229 = vmatprep.subr.bf16.mxu0 %v11846_v37 }
 0x8a6   :  { %10251 = vmatprep.subr.bf16.mxu1 %v11847_v40 }
 0x8a8   :  { %10230 = vmatpush3.bf16.msra.mxu0 %v11848_v42 }
 0x8a9   :  { %10252 = vmatpush3.bf16.msra.mxu1 %v11849_v43  ;;  %10231 = vmatprep.subr.bf16.mxu0 %v11850_v44 }
 0x8aa   :  { %10253 = vmatprep.subr.bf16.mxu1 %v11851_v46 }
 0x8ac   :  { %10232 = vmatpush3.bf16.msra.mxu0 %v11852_v48 }
 0x8ad   :  { %10254 = vmatpush3.bf16.msra.mxu1 %v11853_v50  ;;  %10233 = vmatprep.subr.bf16.mxu0 %v11854_v28 }
 0x8ae   :  { %10255 = vmatprep.subr.bf16.mxu1 %v11855_v51 }
 0x8b0   :  { %10234 = vmatpush3.bf16.msra.mxu0 %v11856_v52 }
 0x8b1   :  { %10256 = vmatpush3.bf16.msra.mxu1 %v11857_v45  ;;  %10235 = vmatprep.subr.bf16.mxu0 %v11858_v35 }
 0x8b2   :  { %v5511_v39 = vpop.f32.mrb[44].mxu0  ;;  %v5552_v41 = vpop.f32.mrb[124].mxu1  ;;  %10257 = vmatprep.subr.bf16.mxu1 %v11859_v60 }
 0x8b3   :  { %v5513_v47 = vpop.f32.mrb[45].mxu0  ;;  %v5554_v14 = vpop.f32.mrb[125].mxu1 }
 0x8b4   :  { %v5515_v32 = vpop.f32.mrb[46].mxu0  ;;  %v5556_v17 = vpop.f32.mrb[126].mxu1  ;;  %10236 = vmatpush3.bf16.msra.mxu0 %v11860_v5 }
 0x8b5   :  { %v5516_v18 = vpop.f32.mrb[47].mxu0  ;;  %v5557_v24 = vpop.f32.mrb[127].mxu1  ;;  %10258 = vmatpush3.bf16.msra.mxu1 %v11861_v7  ;;  %10237 = vmatprep.subr.bf16.mxu0 %v11862_v2  ;;  %v6924_v32 = vsub.s32 2, %v12730_v61  ;;  %v6928_v17 = vsub.s32 3, %v12730_v61  ;;  %v7323_v2 = vld [vmem:[%s13078_s21] sm:$0x3] }
 0x8b6   :  { %10259 = vmatprep.subr.bf16.mxu1 %v11863_v4  ;;  %v6911_v18 = vld [vmem:[%s13077_s17] sm:$0xf] }
 0x8b7   :  { %v6942_v29 = vrot.slane %v6911_v18, %v12733_v62  ;;  %v6950_v40 = vrot.slane %v6911_v18, %v6924_v32  ;;  %v6946_v43 = vrot.slane %v6911_v18, %v12737_v58  ;;  %v6954_v50 = vrot.slane %v6911_v18, %v6928_v17  ;;  %v9875_v4 = vld [vmem:[%s13079_s25] ss:$0 sm:$0xff] }
 0x8b8   :  { %10238 = vmatpush3.bf16.msra.mxu0 %v11864_v8  ;;  %v7340_v8 = vadd.f32 %v9875_v4, %v7323_v2 }
 0x8b9   :  { %10260 = vmatpush3.bf16.msra.mxu1 %v11865_v12  ;;  %10239 = vmatprep.subr.bf16.mxu0 %v11866_v6  ;;  %v9876_v12 = vld [vmem:[%s13080_s29] ss:$0 sm:$0xff] }
 0x8ba   :  { %10261 = vmatprep.subr.bf16.mxu1 %v11867_v9  ;;  %v7347_v6 = vmul.f32 %v9876_v12, %v7340_v8  ;;  %v11871_v9 = vld [vmem:[%s13081_s3] sm:$0xff]  }
 0x8bc   :  { %10240 = vmatpush3.bf16.msra.mxu0 %v11868_v10  ;;  %v7349_v10 = vmul.f32 0.9, %v7347_v6  ;;  %vm7348_vm1 = vcmp.ge.f32.partialorder %v7347_v6, 0.0 }
 0x8bd   :  { %10262 = vmatpush3.bf16.msra.mxu1 %v11869_v13  ;;  %v12054_v13 = vmov 0.0  }
 0x8be   :  { %10658 = vmatprep.subr.bf16.mxu0 %v12054_v13  ;;  %10664 = vmatprep.subr.bf16.mxu1 %v12054_v13 }
 0x8f2   :  { %v5913_v53 = vpop.f32.mrb[48].mxu0  ;;  %v5954_v54 = vpop.f32.mrb[128].mxu1 }
 0x8f3   :  { %v5914_v36 = vadd.f32 %v5913_v53, %v5511_v39  ;;  %v5955_v26 = vadd.f32 %v5954_v54, %v5552_v41  ;;  %v5915_v27 = vpop.f32.mrb[49].mxu0  ;;  %v5956_v56 = vpop.f32.mrb[129].mxu1 }
 0x8f4   :  { %v5916_v38 = vadd.f32 %v5915_v27, %v5513_v47  ;;  %v5957_v57 = vadd.f32 %v5956_v56, %v5554_v14  ;;  %v5917_v59 = vpop.f32.mrb[50].mxu0  ;;  %v5958_v55 = vpop.f32.mrb[130].mxu1  ;;  %v6912_v14 = vld [vmem:[%s13076_s13] sm:$0xf] }
 0x8f5   :  { %v5918_v0 = vpop.f32.mrb[51].mxu0  ;;  %v5959_v3 = vpop.f32.mrb[131].mxu1  ;;  %v6917_v24 = vrot.slane %v6912_v14, %v12733_v62  ;;  %v6925_v22 = vrot.slane %v6912_v14, %v6924_v32  ;;  %v6921_v25 = vrot.slane %v6912_v14, %v12737_v58  ;;  %v6929_v11 = vrot.slane %v6912_v14, %v6928_v17 }
 0x932   :  { %v6384_v15 = vpop.f32.mrb[52].mxu0 }
 0x933   :  { %v6432_v16 = vadd.f32 %v6384_v15, %v5914_v36  ;;  %v6425_v19 = vpop.f32.mrb[132].mxu1  ;;  %v6386_v49 = vpop.f32.mrb[53].mxu0  ;;  %v12805_v15 = vsel %vm7348_vm1, %v7347_v6, %v7349_v10 }
 0x934   :  { %v6434_v20 = vadd.f32 %v6425_v19, %v5955_v26  ;;  %v6433_v21 = vadd.f32 %v6386_v49, %v5916_v38  ;;  %v6427_v23 = vpop.f32.mrb[133].mxu1  ;;  %v6388_v31 = vpop.f32.mrb[54].mxu0  ;;  %v7351_v19 = vpack.c.bf16 %v12805_v15, %v12805_v15 }
 0x935   :  { %v6435_v33 = vadd.f32 %v6427_v23, %v5957_v57  ;;  %v6429_v39 = vpop.f32.mrb[134].mxu1  ;;  %v6389_v41 = vpop.f32.mrb[55].mxu0 }
 0x936   :  { %v6430_v47 = vpop.f32.mrb[135].mxu1 }
 0x972   :  { %v6859_v1 = vpop.f32.mrb[56].mxu0 }
 0x973   :  { %v6907_v63 = vadd.f32 %v6859_v1, %v6432_v16  ;;  %v6900_v30 = vpop.f32.mrb[136].mxu1  ;;  %v6861_v34 = vpop.f32.mrb[57].mxu0  ;;  %v11870_v16 = vld [vmem:[%s13082_s8] sm:$0xff]  }
 0x974   :  { %v6909_v37 = vadd.f32 %v6900_v30, %v6434_v20  ;;  %v6908_v42 = vadd.f32 %v6861_v34, %v6433_v21  ;;  %v6902_v44 = vpop.f32.mrb[137].mxu1  ;;  %v6863_v61 = vpop.f32.mrb[58].mxu0  ;;  %v9841_v21 = vld [vmem:[%s13083_s14] ss:$0 sm:$0xff]  ;;  %v11874_v34 = vld [vmem:[%s13084_s19 + $0x10] sm:$0xff]  }
 0x975   :  { %v6934_v46 = vadd.f32 %v6917_v24, %v6907_v63  ;;  %v6910_v48 = vadd.f32 %v6902_v44, %v6435_v33  ;;  %v6904_v28 = vpop.f32.mrb[138].mxu1  ;;  %v6864_v51 = vpop.f32.mrb[59].mxu0  ;;  %v11872_v24 = vld [vmem:[%s13084_s19] sm:$0xff]  }
 0x976   :  { %v6936_v52 = vadd.f32 %v6925_v22, %v6909_v37  ;;  %v6935_v45 = vadd.f32 %v6921_v25, %v6908_v42  ;;  %v6905_v53 = vpop.f32.mrb[139].mxu1  ;;  %v11873_v22 = vld [vmem:[%s13084_s19 + $0x8] sm:$0xff]   ;;  %v11876_v37 = vld [vmem:[%s13085_s24] sm:$0xff]  }
 0x977   :  { %v6959_v54 = vmul.f32 %v6942_v29, %v6934_v46  ;;  %v6937_v62 = vadd.f32 %v6929_v11, %v6910_v48  ;;  %v11875_v11 = vld [vmem:[%s13084_s19 + $0x18] sm:$0xff]  }
 0x978   :  { %v6961_v36 = vmul.f32 %v6950_v40, %v6936_v52  ;;  %v6960_v26 = vmul.f32 %v6946_v43, %v6935_v45  ;;  %v11877_v40 = vld [vmem:[%s13085_s24 + $0x8] sm:$0xff]   ;;  %v9881_v43 = vld [vmem:[%s13086_s30] ss:$0 sm:$0xff]  ;;  %v11878_v45 = vld [vmem:[%s13085_s24 + $0x10] sm:$0xff]  }
 0x979   :  { %vm6963_vm12 = vcmp.ge.f32.partialorder %v6959_v54, 0.0  ;;  %v6967_v27 = vmul.f32 0.2, %v6959_v54  ;;  %v6962_v56 = vmul.f32 %v6954_v50, %v6937_v62  ;;  %v11879_v53 = vld [vmem:[%s13085_s24 + $0x18] sm:$0xff]   ;;  %v11882_v62 = vld [vmem:[%s13087_s6 + $0x8] sm:$0xff]  }
 0x97a   :  { %vm6965_vm13 = vcmp.ge.f32.partialorder %v6961_v36, 0.0  ;;  %v6969_v38 = vmul.f32 0.2, %v6961_v36  ;;  %vm6964_vm14 = vcmp.ge.f32.partialorder %v6960_v26, 0.0  ;;  %v6968_v58 = vmul.f32 0.2, %v6960_v26 }
 0x97b   :  { %vm6966_vm15 = vcmp.ge.f32.partialorder %v6962_v56, 0.0  ;;  %v6970_v57 = vmul.f32 0.2, %v6962_v56  ;;  %v6971_v59 = vsel %vm6963_vm12, %v6959_v54, %v6967_v27  ;;  %v11881_v54 = vld [vmem:[%s13087_s6] sm:$0xff]  }
 0x97c   :  { %v6972_v55 = vsel %vm6964_vm14, %v6960_v26, %v6968_v58  ;;  %v6973_v35 = vsel %vm6965_vm13, %v6961_v36, %v6969_v38  ;;  %v6975_v5 = vpack.c.bf16 %v6971_v59, %v6971_v59  ;;  %v9882_v36 = vld [vmem:[%s13088_s12] ss:$0 sm:$0xff] }
 0x97d   :  { %v6976_v60 = vpack.c.bf16 %v6972_v55, %v6972_v55  ;;  %v6974_v0 = vsel %vm6966_vm15, %v6962_v56, %v6970_v57  ;;  %v6977_v7 = vpack.c.bf16 %v6973_v35, %v6973_v35  ;;  %v11880_v55 = vld [vmem:[%s13082_s8 + $0x8] sm:$0xff]  }
 0x97e   :  { %v6978_v3 = vpack.c.bf16 %v6974_v0, %v6974_v0  ;;  %v11884_v0 = vld [vmem:[%s13087_s6 + $0x18] sm:$0xff]  }
 0x97f   :  { %7274 = vmatprep.mubr.bf16.mxu0 %v6976_v60  ;;  %v11883_v60 = vld [vmem:[%s13087_s6 + $0x10] sm:$0xff]  }
 0x980   :  { %7314 = vmatprep.mubr.bf16.mxu1 %v6978_v3  ;;  %7275 = vmatmul.mubr.bf16.vlgmr.msra.gmra.mrb[60].mxu0 %v6975_v5  ;;  %v9888_v3 = vld [vmem:[%s13089_s28] ss:$0 sm:$0xff] }
 0x981   :  { %7315 = vmatmul.mubr.bf16.vlgmr.msra.gmra.mrb[140].mxu1 %v6977_v7  ;;  %10660 = vmatprep.mubr.msk.bf16.mxu0 %vm12055_vm3, %v12054_v13 }
 0x982   :  { %10665 = vmatpush3.bf16.msra.mxu1 %v11871_v9  ;;  %10666 = vmatprep.mubr.msk.bf16.mxu1 %vm12055_vm3, %v12054_v13 }
 0x983   :  { %10682 = vmatprep.subr.bf16.mxu1 %v12054_v13  ;;  %10659 = vmatpush3.bf16.msra.mxu0 %v11870_v16 }
 0x984   :  { %10670 = vmatprep.subr.bf16.mxu0 %v12054_v13 }
 0x989   :  { %10667 = vmatmul.mubr.msk.bf16.vlgmr.msra.gmra.mrb[144].mxu1 %vm209_vm0, %v7351_v19 }
 0x98a   :  { %10690 = vmatprep.mubr.msk.bf16.mxu1 %vm12055_vm3, %v12054_v13  ;;  %10683 = vmatpush3.bf16.msra.mxu1 %v11876_v37  ;;  %v9909_v37 = vld [vmem:[%s13086_s30 + $0x1] ss:$0 sm:$0xff] }
 0x98b   :  { %10684 = vmatprep.subr.bf16.mxu1 %v12054_v13 }
 0x98e   :  { %10685 = vmatpush3.bf16.msra.mxu1 %v11877_v40 }
 0x98f   :  { %10686 = vmatprep.subr.bf16.mxu1 %v12054_v13 }
 0x992   :  { %10687 = vmatpush3.bf16.msra.mxu1 %v11878_v45  ;;  %v11896_v45 = vld [vmem:[%s13087_s6 + $0x28] sm:$0xff]  }
 0x993   :  { %10688 = vmatprep.subr.bf16.mxu1 %v12054_v13 }
 0x996   :  { %10689 = vmatpush3.bf16.msra.mxu1 %v11879_v53  ;;  %v9919_v53 = vld [vmem:[%s13088_s12 + $0x1] ss:$0 sm:$0xff] }
 0x997   :  { %10706 = vmatprep.subr.bf16.mxu1 %v12054_v13 }
 0xa53   :  { %v10241_v49 = vpop.f32.mrb[60].mxu0 }
 0xa54   :  { %v10263_v20 = vpop.f32.mrb[140].mxu1  ;;  %v10242_v23 = vpop.f32.mrb[61].mxu0 }
 0xa55   :  { %v10243_v31 = vadd.f32 %v10242_v23, %v10241_v49  ;;  %v10264_v33 = vpop.f32.mrb[141].mxu1  ;;  %v10244_v39 = vpop.f32.mrb[62].mxu0  ;;  %v11887_v23 = vld [vmem:[%s13084_s19 + $0x28] sm:$0xff]  }
 0xa56   :  { %v10265_v41 = vadd.f32 %v10264_v33, %v10263_v20  ;;  %v10266_v47 = vpop.f32.mrb[142].mxu1  ;;  %v10245_v14 = vpop.f32.mrb[63].mxu0  ;;  %v11885_v20 = vld [vmem:[%s13081_s3 + $0x8] sm:$0xff]  }
 0xa57   :  { %v7277_v32 = vadd.f32 %v10243_v31, %v9841_v21  ;;  %v10267_v17 = vpop.f32.mrb[143].mxu1  ;;  %v11886_v21 = vld [vmem:[%s13084_s19 + $0x20] sm:$0xff]  }
 0xa58   :  { %v9894_v31 = vld [vmem:[%s13090_s2] ss:$0 sm:$0xff] }
 0xa59   :  { %v7317_v18 = vadd.f32 %v10265_v41, %v7277_v32 }
 0xa5b   :  { %v12821_v1 = vpack.c.bf16 %v7317_v18, %v7317_v18 }
 0xa5c   :  { %v7448_v25 = vpop.f32.mrb[144].mxu1 }
 0xa5d   :  { %10661 = vmatmul.mubr.msk.bf16.vlgmr.msra.gmra.mrb[64].mxu0 %vm209_vm0, %v12821_v1  ;;  %v10668_v63 = vpop.f32.mrb[145].mxu1 }
 0xa5e   :  { %10671 = vmatpush3.bf16.msra.mxu0 %v11872_v24  ;;  %10678 = vmatprep.mubr.msk.bf16.mxu0 %vm12055_vm3, %v12054_v13  ;;  %v7451_v29 = vpop.f32.mrb[146].mxu1 }
 0xa5f   :  { %10672 = vmatprep.subr.bf16.mxu0 %v12054_v13  ;;  %v10669_v30 = vpop.f32.mrb[147].mxu1  ;;  %v11888_v29 = vld [vmem:[%s13084_s19 + $0x30] sm:$0xff]  }
 0xa60   :  { %v11889_v30 = vld [vmem:[%s13084_s19 + $0x38] sm:$0xff]  }
 0xa62   :  { %10673 = vmatpush3.bf16.msra.mxu0 %v11873_v22 }
 0xa63   :  { %10674 = vmatprep.subr.bf16.mxu0 %v12054_v13 }
 0xa66   :  { %10675 = vmatpush3.bf16.msra.mxu0 %v11874_v34  ;;  %v11890_v34 = vld [vmem:[%s13085_s24 + $0x20] sm:$0xff]  }
 0xa67   :  { %10676 = vmatprep.subr.bf16.mxu0 %v12054_v13 }
 0xa6a   :  { %10677 = vmatpush3.bf16.msra.mxu0 %v11875_v11 }
 0xa6b   :  { %10694 = vmatprep.subr.bf16.mxu0 %v12054_v13 }
 0xb30   :  { %v7399_v42 = vpop.f32.mrb[64].mxu0 }
 0xb31   :  { %v7449_v44 = vadd.f32 %v7448_v25, %v7399_v42  ;;  %v10662_v61 = vpop.f32.mrb[65].mxu0 }
 0xb32   :  { %v7402_v46 = vpop.f32.mrb[66].mxu0 }
 0xb33   :  { %v7461_v48 = vadd.f32 %v9881_v43, %v7449_v44  ;;  %v10663_v50 = vpop.f32.mrb[67].mxu0 }
 0xb35   :  { %vm7462_vm4 = vcmp.ge.f32.partialorder %v7461_v48, 0.0  ;;  %v7463_v28 = vmul.f32 0.01, %v7461_v48 }
 0xb37   :  { %v7464_v51 = vsel %vm7462_vm4, %v7461_v48, %v7463_v28  ;;  %v11892_v28 = vld [vmem:[%s13085_s24 + $0x30] sm:$0xff]  }
 0xb38   :  { %v7465_v52 = vpack.c.bf16 %v7464_v51, %v7464_v51  ;;  %v11893_v51 = vld [vmem:[%s13085_s24 + $0x38] sm:$0xff]  }
 0xb3a   :  { %10679 = vmatmul.mubr.msk.bf16.vlgmr.msra.gmra.mrb[68].mxu0 %vm1027_vm2, %v7465_v52  ;;  %v11895_v52 = vld [vmem:[%s13087_s6 + $0x20] sm:$0xff]  }
 0xb3b   :  { %10702 = vmatprep.mubr.msk.bf16.mxu0 %vm12055_vm3, %v12054_v13  ;;  %10695 = vmatpush3.bf16.msra.mxu0 %v11881_v54 }
 0xb3c   :  { %10696 = vmatprep.subr.bf16.mxu0 %v12054_v13 }
 0xb3f   :  { %10697 = vmatpush3.bf16.msra.mxu0 %v11882_v62 }
 0xb40   :  { %10698 = vmatprep.subr.bf16.mxu0 %v12054_v13 }
 0xb43   :  { %10699 = vmatpush3.bf16.msra.mxu0 %v11883_v60 }
 0xb44   :  { %10700 = vmatprep.subr.bf16.mxu0 %v12054_v13 }
 0xb47   :  { %10701 = vmatpush3.bf16.msra.mxu0 %v11884_v0 }
 0xb48   :  { %10718 = vmatprep.subr.bf16.mxu0 %v12054_v13 }
 0xc0d   :  { %v7542_v26 = vpop.f32.mrb[68].mxu0 }
 0xc0e   :  { %v7543_v27 = vadd.f32 %v9882_v36, %v7542_v26  ;;  %v10680_v56 = vpop.f32.mrb[69].mxu0 }
 0xc0f   :  { %v7545_v38 = vpop.f32.mrb[70].mxu0 }
 0xc10   :  { %vm7548_vm5 = vcmp.ge.f32.partialorder %v7543_v27, 0.0  ;;  %v7549_v58 = vmul.f32 0.01, %v7543_v27  ;;  %v10681_v57 = vpop.f32.mrb[71].mxu0 }
 0xc12   :  { %v7550_v59 = vsel %vm7548_vm5, %v7543_v27, %v7549_v58  ;;  %v11894_v58 = vld [vmem:[%s13082_s8 + $0x10] sm:$0xff]  }
 0xc13   :  { %v7551_v35 = vpack.c.bf16 %v7550_v59, %v7550_v59  ;;  %v11897_v59 = vld [vmem:[%s13087_s6 + $0x30] sm:$0xff]  }
 0xc15   :  { %10691 = vmatmul.mubr.msk.bf16.vlgmr.msra.gmra.mrb[148].mxu1 %vm1027_vm2, %v7551_v35  ;;  %v9934_v35 = vld [vmem:[%s13089_s28 + $0x1] ss:$0 sm:$0xff] }
 0xc16   :  { %10707 = vmatpush3.bf16.msra.mxu1 %v11880_v55  ;;  %10708 = vmatprep.mubr.msk.bf16.mxu1 %vm12055_vm3, %v12054_v13  ;;  %v11898_v55 = vld [vmem:[%s13087_s6 + $0x38] sm:$0xff]  }
 0xc17   :  { %10712 = vmatprep.subr.bf16.mxu1 %v12054_v13 }
 0xc1d   :  { %10709 = vmatmul.mubr.msk.bf16.vlgmr.msra.gmra.mrb[152].mxu1 %vm209_vm0, %v12821_v1 }
 0xc1e   :  { %10714 = vmatprep.mubr.msk.bf16.mxu1 %vm12055_vm3, %v12054_v13  ;;  %10713 = vmatpush3.bf16.msra.mxu1 %v11885_v20 }
 0xc1f   :  { %10730 = vmatprep.subr.bf16.mxu1 %v12054_v13 }
 0xce8   :  { %v7628_v5 = vpop.f32.mrb[148].mxu1 }
 0xce9   :  { %v7629_v7 = vadd.f32 %v9888_v3, %v7628_v5  ;;  %v10692_v2 = vpop.f32.mrb[149].mxu1 }
 0xcea   :  { %v7631_v4 = vpop.f32.mrb[150].mxu1 }
 0xceb   :  { %vm7634_vm6 = vcmp.ge.f32.partialorder %v7629_v7, 0.0  ;;  %v7635_v8 = vmul.f32 0.01, %v7629_v7  ;;  %v10693_v12 = vpop.f32.mrb[151].mxu1 }
 0xced   :  { %v7636_v6 = vsel %vm7634_vm6, %v7629_v7, %v7635_v8 }
 0xcee   :  { %v7637_v9 = vpack.c.bf16 %v7636_v6, %v7636_v6 }
 0xcf0   :  { %10703 = vmatmul.mubr.msk.bf16.vlgmr.msra.gmra.mrb[72].mxu0 %vm1027_vm2, %v7637_v9  ;;  %v7781_v10 = vpop.f32.mrb[152].mxu1 }
 0xcf1   :  { %v10710_v16 = vpop.f32.mrb[153].mxu1  ;;  %10726 = vmatprep.mubr.msk.bf16.mxu0 %vm12055_vm3, %v12054_v13  ;;  %10719 = vmatpush3.bf16.msra.mxu0 %v11886_v21 }
 0xcf2   :  { %v7784_v19 = vpop.f32.mrb[154].mxu1  ;;  %10720 = vmatprep.subr.bf16.mxu0 %v12054_v13  ;;  %v9949_v16 = vld [vmem:[%s13090_s2 + $0x1] ss:$0 sm:$0xff] }
 0xcf3   :  { %v10711_v49 = vpop.f32.mrb[155].mxu1  ;;  %v11899_v19 = vld [vmem:[%s13081_s3 + $0x10] sm:$0xff]  }
 0xcf5   :  { %10721 = vmatpush3.bf16.msra.mxu0 %v11887_v23 }
 0xcf6   :  { %10722 = vmatprep.subr.bf16.mxu0 %v12054_v13 }
 0xcf9   :  { %10723 = vmatpush3.bf16.msra.mxu0 %v11888_v29 }
 0xcfa   :  { %10724 = vmatprep.subr.bf16.mxu0 %v12054_v13 }
 0xcfd   :  { %10725 = vmatpush3.bf16.msra.mxu0 %v11889_v30 }
 0xcfe   :  { %10742 = vmatprep.subr.bf16.mxu0 %v12054_v13 }
 0xdc3   :  { %v7714_v33 = vpop.f32.mrb[72].mxu0 }
 0xdc4   :  { %v7715_v39 = vadd.f32 %v9894_v31, %v7714_v33  ;;  %v10704_v41 = vpop.f32.mrb[73].mxu0 }
 0xdc5   :  { %v7717_v47 = vpop.f32.mrb[74].mxu0  ;;  %v11901_v41 = vld [vmem:[%s13084_s19 + $0x48] sm:$0xff]  }
 0xdc6   :  { %7725 = vrot.lane.b32.xlu0 %v7715_v39, %s12056_s7  ;;  %v10705_v14 = vpop.f32.mrb[75].mxu0  ;;  %11926 = vtanh.f32 %v7715_v39  ;;  %v11900_v39 = vld [vmem:[%s13084_s19 + $0x40] sm:$0xff]  }
 0xdd0   :  { %v12876_v32 = vpop.eup %11926 }
 0xdd1   :  { %v7721_v17 = vmul.f32 1.442695, %v12876_v32  ;;  %v7730_v33 = vsel %vm7729_vm10, %v12876_v32, 0.0 }
 0xdd3   :  { %11928 = vpow2.f32 %v7721_v17 }
 0xddd   :  { %v11929_v18 = vpop.eup %11928 }
 0xdde   :  { %v7723_v24 = vmul.f32 %v11929_v18, %v12805_v15  ;;  %v11891_v15 = vld [vmem:[%s13085_s24 + $0x28] sm:$0xff]   ;;  %v9957_v18 = vld [vmem:[%s13079_s25 + $0x1] ss:$0 sm:$0xff] }
 0xe38   :  { %v7726_v22 = vpop.permute.xlu0 %7725 }
 0xe39   :  { %v12880_v25 = vadd.f32 %v7726_v22, %v7723_v24 }
 0xe3b   :  { %v7734_v63 = vpack.c.bf16 %v12880_v25, %v12880_v25 }
 0xe3d   :  { %10715 = vmatmul.mubr.msk.bf16.vlgmr.msra.gmra.mrb[156].mxu1 %vm209_vm0, %v7734_v63  ;;  %v9958_v63 = vld [vmem:[%s13080_s29 + $0x1] ss:$0 sm:$0xff] }
 0xe3e   :  { %10738 = vmatprep.mubr.msk.bf16.mxu1 %vm12055_vm3, %v12054_v13  ;;  %10731 = vmatpush3.bf16.msra.mxu1 %v11890_v34 }
 0xe3f   :  { %10732 = vmatprep.subr.bf16.mxu1 %v12054_v13 }
 0xe42   :  { %10733 = vmatpush3.bf16.msra.mxu1 %v11891_v15 }
 0xe43   :  { %10734 = vmatprep.subr.bf16.mxu1 %v12054_v13 }
 0xe46   :  { %10735 = vmatpush3.bf16.msra.mxu1 %v11892_v28 }
 0xe47   :  { %10736 = vmatprep.subr.bf16.mxu1 %v12054_v13 }
 0xe4a   :  { %10737 = vmatpush3.bf16.msra.mxu1 %v11893_v51 }
 0xe4b   :  { %10754 = vmatprep.subr.bf16.mxu1 %v12054_v13 }
 0xf10   :  { %v7830_v11 = vpop.f32.mrb[156].mxu1 }
 0xf11   :  { %v7831_v40 = vadd.f32 %v7830_v11, %v7781_v10  ;;  %v10716_v42 = vpop.f32.mrb[157].mxu1 }
 0xf12   :  { %v7833_v43 = vpop.f32.mrb[158].mxu1  ;;  %v11905_v42 = vld [vmem:[%s13085_s24 + $0x48] sm:$0xff]  }
 0xf13   :  { %v7844_v44 = vadd.f32 %v9909_v37, %v7831_v40  ;;  %v10717_v61 = vpop.f32.mrb[159].mxu1  ;;  %v11903_v37 = vld [vmem:[%s13084_s19 + $0x58] sm:$0xff]   ;;  %v11904_v40 = vld [vmem:[%s13085_s24 + $0x40] sm:$0xff]  }
 0xf15   :  { %vm7845_vm7 = vcmp.ge.f32.partialorder %v7844_v44, 0.0  ;;  %v7846_v46 = vmul.f32 0.01, %v7844_v44 }
 0xf17   :  { %v7847_v48 = vsel %vm7845_vm7, %v7844_v44, %v7846_v46  ;;  %v9968_v44 = vld [vmem:[%s13086_s30 + $0x2] ss:$0 sm:$0xff] }
 0xf18   :  { %v7848_v50 = vpack.c.bf16 %v7847_v48, %v7847_v48 }
 0xf1a   :  { %10727 = vmatmul.mubr.msk.bf16.vlgmr.msra.gmra.mrb[76].mxu0 %vm1027_vm2, %v7848_v50 }
 0xf1b   :  { %10750 = vmatprep.mubr.msk.bf16.mxu0 %vm12055_vm3, %v12054_v13  ;;  %10743 = vmatpush3.bf16.msra.mxu0 %v11895_v52 }
 0xf1c   :  { %10744 = vmatprep.subr.bf16.mxu0 %v12054_v13 }
 0xf1f   :  { %10745 = vmatpush3.bf16.msra.mxu0 %v11896_v45 }
 0xf20   :  { %10746 = vmatprep.subr.bf16.mxu0 %v12054_v13 }
 0xf23   :  { %10747 = vmatpush3.bf16.msra.mxu0 %v11897_v59 }
 0xf24   :  { %10748 = vmatprep.subr.bf16.mxu0 %v12054_v13 }
 0xf27   :  { %10749 = vmatpush3.bf16.msra.mxu0 %v11898_v55 }
 0xf28   :  { %10766 = vmatprep.subr.bf16.mxu0 %v12054_v13 }
 0xfed   :  { %v7927_v54 = vpop.f32.mrb[76].mxu0 }
 0xfee   :  { %v7928_v62 = vadd.f32 %v9919_v53, %v7927_v54  ;;  %v10728_v36 = vpop.f32.mrb[77].mxu0  ;;  %v11906_v53 = vld [vmem:[%s13085_s24 + $0x50] sm:$0xff]   ;;  %v11907_v54 = vld [vmem:[%s13085_s24 + $0x58] sm:$0xff]  }
 0xfef   :  { %v7930_v26 = vpop.f32.mrb[78].mxu0  ;;  %v11910_v36 = vld [vmem:[%s13087_s6 + $0x48] sm:$0xff]  }
 0xff0   :  { %vm7933_vm8 = vcmp.ge.f32.partialorder %v7928_v62, 0.0  ;;  %v7934_v27 = vmul.f32 0.01, %v7928_v62  ;;  %v10729_v56 = vpop.f32.mrb[79].mxu0  ;;  %v9978_v26 = vld [vmem:[%s13088_s12 + $0x2] ss:$0 sm:$0xff] }
 0xff2   :  { %v7935_v38 = vsel %vm7933_vm8, %v7928_v62, %v7934_v27  ;;  %v11909_v62 = vld [vmem:[%s13087_s6 + $0x40] sm:$0xff]  }
 0xff3   :  { %v7936_v57 = vpack.c.bf16 %v7935_v38, %v7935_v38 }
 0xff5   :  { %10739 = vmatmul.mubr.msk.bf16.vlgmr.msra.gmra.mrb[160].mxu1 %vm1027_vm2, %v7936_v57 }
 0xff6   :  { %10755 = vmatpush3.bf16.msra.mxu1 %v11894_v58  ;;  %10756 = vmatprep.mubr.msk.bf16.mxu1 %vm12055_vm3, %v12054_v13 }
 0xff7   :  { %10760 = vmatprep.subr.bf16.mxu1 %v12054_v13 }
 0xffd   :  { %10757 = vmatmul.mubr.msk.bf16.vlgmr.msra.gmra.mrb[164].mxu1 %vm209_vm0, %v12821_v1 }
 0xffe   :  { %10762 = vmatprep.mubr.msk.bf16.mxu1 %vm12055_vm3, %v12054_v13  ;;  %10761 = vmatpush3.bf16.msra.mxu1 %v11899_v19 }
 0xfff   :  { %10778 = vmatprep.subr.bf16.mxu1 %v12054_v13 }
0x10c8   :  { %v8015_v60 = vpop.f32.mrb[160].mxu1 }
0x10c9   :  { %v8016_v0 = vadd.f32 %v9934_v35, %v8015_v60  ;;  %v10740_v3 = vpop.f32.mrb[161].mxu1  ;;  %v11908_v35 = vld [vmem:[%s13082_s8 + $0x18] sm:$0xff]  }
0x10ca   :  { %v8018_v5 = vpop.f32.mrb[162].mxu1  ;;  %v11912_v3 = vld [vmem:[%s13087_s6 + $0x58] sm:$0xff]  }
0x10cb   :  { %vm8021_vm9 = vcmp.ge.f32.partialorder %v8016_v0, 0.0  ;;  %v8022_v7 = vmul.f32 0.01, %v8016_v0  ;;  %v10741_v2 = vpop.f32.mrb[163].mxu1  ;;  %v9993_v5 = vld [vmem:[%s13089_s28 + $0x2] ss:$0 sm:$0xff] }
0x10cd   :  { %v8023_v4 = vsel %vm8021_vm9, %v8016_v0, %v8022_v7  ;;  %v11911_v0 = vld [vmem:[%s13087_s6 + $0x50] sm:$0xff]  }
0x10ce   :  { %v8024_v8 = vpack.c.bf16 %v8023_v4, %v8023_v4 }
0x10d0   :  { %10751 = vmatmul.mubr.msk.bf16.vlgmr.msra.gmra.mrb[80].mxu0 %vm1027_vm2, %v8024_v8  ;;  %v8190_v12 = vpop.f32.mrb[164].mxu1 }
0x10d1   :  { %v10758_v6 = vpop.f32.mrb[165].mxu1  ;;  %10774 = vmatprep.mubr.msk.bf16.mxu0 %vm12055_vm3, %v12054_v13  ;;  %10767 = vmatpush3.bf16.msra.mxu0 %v11900_v39 }
0x10d2   :  { %v8193_v9 = vpop.f32.mrb[166].mxu1  ;;  %10768 = vmatprep.subr.bf16.mxu0 %v12054_v13 }
0x10d3   :  { %v10759_v10 = vpop.f32.mrb[167].mxu1 }
0x10d5   :  { %10769 = vmatpush3.bf16.msra.mxu0 %v11901_v41 }
0x10d6   :  { %10770 = vmatprep.subr.bf16.mxu0 %v12054_v13 }
0x11a3   :  { %v8103_v49 = vpop.f32.mrb[80].mxu0 }
0x11a4   :  { %v8104_v20 = vadd.f32 %v9949_v16, %v8103_v49  ;;  %v10752_v21 = vpop.f32.mrb[81].mxu0 }
0x11a5   :  { %v8106_v23 = vpop.f32.mrb[82].mxu0  ;;  %v10008_v21 = vld [vmem:[%s13090_s2 + $0x2] ss:$0 sm:$0xff] }
0x11a6   :  { %8114 = vrot.lane.b32.xlu0 %v8104_v20, %s12056_s7  ;;  %v10753_v31 = vpop.f32.mrb[83].mxu0  ;;  %11930 = vtanh.f32 %v8104_v20  ;;  %v11913_v20 = vld [vmem:[%s13081_s3 + $0x18] sm:$0xff]  }
0x11b0   :  { %v12935_v47 = vpop.eup %11930 }
0x11b1   :  { %v8110_v14 = vmul.f32 1.442695, %v12935_v47 }
0x11b3   :  { %11932 = vpow2.f32 %v8110_v14 }
0x11bd   :  { %v11933_v17 = vpop.eup %11932 }
0x11be   :  { %v8112_v32 = vmul.f32 %v11933_v17, %v12880_v25  ;;  %v11902_v25 = vld [vmem:[%s13084_s19 + $0x50] sm:$0xff]  }
0x11bf   :  { %10771 = vmatpush3.bf16.msra.mxu0 %v11902_v25  ;;  %v11917_v25 = vld [vmem:[%s13084_s19 + $0x78] sm:$0xff]  }
0x11c0   :  { %10772 = vmatprep.subr.bf16.mxu0 %v12054_v13 }
0x11c3   :  { %10773 = vmatpush3.bf16.msra.mxu0 %v11903_v37  ;;  %v11918_v37 = vld [vmem:[%s13085_s24 + $0x60] sm:$0xff]  }
0x11c4   :  { %10790 = vmatprep.subr.bf16.mxu0 %v12054_v13 }
0x11c5   :  { %7731 = vadd.xlane.f32.xlu0 %v7730_v33 }
0x1218   :  { %v8115_v24 = vpop.permute.xlu0 %8114 }
0x1219   :  { %v8117_v22 = vadd.f32 %v8115_v24, %v8112_v32  ;;  %v11914_v32 = vld [vmem:[%s13084_s19 + $0x60] sm:$0xff]  }
0x121b   :  { %v8132_v29 = vadd.f32 %v9957_v18, %v8117_v22  ;;  %v11915_v18 = vld [vmem:[%s13084_s19 + $0x68] sm:$0xff]  }
0x121d   :  { %v8139_v30 = vmul.f32 %v9958_v63, %v8132_v29 }
0x121f   :  { %vm8140_vm11 = vcmp.ge.f32.partialorder %v8139_v30, 0.0  ;;  %v8141_v34 = vmul.f32 0.9, %v8139_v30 }
0x1221   :  { %v12941_v15 = vsel %vm8140_vm11, %v8139_v30, %v8141_v34 }
0x1222   :  { %v8143_v11 = vpack.c.bf16 %v12941_v15, %v12941_v15 }
0x1224   :  { %10763 = vmatmul.mubr.msk.bf16.vlgmr.msra.gmra.mrb[168].mxu1 %vm209_vm0, %v8143_v11  ;;  %v11916_v11 = vld [vmem:[%s13084_s19 + $0x70] sm:$0xff]  }
0x1225   :  { %10786 = vmatprep.mubr.msk.bf16.mxu1 %vm12055_vm3, %v12054_v13  ;;  %10779 = vmatpush3.bf16.msra.mxu1 %v11904_v40 }
0x1226   :  { %10780 = vmatprep.subr.bf16.mxu1 %v12054_v13 }
0x1229   :  { %10781 = vmatpush3.bf16.msra.mxu1 %v11905_v42  ;;  %v10023_v42 = vld [vmem:[%s13086_s30 + $0x3] ss:$0 sm:$0xff] }
0x122a   :  { %10782 = vmatprep.subr.bf16.mxu1 %v12054_v13 }
0x122d   :  { %10783 = vmatpush3.bf16.msra.mxu1 %v11906_v53  ;;  %v11922_v53 = vld [vmem:[%s13087_s6 + $0x60] sm:$0xff]  }
0x122e   :  { %10784 = vmatprep.subr.bf16.mxu1 %v12054_v13 }
0x1231   :  { %10785 = vmatpush3.bf16.msra.mxu1 %v11907_v54  ;;  %v11923_v54 = vld [vmem:[%s13087_s6 + $0x68] sm:$0xff]  }
0x1232   :  { %10802 = vmatprep.subr.bf16.mxu1 %v12054_v13 }
0x12f7   :  { %v8239_v43 = vpop.f32.mrb[168].mxu1 }
0x12f8   :  { %v8240_v61 = vadd.f32 %v8239_v43, %v8190_v12  ;;  %v10764_v46 = vpop.f32.mrb[169].mxu1 }
0x12f9   :  { %v8242_v48 = vpop.f32.mrb[170].mxu1 }
0x12fa   :  { %v8253_v50 = vadd.f32 %v9968_v44, %v8240_v61  ;;  %v10765_v28 = vpop.f32.mrb[171].mxu1 }
0x12fc   :  { %vm8254_vm12 = vcmp.ge.f32.partialorder %v8253_v50, 0.0  ;;  %v8255_v51 = vmul.f32 0.01, %v8253_v50 }
0x12fe   :  { %v8256_v52 = vsel %vm8254_vm12, %v8253_v50, %v8255_v51 }
0x12ff   :  { %v8257_v45 = vpack.c.bf16 %v8256_v52, %v8256_v52  ;;  %v11920_v52 = vld [vmem:[%s13085_s24 + $0x70] sm:$0xff]  }
0x1301   :  { %10775 = vmatmul.mubr.msk.bf16.vlgmr.msra.gmra.mrb[84].mxu0 %vm1027_vm2, %v8257_v45  ;;  %v11921_v45 = vld [vmem:[%s13085_s24 + $0x78] sm:$0xff]  }
0x1302   :  { %10798 = vmatprep.mubr.msk.bf16.mxu0 %vm12055_vm3, %v12054_v13  ;;  %10791 = vmatpush3.bf16.msra.mxu0 %v11909_v62  ;;  %v10033_v62 = vld [vmem:[%s13088_s12 + $0x3] ss:$0 sm:$0xff] }
0x1303   :  { %10792 = vmatprep.subr.bf16.mxu0 %v12054_v13 }
0x1306   :  { %10793 = vmatpush3.bf16.msra.mxu0 %v11910_v36 }
0x1307   :  { %10794 = vmatprep.subr.bf16.mxu0 %v12054_v13 }
0x130a   :  { %10795 = vmatpush3.bf16.msra.mxu0 %v11911_v0 }
0x130b   :  { %10796 = vmatprep.subr.bf16.mxu0 %v12054_v13 }
0x130e   :  { %10797 = vmatpush3.bf16.msra.mxu0 %v11912_v3 }
0x130f   :  { %10814 = vmatprep.subr.bf16.mxu0 %v12054_v13 }
0x13d4   :  { %v8336_v27 = vpop.f32.mrb[84].mxu0 }
0x13d5   :  { %v8337_v56 = vadd.f32 %v9978_v26, %v8336_v27  ;;  %v10776_v38 = vpop.f32.mrb[85].mxu0 }
0x13d6   :  { %v8339_v58 = vpop.f32.mrb[86].mxu0 }
0x13d7   :  { %vm8342_vm13 = vcmp.ge.f32.partialorder %v8337_v56, 0.0  ;;  %v8343_v57 = vmul.f32 0.01, %v8337_v56  ;;  %v10777_v59 = vpop.f32.mrb[87].mxu0 }
0x13d9   :  { %v8344_v55 = vsel %vm8342_vm13, %v8337_v56, %v8343_v57 }
0x13da   :  { %v8345_v60 = vpack.c.bf16 %v8344_v55, %v8344_v55  ;;  %v11924_v55 = vld [vmem:[%s13087_s6 + $0x70] sm:$0xff]  }
0x13dc   :  { %10787 = vmatmul.mubr.msk.bf16.vlgmr.msra.gmra.mrb[172].mxu1 %vm1027_vm2, %v8345_v60  ;;  %v10048_v60 = vld [vmem:[%s13089_s28 + $0x3] ss:$0 sm:$0xff] }
0x13dd   :  { %10803 = vmatpush3.bf16.msra.mxu1 %v11908_v35  ;;  %10804 = vmatprep.mubr.msk.bf16.mxu1 %vm12055_vm3, %v12054_v13  ;;  %v11925_v35 = vld [vmem:[%s13087_s6 + $0x78] sm:$0xff]  }
0x13de   :  { %10808 = vmatprep.subr.bf16.mxu1 %v12054_v13 }
0x13e4   :  { %10805 = vmatmul.mubr.msk.bf16.vlgmr.msra.gmra.mrb[176].mxu1 %vm209_vm0, %v12821_v1 }
0x13e5   :  { %10810 = vmatprep.mubr.msk.bf16.mxu1 %vm12055_vm3, %v12054_v13  ;;  %10809 = vmatpush3.bf16.msra.mxu1 %v11913_v20 }
0x13e6   :  { %10826 = vmatprep.subr.bf16.mxu1 %v12054_v13 }
0x14af   :  { %v8424_v7 = vpop.f32.mrb[172].mxu1 }
0x14b0   :  { %v8425_v2 = vadd.f32 %v9993_v5, %v8424_v7  ;;  %v10788_v4 = vpop.f32.mrb[173].mxu1 }
0x14b1   :  { %v8427_v8 = vpop.f32.mrb[174].mxu1 }
0x14b2   :  { %vm8430_vm14 = vcmp.ge.f32.partialorder %v8425_v2, 0.0  ;;  %v8431_v1 = vmul.f32 0.01, %v8425_v2  ;;  %v10789_v12 = vpop.f32.mrb[175].mxu1 }
0x14b3   :  { %v8919_v12 = vld [vmem:[%s12217_s9] sm:$0xff] }
0x14b4   :  { %v8432_v6 = vsel %vm8430_vm14, %v8425_v2, %v8431_v1 }
0x14b5   :  { %v8433_v9 = vpack.c.bf16 %v8432_v6, %v8432_v6  ;;  %v8920_v6 = vld [vmem:[%s12217_s9 + $0x8] sm:$0xff]  ;;  %s12058_s9 = smov [#allocation8]  }
0x14b6   :  { %s9003_s10 = sshll.u32 %s12058_s9, 4  ;;  %s9004_s10 = int_to_ptr.vmem [resolvable:$true] %s9003_s10 }
0x14b7   :  { %10799 = vmatmul.mubr.msk.bf16.vlgmr.msra.gmra.mrb[88].mxu0 %vm1027_vm2, %v8433_v9  ;;  %v8578_v10 = vpop.f32.mrb[176].mxu1  ;;  %v12057_v9 = vmov 0.0|0.0   ;;  %s11986_s11 = scalar_lea.vmem %s9004_s10, 32  ;;  %p11991_p3 = scmp.lt.s32.totalorder %s9004_s10, %s9004_s10 }
0x14b8   :  { %v10806_v16 = vpop.f32.mrb[177].mxu1  ;;  %10822 = vmatprep.mubr.msk.bf16.mxu0 %vm12055_vm3, %v12054_v13  ;;  %10815 = vmatpush3.bf16.msra.mxu0 %v11914_v32  ;;  %p11987_p2 = scmp.ne.s32.totalorder %s9004_s10, %s11986_s11  ;;  %p11992_p4 = scmp.lt.s32.totalorder %s11986_s11, %s11986_s11 }
0x14b9   :  { %v8581_v19 = vpop.f32.mrb[178].mxu1  ;;  %10816 = vmatprep.subr.bf16.mxu0 %v12054_v13 }
0x14ba   :  { %v10807_v49 = vpop.f32.mrb[179].mxu1  ;;  %p11993_p5 = por %p11992_p4, %p11991_p3 }
0x14bc   :  { %10817 = vmatpush3.bf16.msra.mxu0 %v11915_v18  ;;  %v9874_v18 = vld [vmem:[#allocation2] ss:$0 sm:$0xff]  ;;  %p11994_p6 = pnand %p11993_p5, %p11987_p2 }
0x14bd   :  { %10818 = vmatprep.subr.bf16.mxu0 %v12054_v13 }
0x14c0   :  { %10819 = vmatpush3.bf16.msra.mxu0 %v11916_v11 }
0x14c1   :  { %10820 = vmatprep.subr.bf16.mxu0 %v12054_v13 }
0x14c4   :  { %10821 = vmatpush3.bf16.msra.mxu0 %v11917_v25 }
0x14c5   :  { %10838 = vmatprep.subr.bf16.mxu0 %v12054_v13 }
0x158a   :  { %v8512_v23 = vpop.f32.mrb[88].mxu0 }
0x158b   :  { %v8513_v31 = vadd.f32 %v10008_v21, %v8512_v23  ;;  %v10800_v33 = vpop.f32.mrb[89].mxu0 }
0x158c   :  { %v8515_v39 = vpop.f32.mrb[90].mxu0  ;;  %v8118_v33 = vsel %vm7729_vm10, %v12935_v47, 0.0 }
0x158d   :  { %11934 = vtanh.f32 %v8513_v31  ;;  %8523 = vrot.lane.b32.xlu1 %v8513_v31, %s12056_s7  ;;  %v10801_v41 = vpop.f32.mrb[91].mxu0 }
0x1597   :  { %v11935_v14 = vpop.eup %11934 }
0x1598   :  { %v8527_v17 = vsel %vm7729_vm10, %v11935_v14, 0.0  ;;  %v8519_v24 = vmul.f32 1.442695, %v11935_v14 }
0x1599   :  { %8528 = vadd.xlane.f32.xlu0 %v8527_v17 }
0x159a   :  { %11936 = vpow2.f32 %v8519_v24  ;;  %v7732_v24 = vpop.xlane.xlu0 %7731 }
0x15a4   :  { %v11937_v22 = vpop.eup %11936 }
0x15a5   :  { %v8521_v63 = vmul.f32 %v11937_v22, %v12941_v15  ;;  %v11919_v15 = vld [vmem:[%s13085_s24 + $0x68] sm:$0xff]   ;;  %v7733_v22 = vadd.f32 %v9874_v18, %v7732_v24 }
0x15ff   :  { %v8524_v29 = vpop.permute.xlu1 %8523 }
0x1600   :  { %v12996_v30 = vadd.f32 %v8524_v29, %v8521_v63 }
0x1602   :  { %v8531_v34 = vpack.c.bf16 %v12996_v30, %v12996_v30 }
0x1604   :  { %10811 = vmatmul.mubr.msk.bf16.vlgmr.msra.gmra.mrb[180].mxu1 %vm209_vm0, %v8531_v34 }
0x1605   :  { %10834 = vmatprep.mubr.msk.bf16.mxu1 %vm12055_vm3, %v12054_v13  ;;  %10827 = vmatpush3.bf16.msra.mxu1 %v11918_v37 }
0x1606   :  { %10828 = vmatprep.subr.bf16.mxu1 %v12054_v13 }
0x1609   :  { %10829 = vmatpush3.bf16.msra.mxu1 %v11919_v15 }
0x160a   :  { %10830 = vmatprep.subr.bf16.mxu1 %v12054_v13 }
0x160d   :  { %10831 = vmatpush3.bf16.msra.mxu1 %v11920_v52 }
0x160e   :  { %10832 = vmatprep.subr.bf16.mxu1 %v12054_v13 }
0x1611   :  { %10833 = vmatpush3.bf16.msra.mxu1 %v11921_v45 }
0x1612   :  { %10857 = vmatprep.subr.bf16.mxu1 %v12057_v9 }
0x1626   :  { %v8529_v63 = vpop.xlane.xlu0 %8528 }
0x16d7   :  { %v8627_v40 = vpop.f32.mrb[180].mxu1 }
0x16d8   :  { %v8628_v43 = vadd.f32 %v8627_v40, %v8578_v10  ;;  %v10812_v44 = vpop.f32.mrb[181].mxu1  ;;  %v10063_v10 = vld [vmem:[%s13090_s2 + $0x3] ss:$0 sm:$0xff] }
0x16d9   :  { %v8630_v61 = vpop.f32.mrb[182].mxu1 }
0x16da   :  { %v8641_v46 = vadd.f32 %v10023_v42, %v8628_v43  ;;  %v10813_v48 = vpop.f32.mrb[183].mxu1 }
0x16dc   :  { %vm8642_vm15 = vcmp.ge.f32.partialorder %v8641_v46, 0.0  ;;  %v8643_v50 = vmul.f32 0.01, %v8641_v46 }
0x16de   :  { %v8644_v28 = vsel %vm8642_vm15, %v8641_v46, %v8643_v50 }
0x16df   :  { %v8645_v51 = vpack.c.bf16 %v8644_v28, %v8644_v28 }
0x16e1   :  { %10823 = vmatmul.mubr.msk.bf16.vlgmr.msra.gmra.mrb[92].mxu0 %vm1027_vm2, %v8645_v51 }
0x16e2   :  { %10846 = vmatprep.mubr.msk.bf16.mxu0 %vm12055_vm3, %v12054_v13  ;;  %10839 = vmatpush3.bf16.msra.mxu0 %v11922_v53 }
0x16e3   :  { %10840 = vmatprep.subr.bf16.mxu0 %v12054_v13 }
0x16e6   :  { %10841 = vmatpush3.bf16.msra.mxu0 %v11923_v54 }
0x16e7   :  { %10842 = vmatprep.subr.bf16.mxu0 %v12054_v13 }
0x16ea   :  { %10843 = vmatpush3.bf16.msra.mxu0 %v11924_v55 }
0x16eb   :  { %10844 = vmatprep.subr.bf16.mxu0 %v12054_v13 }
0x16ee   :  { %10845 = vmatpush3.bf16.msra.mxu0 %v11925_v35 }
0x17b4   :  { %v8724_v36 = vpop.f32.mrb[92].mxu0 }
0x17b5   :  { %v8725_v26 = vadd.f32 %v10033_v62, %v8724_v36  ;;  %v10824_v27 = vpop.f32.mrb[93].mxu0 }
0x17b6   :  { %v8727_v56 = vpop.f32.mrb[94].mxu0 }
0x17b7   :  { %vm8730_vm1 = vcmp.ge.f32.partialorder %v8725_v26, 0.0  ;;  %v8731_v38 = vmul.f32 0.01, %v8725_v26  ;;  %v10825_v58 = vpop.f32.mrb[95].mxu0 }
0x17b9   :  { %v8732_v57 = vsel %vm8730_vm1, %v8725_v26, %v8731_v38 }
0x17ba   :  { %v8733_v59 = vpack.c.bf16 %v8732_v57, %v8732_v57 }
0x17bc   :  { %10835 = vmatmul.mubr.msk.bf16.vlgmr.msra.gmra.mrb[184].mxu1 %vm1027_vm2, %v8733_v59 }
0x17bd   :  { %10854 = vmatprep.mubr.msk.f32.mxu1 %vm12055_vm3, %v12054_v13  ;;  %v10858_v13 = vpack.c.bf16 %v8920_v6, %v8919_v12 }
0x17bf   :  { %10859 = vmatpush3.bf16.msra.mxu1 %v10858_v13 }
0x188f   :  { %v8812_v0 = vpop.f32.mrb[184].mxu1 }
0x1890   :  { %v8813_v3 = vadd.f32 %v10048_v60, %v8812_v0  ;;  %v10836_v5 = vpop.f32.mrb[185].mxu1 }
0x1891   :  { %v8815_v7 = vpop.f32.mrb[186].mxu1 }
0x1892   :  { %vm8818_vm4 = vcmp.ge.f32.partialorder %v8813_v3, 0.0  ;;  %v8819_v2 = vmul.f32 0.01, %v8813_v3  ;;  %v10837_v4 = vpop.f32.mrb[187].mxu1 }
0x1894   :  { %v8820_v8 = vsel %vm8818_vm4, %v8813_v3, %v8819_v2 }
0x1895   :  { %v8821_v1 = vpack.c.bf16 %v8820_v8, %v8820_v8 }
0x1897   :  { %10847 = vmatmul.mubr.msk.bf16.vlgmr.msra.gmra.mrb[96].mxu0 %vm1027_vm2, %v8821_v1  ;;  %vm8995_vm2 = vcmask 1024  }
0x196a   :  { %v8900_v16 = vpop.f32.mrb[96].mxu0 }
0x196b   :  { %v8901_v19 = vadd.f32 %v10063_v10, %v8900_v16  ;;  %v10848_v49 = vpop.f32.mrb[97].mxu0 }
0x196c   :  { %v8903_v20 = vpop.f32.mrb[98].mxu0 }
0x196d   :  { %11938 = vtanh.f32 %v8901_v19  ;;  %8911 = vrot.lane.b32.xlu1 %v8901_v19, %s12056_s7  ;;  %v10849_v21 = vpop.f32.mrb[99].mxu0 }
0x1977   :  { %v11939_v23 = vpop.eup %11938 }
0x1978   :  { %v8915_v31 = vsel %vm7729_vm10, %v11939_v23, 0.0  ;;  %v8907_v39 = vmul.f32 1.442695, %v11939_v23 }
0x1979   :  { %8916 = vadd.xlane.f32.xlu0 %v8915_v31 }
0x197a   :  { %11940 = vpow2.f32 %v8907_v39 }
0x1984   :  { %v11941_v41 = vpop.eup %11940 }
0x1985   :  { %v8909_v14 = vmul.f32 %v11941_v41, %v12996_v30 }
0x1991   :  { %8119 = vadd.xlane.f32.xlu1 %v8118_v33 }
0x19df   :  { %v8912_v17 = vpop.permute.xlu1 %8911 }
0x19e0   :  { %v8914_v32 = vadd.f32 %v8912_v17, %v8909_v14 }
0x19e2   :  { %10855 = vmatmul.mubr.msk.f32.vlgmr.msra.gmra.mrb[188].mxu1 %vm209_vm0, %v8914_v32 }
0x1a06   :  { %v8917_v25 = vpop.xlane.xlu0 %8916 }
0x1a1e   :  { %v8120_v29 = vpop.xlane.xlu1 %8119 }
0x1a1f   :  { %v8121_v34 = vadd.f32 %v8120_v29, %v7733_v22 }
0x1a21   :  { %v8530_v11 = vadd.f32 %v8529_v63, %v8121_v34 }
0x1a23   :  { %v8918_v47 = vadd.f32 %v8917_v25, %v8530_v11 }
0x1a25   :  { %8996 = vst.msk [vmem:[%s12230_s4] sm:$0x3] %vm8995_vm2, %v8918_v47 }
0x1ab5   :  { %v8990_v37 = vpop.f32.mrb[188].mxu1 }
0x1ab6   :  { %8994 = vst.msk [vmem:[#allocation8] sm:$0x3] %vm7729_vm10, %v8990_v37  ;;  %v10856_v30 = vpop.f32.mrb[189].mxu1 }
0x1ab7   :  { %11997 = shalt.err (!%p11994_p6)
}
0x1ab8   :  { %s11998_s15 = scalar_lea.hbm %s12225_s27, 32 }
0x1ab9   :  { %p11999_p7 = scmp.ne.s32.totalorder %s12225_s27, %s11998_s15  ;;  %p12002_p8 = scmp.lt.u32.totalorder %s11998_s15, %s12225_s27 }
0x1abb   :  { %p12004_p9 = pnand %p12002_p8, %p11999_p7 }
0x1abd   :  { %12007 = shalt.err (!%p12004_p9)
}
0x1abe   :  { %9006 = dma.vmem_to_hbm [thread:$0]  %s9004_s10, 32, %s12225_s27, [#allocation5]  }
0x1abf   :  { %12012 = dma.done.wait [#allocation5], 32  }
0x1ac0   :  { %12013 = vsyncadd [#allocation5], 4294967264 }
0x1ac1   :  { %9014 = vsyncpa [#allocation4], 1 }
0x1ac2   :  { %9015 = vsyncpa [#allocation7], 1 }
0x1ac3   :  { %9016 = vsyncpa [#allocation5], 1 }

</bundles_post_ra>
